<compile_context>
chip_gen: v5e
topology: v5e:2x2
jax: 0.10.0
libtpu: 0.0.40
codegen_flags: <defaults>
</compile_context>

<pallas_src>
import functools

import jax
import jax.numpy as jnp
from jax.experimental import pallas as pl
from jax.experimental.pallas import tpu as pltpu

H_HIDDEN = 128   # feats_hidden (forced by TCN(128, [256]))
C_TCN = 256      # TCN channel width
K_SIZE = 3       # TCN kernel size
LANE = 128       # TPU lane width (used for lane-dense output padding)


# ---------------------------------------------------------------------------
# Fused kernel (one grid step == one scene)
# ---------------------------------------------------------------------------
def _make_fused_kernel(obs_length, pred_length, feats_in, feats_out, agents):
    L, P, N, K = obs_length, pred_length, agents, K_SIZE
    LN, PN = L * N, P * N
    H, C = H_HIDDEN, C_TCN

    # Static row offsets inside the stacked parameter slabs (see pack_params).
    R_B1, R_B2, R_T1B1, R_T1B2, R_T1BD, R_T2B1, R_T2B2, R_B3, R_W1 = range(9)
    O_T1WD = 0                    # tcn1 1x1 downsample  (128, 256)
    O_T1W1 = O_T1WD + H           # tcn1 conv1 im2col    (K*128, 256)
    O_T1W2 = O_T1W1 + K * H       # tcn1 conv2 im2col    (K*256, 256)
    O_T2W1 = O_T1W2 + K * C       # tcn2 conv1 im2col
    O_T2W2 = O_T2W1 + K * C       # tcn2 conv2 im2col
    O_W2 = 0                      # project2             (128, 128)
    O_W3 = O_W2 + H               # project3 lane-padded (256, 128)

    def kernel(x_ref, tar_ref, scal_ref, w256_ref, w128_ref, tra_ref, loss_ref):
        def mm(a_bf16, w_bf16):                         # MXU, f32 accumulate
            return jnp.dot(a_bf16, w_bf16, preferred_element_type=jnp.float32)

        def causal_conv_relu(x2d, t, w_off, ci, b_row):
            # x2d: (t*N, ci) f32, rows time-major.  Causal K-tap conv (== torch
            # pad+chomp) as ONE im2col MXU matmul.  Taps are row-shifts by N
            # (one f32 sublane group -> tile-aligned slices); each shifted view
            # is cast to bf16 so the lane-concat / (t*N, K*ci) cols temporary is
            # half-width (review item 4).
            # TODO(synk): on v5e a matmul-then-shift formulation (review item 5)
            # would remove these concats entirely; kept im2col for simplicity.
            xp = jnp.concatenate(
                [jnp.zeros(((K - 1) * N, ci), jnp.float32), x2d], axis=0)
            cols = jnp.concatenate(
                [xp[k * N:k * N + t * N, :].astype(jnp.bfloat16) for k in range(K)],
                axis=-1)                                 # (t*N, K*ci) bf16
            y = mm(cols, w256_ref[w_off:w_off + K * ci, :]) \
                + scal_ref[b_row:b_row + 1, :]
            return jnp.maximum(y, 0.0)                   # (t*N, C) f32

        # ---- project1 on the VPU: (LN, feats_in)@(feats_in, 128) would use only
        #      feats_in of 128+ MXU contraction lanes; broadcast FMAs are cheaper.
        x = x_ref[...]                                   # (LN, feats_in) f32
        h = scal_ref[R_B1:R_B1 + 1, :H]
        for f in range(feats_in):                        # static, tiny
            h = h + x[:, f:f + 1] * scal_ref[R_W1 + f:R_W1 + f + 1, :H]
        h = jnp.maximum(h, 0.0)                          # (LN, 128)

        # ---- project2 (MXU)
        h = jnp.maximum(
            mm(h.astype(jnp.bfloat16), w128_ref[O_W2:O_W2 + H, :])
            + scal_ref[R_B2:R_B2 + 1, :H], 0.0)          # (LN, 128)

        # ---- TemporalBlock 1 (128 -> 256): conv->relu x2 + 1x1-downsample residual
        res1 = mm(h.astype(jnp.bfloat16), w256_ref[O_T1WD:O_T1WD + H, :]) \
               + scal_ref[R_T1BD:R_T1BD + 1, :]          # (LN, 256)
        c1 = causal_conv_relu(h, L, O_T1W1, H, R_T1B1)   # (LN, 256)
        c2 = causal_conv_relu(c1, L, O_T1W2, C, R_T1B2)  # (LN, 256)
        out1 = jnp.maximum(c2 + res1, 0.0)               # (LN, 256)

        # ---- last observed step repeated pred_length times (VMEM values only)
        rep = jnp.tile(out1[LN - N:LN, :], (P, 1))       # (PN, 256)
        # TODO(synk): all `rep` time rows are identical, so tcn2-conv1 taps could
        # share one matmul result; skipped -- PN is tiny.

        # ---- TemporalBlock 2 (256 -> 256, identity residual)
        d1 = causal_conv_relu(rep, P, O_T2W1, C, R_T2B1)
        d2 = causal_conv_relu(d1, P, O_T2W2, C, R_T2B2)
        out2 = jnp.maximum(d2 + rep, 0.0)                # (PN, 256)

        # ---- project3 into a lane-dense 128-wide slab (cols >= feats_out are
        #      exactly 0 because W3/b3 are zero-padded), fused trajectory loss.
        tra = mm(out2.astype(jnp.bfloat16), w128_ref[O_W3:O_W3 + C, :]) \
              + scal_ref[R_B3:R_B3 + 1, :LANE]           # (PN, 128)
        tra_ref[...] = tra

        # TODO(synk): Traj_loss is not defined in the provided source; implemented as
        # mean Euclidean (ADE) loss.  tar is zero-padded to 128 lanes so the lane
        # reduction needs no sub-lane slicing.
        d = tra - tar_ref[...]
        dist = jnp.sqrt(jnp.sum(d * d, axis=-1, keepdims=True))   # (PN, 1)
        loss_ref[...] = jnp.mean(dist).reshape(1, 1)
        # TODO(synk): an SMEM (1,1) out-spec (review item 8) would avoid this padded
        # scalar tile; kept in VMEM for lowering safety.

    return kernel


# ---------------------------------------------------------------------------
# Wrapper
# ---------------------------------------------------------------------------
def t_cnn_forward(x, tar_pad, packed, *, obs_length, pred_length,
                  feats_in, feats_out, agents):
    """Batched fused forward.

    x:       (B, obs_length*agents, feats_in)  f32
    tar_pad: (B, pred_length*agents, 128)      f32 (zero lane-padded targets)
    packed:  (scal, w256, w128) parameter slabs from pack_params.
    Returns  tra (B, pred_length, agents, feats_out), per-scene loss (B,).
    """
    scal, w256, w128 = packed
    B = x.shape[0]
    LN = obs_length * agents
    PN = pred_length * agents
    kernel = _make_fused_kernel(obs_length, pred_length, feats_in, feats_out, agents)

    const = lambda b: (0, 0)   # weight slabs: DMA'd once, resident across the grid
    tra_pad, loss = pl.pallas_call(
        kernel,
        grid=(B,),
        out_shape=(jax.ShapeDtypeStruct((B, PN, LANE), jnp.float32),
                   jax.ShapeDtypeStruct((B, 1, 1), jnp.float32)),
        in_specs=[
            pl.BlockSpec((None, LN, feats_in), lambda b: (b, 0, 0)),
            pl.BlockSpec((None, PN, LANE), lambda b: (b, 0, 0)),
            pl.BlockSpec(scal.shape, const),
            pl.BlockSpec(w256.shape, const),
            pl.BlockSpec(w128.shape, const),
        ],
        out_specs=(
            pl.BlockSpec((None, PN, LANE), lambda b: (b, 0, 0)),
            pl.BlockSpec((None, 1, 1), lambda b: (b, 0, 0)),
        ),
        compiler_params=pltpu.CompilerParams(
            dimension_semantics=("parallel",)),   # shards batch across v7x's 2 TCs
    )(x, tar_pad, scal, w256, w128)

    tra = tra_pad[..., :feats_out].reshape(B, pred_length, agents, feats_out)
    return tra, loss[:, 0, 0]


def prepare_inputs(scenes, obs_length, pred_length, feats_in, feats_out):
    """scenes: (B, T, agents, Fraw) == a batch of torch `inputs[0]` tensors."""
    B, T, N, _ = scenes.shape
    assert T == obs_length + pred_length
    x = scenes[:, :obs_length, :, :feats_in].reshape(B, obs_length * N, feats_in)
    tar = scenes[:, obs_length:, :, :feats_out].reshape(B, pred_length * N, feats_out)
    tar_pad = jnp.pad(tar, ((0, 0), (0, 0), (0, LANE - feats_out)))
    return x, tar_pad, tar


def pack_params(p, feats_out):
    """Pack all parameters into 3 slabs (3 DMAs instead of 16).

    scal (8+feats_in, 256) f32 : rows = b1,b2,t1b1,t1b2,t1bd,t2b1,t2b2,b3(padded),
                                 then project1 weight rows (each zero-padded to 256).
    w256 (2816, 256) bf16      : [t1.Wd | t1.W1 | t1.W2 | t2.W1 | t2.W2] row-stacked;
                                 conv weights in im2col (K*Cin, Cout) layout, i.e.
                                 torch (Cout,Cin,K).permute(2,1,0).reshape(K*Cin,Cout).
    w128 (384, 128) bf16       : [W2 | W3 zero-padded to 128 output cols] row-stacked.
    NOTE: if the torch TCN uses weight_norm, g/||v|| must be folded by the caller.
    """
    H, C = H_HIDDEN, C_TCN

    def row(a, width=C):
        a = a.reshape(1, -1).astype(jnp.float32)
        return jnp.pad(a, ((0, 0), (0, width - a.shape[1])))

    t1, t2 = p["tcn1"], p["tcn2"]
    scal = jnp.concatenate(
        [row(p["b1"]), row(p["b2"]), row(t1["b1"]), row(t1["b2"]), row(t1["bd"]),
         row(t2["b1"]), row(t2["b2"]), row(p["b3"])]
        + [row(p["W1"][f]) for f in range(p["W1"].shape[0])], axis=0)

    def cw(a):   # (K, Cin, Cout) -> (K*Cin, Cout)
        return a.reshape(-1, a.shape[-1])

    w256 = jnp.concatenate(
        [t1["Wd"], cw(t1["W1"]), cw(t1["W2"]), cw(t2["W1"]), cw(t2["W2"])],
        axis=0).astype(jnp.bfloat16)

    w3_pad = jnp.pad(p["W3"], ((0, 0), (0, LANE - feats_out)))
    w128 = jnp.concatenate([p["W2"], w3_pad], axis=0).astype(jnp.bfloat16)
    return scal, w256, w128


# ---------------------------------------------------------------------------
# Deterministic synthetic parameters + pure-JAX reference (same bf16 precision)
# ---------------------------------------------------------------------------
def init_params(key, feats_in, feats_out, H=H_HIDDEN, C=C_TCN, K=K_SIZE):
    keys = jax.random.split(key, 16)

    def w(k, shape, scale):
        return jax.random.normal(k, shape, jnp.float32) * scale

    return {
        "W1": w(keys[0], (feats_in, H), 0.3),  "b1": w(keys[1], (1, H), 0.1),
        "W2": w(keys[2], (H, H), 0.05),        "b2": w(keys[3], (1, H), 0.1),
        "W3": w(keys[4], (2 * H, feats_out), 0.05), "b3": w(keys[5], (1, feats_out), 0.1),
        "tcn1": {
            "W1": w(keys[6], (K, H, C), 0.05), "b1": w(keys[7], (1, C), 0.1),
            "W2": w(keys[8], (K, C, C), 0.03), "b2": w(keys[9], (1, C), 0.1),
            "Wd": w(keys[10], (H, C), 0.05),   "bd": w(keys[11], (1, C), 0.1),
        },
        "tcn2": {
            "W1": w(keys[12], (K, C, C), 0.03), "b1": w(keys[13], (1, C), 0.1),
            "W2": w(keys[14], (K, C, C), 0.03), "b2": w(keys[15], (1, C), 0.1),
        },
    }


def _reference_forward(x, tar, p, *, L, P, N, fin, fout):
    """Single-scene pure-JAX reference mirroring the kernel's bf16 matmul precision."""
    def mm(a, w):
        return jnp.dot(a.astype(jnp.bfloat16), w.astype(jnp.bfloat16),
                       preferred_element_type=jnp.float32)

    def conv(x2d, t, W, b):
        K, ci, _ = W.shape
        xp = jnp.concatenate([jnp.zeros(((K - 1) * N, ci), x2d.dtype), x2d], axis=0)
        cols = jnp.concatenate([xp[k * N:k * N + t * N] for k in range(K)], axis=-1)
        return jnp.maximum(mm(cols, W.reshape(K * ci, -1)) + b, 0.0)

    h = p["b1"]
    for f in range(fin):
        h = h + x[:, f:f + 1] * p["W1"][f:f + 1]
    h = jnp.maximum(h, 0.0)
    h = jnp.maximum(mm(h, p["W2"]) + p["b2"], 0.0)
    t1, t2 = p["tcn1"], p["tcn2"]
    res1 = mm(h, t1["Wd"]) + t1["bd"]
    c1 = conv(h, L, t1["W1"], t1["b1"])
    c2 = conv(c1, L, t1["W2"], t1["b2"])
    out1 = jnp.maximum(c2 + res1, 0.0)
    rep = jnp.tile(out1[-N:], (P, 1))
    d1 = conv(rep, P, t2["W1"], t2["b1"])
    d2 = conv(d1, P, t2["W2"], t2["b2"])
    out2 = jnp.maximum(d2 + rep, 0.0)
    tra = mm(out2, p["W3"]) + p["b3"]
    dd = tra - tar
    loss = jnp.mean(jnp.sqrt(jnp.sum(dd * dd, axis=-1)))
    return tra.reshape(P, N, fout), loss


if __name__ == "__main__":
    obs_length, pred_length = 8, 4
    feats_in = feats_out = 2
    N = 8            # agents per scene (multiple of 8 keeps sublanes aligned)
    B = 8            # scenes per call -> batch grid axis (review item 1)
    T = obs_length + pred_length

    key = jax.random.PRNGKey(0)
    k_in, k_p = jax.random.split(key)
    scenes = jax.random.normal(k_in, (B, T, N, 4), jnp.float32)   # batched inputs[0]
    params = init_params(k_p, feats_in, feats_out)
    packed = pack_params(params, feats_out)

    x, tar_pad, tar = prepare_inputs(scenes, obs_length, pred_length,
                                     feats_in, feats_out)

    fwd = jax.jit(functools.partial(
        t_cnn_forward, obs_length=obs_length, pred_length=pred_length,
        feats_in=feats_in, feats_out=feats_out, agents=N))
    tra, loss = fwd(x, tar_pad, packed)
    jax.block_until_ready((tra, loss))

    assert tra.shape == (B, pred_length, N, feats_out)
    assert loss.shape == (B,)
    assert bool(jnp.all(jnp.isfinite(loss)))

    # Validate the packed-slab kernel against the unpacked pure-JAX reference.
    ref = jax.jit(jax.vmap(functools.partial(
        _reference_forward, p=params, L=obs_length, P=pred_length, N=N,
        fin=feats_in, fout=feats_out)))
    tra_ref, loss_ref = ref(x, tar)
    err_t = float(jnp.max(jnp.abs(tra - tra_ref)))
    err_l = float(jnp.max(jnp.abs(loss - loss_ref)))
    assert err_t < 5e-2 and err_l < 5e-2, (err_t, err_l)

    print("KERNEL_OK")
</pallas_src>

<mosaic_0001>
module attributes {stable_mosaic.version = 11 : i64} {
  func.func @kernel(%arg0: i32, %arg1: memref<1x64x2xf32, #tpu.memory_space<vmem>>, %arg2: memref<1x32x128xf32, #tpu.memory_space<vmem>>, %arg3: memref<10x256xf32, #tpu.memory_space<vmem>>, %arg4: memref<2816x256xbf16, #tpu.memory_space<vmem>>, %arg5: memref<384x128xbf16, #tpu.memory_space<vmem>>, %arg6: memref<1x32x128xf32, #tpu.memory_space<vmem>>, %arg7: memref<1x1x1xf32, #tpu.memory_space<vmem>>) attributes {dimension_semantics = [#tpu.dimension_semantics<parallel>], iteration_bounds = array<i64: 8>, scalar_prefetch = 0 : i64, scratch_operands = 0 : i64, tpu.core_type = #tpu.core_type<tc>, window_params = [{transform_indices = @transform_0, window_bounds = array<i64: 1, 64, 2>}, {transform_indices = @transform_1, window_bounds = array<i64: 1, 32, 128>}, {pipeline_mode = #tpu.pipeline_mode<synchronous>, transform_indices = @transform_2, window_bounds = array<i64: 10, 256>}, {pipeline_mode = #tpu.pipeline_mode<synchronous>, transform_indices = @transform_3, window_bounds = array<i64: 2816, 256>}, {pipeline_mode = #tpu.pipeline_mode<synchronous>, transform_indices = @transform_4, window_bounds = array<i64: 384, 128>}, {transform_indices = @transform_5, window_bounds = array<i64: 1, 32, 128>}, {transform_indices = @transform_6, window_bounds = array<i64: 1, 1, 1>}]} {
    %c0 = arith.constant 0 : index
    %c0_0 = arith.constant 0 : index
    %c0_1 = arith.constant 0 : index
    %0 = vector.load %arg1[%c0, %c0_0, %c0_1] : memref<1x64x2xf32, #tpu.memory_space<vmem>>, vector<1x64x2xf32>
    %1 = vector.shape_cast %0 : vector<1x64x2xf32> to vector<64x2xf32>
    %c0_2 = arith.constant 0 : index
    %c0_3 = arith.constant 0 : index
    %2 = vector.load %arg3[%c0_2, %c0_3] : memref<10x256xf32, #tpu.memory_space<vmem>>, vector<1x128xf32>
    %3 = vector.extract_strided_slice %1 {offsets = [0, 0], sizes = [64, 1], strides = [1, 1]} : vector<64x2xf32> to vector<64x1xf32>
    %c8 = arith.constant 8 : index
    %c0_4 = arith.constant 0 : index
    %4 = vector.load %arg3[%c8, %c0_4] : memref<10x256xf32, #tpu.memory_space<vmem>>, vector<1x128xf32>
    %5 = vector.broadcast %3 : vector<64x1xf32> to vector<64x128xf32>
    %6 = vector.broadcast %4 : vector<1x128xf32> to vector<64x128xf32>
    %7 = arith.mulf %5, %6 : vector<64x128xf32>
    %8 = vector.broadcast %2 : vector<1x128xf32> to vector<64x128xf32>
    %9 = arith.addf %8, %7 : vector<64x128xf32>
    %10 = vector.extract_strided_slice %1 {offsets = [0, 1], sizes = [64, 1], strides = [1, 1]} : vector<64x2xf32> to vector<64x1xf32>
    %c9 = arith.constant 9 : index
    %c0_5 = arith.constant 0 : index
    %11 = vector.load %arg3[%c9, %c0_5] : memref<10x256xf32, #tpu.memory_space<vmem>>, vector<1x128xf32>
    %12 = vector.broadcast %10 : vector<64x1xf32> to vector<64x128xf32>
    %13 = vector.broadcast %11 : vector<1x128xf32> to vector<64x128xf32>
    %14 = arith.mulf %12, %13 : vector<64x128xf32>
    %15 = arith.addf %9, %14 : vector<64x128xf32>
    %cst = arith.constant 0.000000e+00 : f32
    %16 = vector.broadcast %cst : f32 to vector<64x128xf32>
    %17 = arith.maximumf %15, %16 : vector<64x128xf32>
    %18 = arith.truncf %17 : vector<64x128xf32> to vector<64x128xbf16>
    %c0_6 = arith.constant 0 : index
    %c0_7 = arith.constant 0 : index
    %19 = vector.load %arg5[%c0_6, %c0_7] : memref<384x128xbf16, #tpu.memory_space<vmem>>, vector<128x128xbf16>
    %cst_8 = arith.constant dense<0.000000e+00> : vector<64x128xf32>
    %20 = tpu.matmul %18, %19, %cst_8 {dimension_numbers = #tpu.dot_dimension_numbers<[1], [0], [0], [1], [0, 0, 1, 1], [], []>} : vector<64x128xbf16>, vector<128x128xbf16>, vector<64x128xf32> -> vector<64x128xf32>
    %c1 = arith.constant 1 : index
    %c0_9 = arith.constant 0 : index
    %21 = vector.load %arg3[%c1, %c0_9] : memref<10x256xf32, #tpu.memory_space<vmem>>, vector<1x128xf32>
    %22 = vector.broadcast %21 : vector<1x128xf32> to vector<64x128xf32>
    %23 = arith.addf %20, %22 : vector<64x128xf32>
    %cst_10 = arith.constant 0.000000e+00 : f32
    %24 = vector.broadcast %cst_10 : f32 to vector<64x128xf32>
    %25 = arith.maximumf %23, %24 : vector<64x128xf32>
    %26 = arith.truncf %25 : vector<64x128xf32> to vector<64x128xbf16>
    %c0_11 = arith.constant 0 : index
    %c0_12 = arith.constant 0 : index
    %27 = vector.load %arg4[%c0_11, %c0_12] : memref<2816x256xbf16, #tpu.memory_space<vmem>>, vector<128x256xbf16>
    %cst_13 = arith.constant dense<0.000000e+00> : vector<64x256xf32>
    %28 = tpu.matmul %26, %27, %cst_13 {dimension_numbers = #tpu.dot_dimension_numbers<[1], [0], [0], [1], [0, 0, 1, 1], [], []>} : vector<64x128xbf16>, vector<128x256xbf16>, vector<64x256xf32> -> vector<64x256xf32>
    %c4 = arith.constant 4 : index
    %c0_14 = arith.constant 0 : index
    %29 = vector.load %arg3[%c4, %c0_14] : memref<10x256xf32, #tpu.memory_space<vmem>>, vector<1x256xf32>
    %30 = vector.broadcast %29 : vector<1x256xf32> to vector<64x256xf32>
    %31 = arith.addf %28, %30 : vector<64x256xf32>
    %cst_15 = arith.constant 0.000000e+00 : f32
    %32 = vector.broadcast %cst_15 : f32 to vector<16x128xf32>
    %33 = tpu.concatenate %32, %25 in 0 : vector<16x128xf32>, vector<64x128xf32> -> vector<80x128xf32>
    %34 = vector.extract_strided_slice %33 {offsets = [0, 0], sizes = [64, 128], strides = [1, 1]} : vector<80x128xf32> to vector<64x128xf32>
    %35 = arith.truncf %34 : vector<64x128xf32> to vector<64x128xbf16>
    %36 = vector.extract_strided_slice %33 {offsets = [8, 0], sizes = [64, 128], strides = [1, 1]} : vector<80x128xf32> to vector<64x128xf32>
    %37 = arith.truncf %36 : vector<64x128xf32> to vector<64x128xbf16>
    %38 = vector.extract_strided_slice %33 {offsets = [16, 0], sizes = [64, 128], strides = [1, 1]} : vector<80x128xf32> to vector<64x128xf32>
    %39 = arith.truncf %38 : vector<64x128xf32> to vector<64x128xbf16>
    %40 = tpu.concatenate %35, %37, %39 in 1 : vector<64x128xbf16>, vector<64x128xbf16>, vector<64x128xbf16> -> vector<64x384xbf16>
    %c128 = arith.constant 128 : index
    %c0_16 = arith.constant 0 : index
    %41 = vector.load %arg4[%c128, %c0_16] : memref<2816x256xbf16, #tpu.memory_space<vmem>>, vector<384x256xbf16>
    %cst_17 = arith.constant dense<0.000000e+00> : vector<64x256xf32>
    %42 = tpu.matmul %40, %41, %cst_17 {dimension_numbers = #tpu.dot_dimension_numbers<[1], [0], [0], [1], [0, 0, 1, 1], [], []>} : vector<64x384xbf16>, vector<384x256xbf16>, vector<64x256xf32> -> vector<64x256xf32>
    %c2 = arith.constant 2 : index
    %c0_18 = arith.constant 0 : index
    %43 = vector.load %arg3[%c2, %c0_18] : memref<10x256xf32, #tpu.memory_space<vmem>>, vector<1x256xf32>
    %44 = vector.broadcast %43 : vector<1x256xf32> to vector<64x256xf32>
    %45 = arith.addf %42, %44 : vector<64x256xf32>
    %cst_19 = arith.constant 0.000000e+00 : f32
    %46 = vector.broadcast %cst_19 : f32 to vector<64x256xf32>
    %47 = arith.maximumf %45, %46 : vector<64x256xf32>
    %cst_20 = arith.constant 0.000000e+00 : f32
    %48 = vector.broadcast %cst_20 : f32 to vector<16x256xf32>
    %49 = tpu.concatenate %48, %47 in 0 : vector<16x256xf32>, vector<64x256xf32> -> vector<80x256xf32>
    %50 = vector.extract_strided_slice %49 {offsets = [0, 0], sizes = [64, 256], strides = [1, 1]} : vector<80x256xf32> to vector<64x256xf32>
    %51 = arith.truncf %50 : vector<64x256xf32> to vector<64x256xbf16>
    %52 = vector.extract_strided_slice %49 {offsets = [8, 0], sizes = [64, 256], strides = [1, 1]} : vector<80x256xf32> to vector<64x256xf32>
    %53 = arith.truncf %52 : vector<64x256xf32> to vector<64x256xbf16>
    %54 = vector.extract_strided_slice %49 {offsets = [16, 0], sizes = [64, 256], strides = [1, 1]} : vector<80x256xf32> to vector<64x256xf32>
    %55 = arith.truncf %54 : vector<64x256xf32> to vector<64x256xbf16>
    %56 = tpu.concatenate %51, %53, %55 in 1 : vector<64x256xbf16>, vector<64x256xbf16>, vector<64x256xbf16> -> vector<64x768xbf16>
    %c512 = arith.constant 512 : index
    %c0_21 = arith.constant 0 : index
    %57 = vector.load %arg4[%c512, %c0_21] : memref<2816x256xbf16, #tpu.memory_space<vmem>>, vector<768x256xbf16>
    %cst_22 = arith.constant dense<0.000000e+00> : vector<64x256xf32>
    %58 = tpu.matmul %56, %57, %cst_22 {dimension_numbers = #tpu.dot_dimension_numbers<[1], [0], [0], [1], [0, 0, 1, 1], [], []>} : vector<64x768xbf16>, vector<768x256xbf16>, vector<64x256xf32> -> vector<64x256xf32>
    %c3 = arith.constant 3 : index
    %c0_23 = arith.constant 0 : index
    %59 = vector.load %arg3[%c3, %c0_23] : memref<10x256xf32, #tpu.memory_space<vmem>>, vector<1x256xf32>
    %60 = vector.broadcast %59 : vector<1x256xf32> to vector<64x256xf32>
    %61 = arith.addf %58, %60 : vector<64x256xf32>
    %cst_24 = arith.constant 0.000000e+00 : f32
    %62 = vector.broadcast %cst_24 : f32 to vector<64x256xf32>
    %63 = arith.maximumf %61, %62 : vector<64x256xf32>
    %64 = arith.addf %63, %31 : vector<64x256xf32>
    %cst_25 = arith.constant 0.000000e+00 : f32
    %65 = vector.broadcast %cst_25 : f32 to vector<64x256xf32>
    %66 = arith.maximumf %64, %65 : vector<64x256xf32>
    %67 = vector.extract_strided_slice %66 {offsets = [56, 0], sizes = [8, 256], strides = [1, 1]} : vector<64x256xf32> to vector<8x256xf32>
    %68 = tpu.concatenate %67, %67, %67, %67 in 0 : vector<8x256xf32>, vector<8x256xf32>, vector<8x256xf32>, vector<8x256xf32> -> vector<32x256xf32>
    %cst_26 = arith.constant 0.000000e+00 : f32
    %69 = vector.broadcast %cst_26 : f32 to vector<16x256xf32>
    %70 = tpu.concatenate %69, %68 in 0 : vector<16x256xf32>, vector<32x256xf32> -> vector<48x256xf32>
    %71 = vector.extract_strided_slice %70 {offsets = [0, 0], sizes = [32, 256], strides = [1, 1]} : vector<48x256xf32> to vector<32x256xf32>
    %72 = arith.truncf %71 : vector<32x256xf32> to vector<32x256xbf16>
    %73 = vector.extract_strided_slice %70 {offsets = [8, 0], sizes = [32, 256], strides = [1, 1]} : vector<48x256xf32> to vector<32x256xf32>
    %74 = arith.truncf %73 : vector<32x256xf32> to vector<32x256xbf16>
    %75 = vector.extract_strided_slice %70 {offsets = [16, 0], sizes = [32, 256], strides = [1, 1]} : vector<48x256xf32> to vector<32x256xf32>
    %76 = arith.truncf %75 : vector<32x256xf32> to vector<32x256xbf16>
    %77 = tpu.concatenate %72, %74, %76 in 1 : vector<32x256xbf16>, vector<32x256xbf16>, vector<32x256xbf16> -> vector<32x768xbf16>
    %c1280 = arith.constant 1280 : index
    %c0_27 = arith.constant 0 : index
    %78 = vector.load %arg4[%c1280, %c0_27] : memref<2816x256xbf16, #tpu.memory_space<vmem>>, vector<768x256xbf16>
    %cst_28 = arith.constant dense<0.000000e+00> : vector<32x256xf32>
    %79 = tpu.matmul %77, %78, %cst_28 {dimension_numbers = #tpu.dot_dimension_numbers<[1], [0], [0], [1], [0, 0, 1, 1], [], []>} : vector<32x768xbf16>, vector<768x256xbf16>, vector<32x256xf32> -> vector<32x256xf32>
    %c5 = arith.constant 5 : index
    %c0_29 = arith.constant 0 : index
    %80 = vector.load %arg3[%c5, %c0_29] : memref<10x256xf32, #tpu.memory_space<vmem>>, vector<1x256xf32>
    %81 = vector.broadcast %80 : vector<1x256xf32> to vector<32x256xf32>
    %82 = arith.addf %79, %81 : vector<32x256xf32>
    %cst_30 = arith.constant 0.000000e+00 : f32
    %83 = vector.broadcast %cst_30 : f32 to vector<32x256xf32>
    %84 = arith.maximumf %82, %83 : vector<32x256xf32>
    %cst_31 = arith.constant 0.000000e+00 : f32
    %85 = vector.broadcast %cst_31 : f32 to vector<16x256xf32>
    %86 = tpu.concatenate %85, %84 in 0 : vector<16x256xf32>, vector<32x256xf32> -> vector<48x256xf32>
    %87 = vector.extract_strided_slice %86 {offsets = [0, 0], sizes = [32, 256], strides = [1, 1]} : vector<48x256xf32> to vector<32x256xf32>
    %88 = arith.truncf %87 : vector<32x256xf32> to vector<32x256xbf16>
    %89 = vector.extract_strided_slice %86 {offsets = [8, 0], sizes = [32, 256], strides = [1, 1]} : vector<48x256xf32> to vector<32x256xf32>
    %90 = arith.truncf %89 : vector<32x256xf32> to vector<32x256xbf16>
    %91 = vector.extract_strided_slice %86 {offsets = [16, 0], sizes = [32, 256], strides = [1, 1]} : vector<48x256xf32> to vector<32x256xf32>
    %92 = arith.truncf %91 : vector<32x256xf32> to vector<32x256xbf16>
    %93 = tpu.concatenate %88, %90, %92 in 1 : vector<32x256xbf16>, vector<32x256xbf16>, vector<32x256xbf16> -> vector<32x768xbf16>
    %c2048 = arith.constant 2048 : index
    %c0_32 = arith.constant 0 : index
    %94 = vector.load %arg4[%c2048, %c0_32] : memref<2816x256xbf16, #tpu.memory_space<vmem>>, vector<768x256xbf16>
    %cst_33 = arith.constant dense<0.000000e+00> : vector<32x256xf32>
    %95 = tpu.matmul %93, %94, %cst_33 {dimension_numbers = #tpu.dot_dimension_numbers<[1], [0], [0], [1], [0, 0, 1, 1], [], []>} : vector<32x768xbf16>, vector<768x256xbf16>, vector<32x256xf32> -> vector<32x256xf32>
    %c6 = arith.constant 6 : index
    %c0_34 = arith.constant 0 : index
    %96 = vector.load %arg3[%c6, %c0_34] : memref<10x256xf32, #tpu.memory_space<vmem>>, vector<1x256xf32>
    %97 = vector.broadcast %96 : vector<1x256xf32> to vector<32x256xf32>
    %98 = arith.addf %95, %97 : vector<32x256xf32>
    %cst_35 = arith.constant 0.000000e+00 : f32
    %99 = vector.broadcast %cst_35 : f32 to vector<32x256xf32>
    %100 = arith.maximumf %98, %99 : vector<32x256xf32>
    %101 = arith.addf %100, %68 : vector<32x256xf32>
    %cst_36 = arith.constant 0.000000e+00 : f32
    %102 = vector.broadcast %cst_36 : f32 to vector<32x256xf32>
    %103 = arith.maximumf %101, %102 : vector<32x256xf32>
    %104 = arith.truncf %103 : vector<32x256xf32> to vector<32x256xbf16>
    %c128_37 = arith.constant 128 : index
    %c0_38 = arith.constant 0 : index
    %105 = vector.load %arg5[%c128_37, %c0_38] : memref<384x128xbf16, #tpu.memory_space<vmem>>, vector<256x128xbf16>
    %cst_39 = arith.constant dense<0.000000e+00> : vector<32x128xf32>
    %106 = tpu.matmul %104, %105, %cst_39 {dimension_numbers = #tpu.dot_dimension_numbers<[1], [0], [0], [1], [0, 0, 1, 1], [], []>} : vector<32x256xbf16>, vector<256x128xbf16>, vector<32x128xf32> -> vector<32x128xf32>
    %c7 = arith.constant 7 : index
    %c0_40 = arith.constant 0 : index
    %107 = vector.load %arg3[%c7, %c0_40] : memref<10x256xf32, #tpu.memory_space<vmem>>, vector<1x128xf32>
    %108 = vector.broadcast %107 : vector<1x128xf32> to vector<32x128xf32>
    %109 = arith.addf %106, %108 : vector<32x128xf32>
    %c0_41 = arith.constant 0 : index
    %c0_42 = arith.constant 0 : index
    %c0_43 = arith.constant 0 : index
    %110 = vector.load %arg6[%c0_41, %c0_42, %c0_43] : memref<1x32x128xf32, #tpu.memory_space<vmem>>, vector<1x32x128xf32>
    %111 = vector.shape_cast %110 : vector<1x32x128xf32> to vector<32x128xf32>
    %112 = vector.shape_cast %109 : vector<32x128xf32> to vector<1x32x128xf32>
    tpu.vector_store %arg6[%c0_41, %c0_42, %c0_43], %112 {strides = array<i32>} : memref<1x32x128xf32, #tpu.memory_space<vmem>>, vector<1x32x128xf32>,
    %c0_44 = arith.constant 0 : index
    %c0_45 = arith.constant 0 : index
    %c0_46 = arith.constant 0 : index
    %113 = vector.load %arg2[%c0_44, %c0_45, %c0_46] : memref<1x32x128xf32, #tpu.memory_space<vmem>>, vector<1x32x128xf32>
    %114 = vector.shape_cast %113 : vector<1x32x128xf32> to vector<32x128xf32>
    %115 = arith.subf %109, %114 : vector<32x128xf32>
    %116 = arith.mulf %115, %115 : vector<32x128xf32>
    %cst_47 = arith.constant dense<0.000000e+00> : vector<32xf32>
    %117 = vector.multi_reduction <add>, %116, %cst_47 [1] : vector<32x128xf32> to vector<32xf32>
    %118 = vector.shape_cast %117 : vector<32xf32> to vector<32x1xf32>
    %119 = math.sqrt %118 : vector<32x1xf32>
    %120 = vector.shape_cast %119 : vector<32x1xf32> to vector<1x32x1xf32>
    %cst_48 = arith.constant dense<0.000000e+00> : vector<1xf32>
    %121 = vector.multi_reduction <add>, %120, %cst_48 [1, 2] : vector<1x32x1xf32> to vector<1xf32>
    %122 = vector.shape_cast %121 : vector<1xf32> to vector<1x1x1xf32>
    %123 = vector.extract %122[0, 0, 0] : f32 from vector<1x1x1xf32>
    %cst_49 = arith.constant 3.200000e+01 : f32
    %124 = arith.divf %123, %cst_49 : f32
    %125 = vector.broadcast %124 : f32 to vector<1x1xf32>
    %c0_50 = arith.constant 0 : index
    %c0_51 = arith.constant 0 : index
    %c0_52 = arith.constant 0 : index
    %126 = vector.load %arg7[%c0_50, %c0_51, %c0_52] : memref<1x1x1xf32, #tpu.memory_space<vmem>>, vector<1x1x1xf32>
    %127 = vector.shape_cast %126 : vector<1x1x1xf32> to vector<1x1xf32>
    %128 = vector.shape_cast %125 : vector<1x1xf32> to vector<1x1x1xf32>
    tpu.vector_store %arg7[%c0_50, %c0_51, %c0_52], %128 {strides = array<i32>} : memref<1x1x1xf32, #tpu.memory_space<vmem>>, vector<1x1x1xf32>,
    return
  }
  func.func @transform_0(%arg0: i32) -> (i32, i32, i32) {
    %c0_i32 = arith.constant 0 : i32
    %c0_i32_0 = arith.constant 0 : i32
    %c0_i32_1 = arith.constant 0 : i32
    return %arg0, %c0_i32, %c0_i32_0 : i32, i32, i32
  }
  func.func @transform_1(%arg0: i32) -> (i32, i32, i32) {
    %c0_i32 = arith.constant 0 : i32
    %c0_i32_0 = arith.constant 0 : i32
    %c0_i32_1 = arith.constant 0 : i32
    return %arg0, %c0_i32, %c0_i32_0 : i32, i32, i32
  }
  func.func @transform_2(%arg0: i32) -> (i32, i32) {
    %c0_i32 = arith.constant 0 : i32
    %c0_i32_0 = arith.constant 0 : i32
    %c0_i32_1 = arith.constant 0 : i32
    return %c0_i32, %c0_i32_0 : i32, i32
  }
  func.func @transform_3(%arg0: i32) -> (i32, i32) {
    %c0_i32 = arith.constant 0 : i32
    %c0_i32_0 = arith.constant 0 : i32
    %c0_i32_1 = arith.constant 0 : i32
    return %c0_i32, %c0_i32_0 : i32, i32
  }
  func.func @transform_4(%arg0: i32) -> (i32, i32) {
    %c0_i32 = arith.constant 0 : i32
    %c0_i32_0 = arith.constant 0 : i32
    %c0_i32_1 = arith.constant 0 : i32
    return %c0_i32, %c0_i32_0 : i32, i32
  }
  func.func @transform_5(%arg0: i32) -> (i32, i32, i32) {
    %c0_i32 = arith.constant 0 : i32
    %c0_i32_0 = arith.constant 0 : i32
    %c0_i32_1 = arith.constant 0 : i32
    return %arg0, %c0_i32, %c0_i32_0 : i32, i32, i32
  }
  func.func @transform_6(%arg0: i32) -> (i32, i32, i32) {
    %c0_i32 = arith.constant 0 : i32
    %c0_i32_0 = arith.constant 0 : i32
    %c0_i32_1 = arith.constant 0 : i32
    return %arg0, %c0_i32, %c0_i32_0 : i32, i32, i32
  }
}

</mosaic_0001>

<bundles_post_ra>
// kernel: t_cnn_forward.1
= control target key start
LH: loop header
LB: loop body
LE: loop exit
PB: predicated region body
PF: predicated region fallthrough
CT: control target
= control target key end

     0   :  { %12 = vsyncpa [#allocation3], 0  ;;  %s7144_s0 = inlined_call_operand.vmem [shape: f32[8,64,2], index: 0, kind: input, shape index: {}]   ;;  %s7145_s1 = inlined_call_operand.hbm [shape: f32[8,32,128], index: 1, kind: input, shape index: {}]   ;;  %s7146_s2 = inlined_call_operand.hbm [shape: f32[10,256], index: 2, kind: input, shape index: {}]   ;;  %s7147_s3 = inlined_call_operand.hbm [shape: bf16[2816,256], index: 3, kind: input, shape index: {}]   ;;  %s7148_s4 = inlined_call_operand.hbm [shape: bf16[384,128], index: 4, kind: input, shape index: {}]   ;;  %s7149_s5 = inlined_call_operand.vmem [shape: f32[8,32,128], index: 5, kind: output, shape index: {0}]   ;;  %s7150_s6 = inlined_call_operand.vmem [shape: f32[8,1,1], index: 6, kind: output, shape index: {1}]  }
   0x1   :  { %14 = vsyncpa [#allocation3 + $0x1], 0 }
   0x2   :  { %15 = vsyncpa [#allocation5], 0 }
   0x3   :  { %16 = vsyncpa [#allocation8], 0  ;;  %s6503_s21 = smov 0   ;;  %s6505_s22 = smov 0  }
   0x4   :  { %s6507_s23 = smov 0   ;;  %s6509_s24 = smov 0  }
   0x5 LB: > { %s6522_s25 = sadd.s32 4294967295, %s6453_s24   ;;  %p68_p0 = scmp.ne.s32.totalorder %s6445_s22, %s6441_s21  ;;  %s6453_s24 = sphi %s6509_s24, %s7158_s24   ;;  %s6449_s23 = sphi %s6507_s23, %s7157_s23   ;;  %s6445_s22 = sphi %s6505_s22, %s7156_s22   ;;  %s6441_s21 = sphi %s6503_s21, %s7155_s21  }
   0x6   : > { %p69_p1 = scmp.eq.s32.totalorder %s6522_s25, 0  ;;  %p4287_p2 = scmp.ge.s32.totalorder %s6453_s24, 1 }
   0x7   : > { %p194_p3 = scmp.lt.s32.totalorder %s6453_s24, 9  ;;  %s205_s29 = sshll.u32 %s7146_s2, 4  ;;  %s206_s29 = int_to_ptr.hbm [resolvable:$true] %s205_s29 }
   0x8   : > { %p6530_p4 = por %p69_p1, %p68_p0  ;;  %s6455_s7 = smov [#allocation4]  }
   0x9   : > { %p6537_p5 = pnand %p4287_p2, %p194_p3  ;;  %s207_s8 = sshll.u32 %s6455_s7, 4  ;;  %s208_s8 = int_to_ptr.vmem [resolvable:$true] %s207_s8 }
   0xa   : > { %s219_s12 = sshll.u32 %s7147_s3, 4  ;;  %s6456_s13 = smov 256   ;;  %s220_s12 = int_to_ptr.hbm [resolvable:$true] %s219_s12 }
   0xb   : > { %p6207_p6 = pneg %p6537_p5  ;;  %s6457_s14 = smov 16  }
   0xc   : > { %s6458_s15 = smov [#allocation6]   ;;  %s6459_s17 = smov 128  }
   0xd   : > { %p6545_p7 = pnand %p6207_p6, %p69_p1  ;;  %s221_s16 = sshll.u32 %s6458_s15, 4  ;;  %s222_s16 = int_to_ptr.vmem [resolvable:$true] %s221_s16 }
   0xe   : > { %s6460_s18 = smov 8   ;;  %s233_s21 = sshll.u32 %s7148_s4, 4  ;;  %s234_s21 = int_to_ptr.hbm [resolvable:$true] %s233_s21 }
   0xf   : > { %6210 = dma.hbm_to_vmem [thread:$0]  (!%p6545_p7), %s206_s29, 512, %s208_s8, [#allocation5], %s6456_s13, %s6456_s13, %s6457_s14  }
  0x10   : > { %6213 = dma.hbm_to_vmem [thread:$0]  (!%p6545_p7), %s220_s12, 45056, %s222_s16, [#allocation5], %s6459_s17, %s6459_s17, %s6460_s18  }
  0x11   : > { %s6461_s27 = smov [#allocation7]   ;;  %s6462_s29 = smov 64  }
  0x12   : > { %s235_s28 = sshll.u32 %s6461_s27, 4  ;;  %s6463_s7 = smov 4   ;;  %s236_s28 = int_to_ptr.vmem [resolvable:$true] %s235_s28 }
  0x13   : > { %6216 = dma.hbm_to_vmem [thread:$0]  (!%p6545_p7), %s234_s21, 3072, %s236_s28, [#allocation8], %s6462_s29, %s6462_s29, %s6463_s7  }
  0x14   : > { %s6565_s8 = sadd.s32 1, %s6453_s24   ;;  %s55_s11 = sadd.s32 1, %s6449_s23 }
  0x15   : > { %s52_s10 = ssub.s32 %s6453_s24, %s6565_s8  ;;  %p62_p9 = scmp.ne.s32.totalorder %s6449_s23, %s6445_s22 }
  0x16   : > { %p53_p8 = scmp.eq.s32.totalorder %s52_s10, 0  ;;  %p63_p10 = scmp.eq.s32.totalorder %s6453_s24, 0 }
  0x17   : > { %p6224_p11 = scmp.lt.s32.totalorder %s6453_s24, 8  ;;  %s257_s13 = sand.u32 1, %s6449_s23  }
  0x18   : > { %s6575_s12 = scalar_select %p53_p8, %s6449_s23, %s55_s11  }
  0x19   : > { %p64_p12 = por %p63_p10, %p62_p9  ;;  %s4292_s14 = sshll.u32 %s257_s13, 5 }
  0x1a   : > { %s5810_s15 = sshll.u32 %s6453_s24, 5  ;;  %s261_s20 = scalar_lea.vmem [#allocation2], %s4292_s14 }
  0x1b   : > { %s266_s9 = scalar_lea.hbm %s7145_s1, %s5810_s15  ;;  %s269_s21 = sshll.u32 %s261_s20, 4  ;;  %s270_s21 = int_to_ptr.vmem [resolvable:$true] %s269_s21 }
  0x1c   : > { %s267_s27 = sshll.u32 %s266_s9, 4  ;;  %p6582_p13 = pnand %p6224_p11, %p64_p12  ;;  %s268_s27 = int_to_ptr.hbm [resolvable:$true] %s267_s27 }
  0x1d   : > { %s258_s29 = scalar_lea.sflag [#allocation3], %s257_s13  ;;  %s6381_s7 = sshra.s32 %s268_s27, 4  ;;  %s6382_s7 = int_to_ptr.hbm [resolvable:$true] %s6381_s7 }
  0x1e   : > { %s6383_s10 = scalar_lea.hbm %s6382_s7, 32  ;;  %p6385_p2 = pneg %p6582_p13 }
  0x1f   : > { %p6384_p0 = scmp.ne.s32.totalorder %s6382_s7, %s6383_s10  ;;  %s6388_s14 = scalar_lea.hbm %s7145_s1, 256 }
  0x20   : > { %p6389_p7 = scmp.lt.s32.totalorder %s6382_s7, %s7145_s1  ;;  %p6390_p8 = scmp.lt.s32.totalorder %s6388_s14, %s6383_s10 }
  0x21   : > { %p6386_p3 = pnand %p6385_p2, %p6384_p0 }
  0x22   : > { %p6391_p9 = por %p6390_p8, %p6389_p7 }
  0x23   : > { %p6387_p6 = pneg %p6386_p3 }
  0x25   : > { %p6392_p10 = pnand %p6391_p9, %p6387_p6 }
  0x27   : > { %6395 = shalt.err (!%p6392_p10)
}
  0x28   : > { %6220 = dma.hbm_to_vmem [thread:$0]  (!%p6582_p13), %s268_s27, 512, %s270_s21, %s258_s29, %s6459_s17, %s6459_s17, %s6460_s18  }
  0x29   : > { %281 = sbr.rel (%p6537_p5) target bundleno = 1785 (0x6f9), region = 40  ;;  %s283_s13 = sand.u32 (!%p6537_p5), 1, %s6445_s22  }
  0x2a   : > { %s4296_s19 = sshll.u32 (!%p6537_p5), %s283_s13, 5  ;;  %s284_s9 = scalar_lea.sflag (!%p6537_p5), [#allocation3], %s283_s13 }
  0x2b   : > { %s6602_s20 = scalar_lea.vmem (!%p6537_p5), [#allocation2], %s4296_s19 }
  0x2e   : > { %6428 = dma.done.wait (%p6530_p4), %s284_s9, 512  }
  0x2f   : > { %6430 = vsyncadd (%p6530_p4), %s284_s9, 4294966784 }
  0x30   : > { %6432 = dma.done.wait (%p69_p1), [#allocation5], 45568  }
  0x31   : > { %6434 = vsyncadd (%p69_p1), [#allocation5], 4294921728 }
  0x32   : > { %6436 = dma.done.wait (%p69_p1), [#allocation8], 3072  }
  0x33   : > { %6438 = vsyncadd (%p69_p1), [#allocation8], 4294964224  ;;  %p340_p5 = scmp.lt.s32.totalorder %s6522_s25, 7  ;;  %v6464_v0 = vmov 1   ;;  %v6465_v1 = vmov 0   ;;  %v5820_v6 = vld [vmem:[#allocation7 + $0x38] sm:$0xff] }
  0x34   : > { %6274 = vset.pattern.permute.xlu1 %v6464_v0  ;;  %6273 = vset.pattern.permute.xlu0 %v6465_v1  ;;  %v5819_v8 = vld [vmem:[#allocation7 + $0x30] sm:$0xff]  ;;  %v5818_v12 = vld [vmem:[#allocation7 + $0x28] sm:$0xff]  ;;  %v5817_v13 = vld [vmem:[#allocation7 + $0x20] sm:$0xff]  ;;  %vm4124_vm6 = vcmask 7168   ;;  %vm4151_vm10 = vcmask 0  }
  0x35   : > { %s7160_s25 = smov (!%p340_p5, %s6522_s25), 7  ;;  %6275 = vset.pattern.permute.xlu2 %v6465_v1  ;;  %545 = vmatpush.bf16.msra.mxu0 %v5820_v6  ;;  %v5816_v14 = vld [vmem:[#allocation7 + $0x18] sm:$0xff]  ;;  %v5815_v15 = vld [vmem:[#allocation7 + $0x10] sm:$0xff]  ;;  %v5814_v16 = vld [vmem:[#allocation7 + $0x8] sm:$0xff] }
  0x36   : > { %s5811_s26 = sshll.u32 %s7160_s25, 6  ;;  %v5813_v17 = vld [vmem:[#allocation7] sm:$0xff]  ;;  %v6624_v18 = vld [vmem:[#allocation4 + $0x10] ss:$0 sm:$0xff]  ;;  %v6629_v23 = vld [vmem:[#allocation4 + $0x11] ss:$0 sm:$0xff]  ;;  %s352_s14 = scalar_lea.vmem %s7150_s6, %s7160_s25 }
  0x37   : > { %s344_s18 = scalar_lea.vmem %s7144_s0, %s5811_s26  ;;  %v6627_v22 = vld [vmem:[#allocation4] ss:$0 sm:$0xff]  ;;  %v4522_v57 = vld [vmem:[#allocation6 + $0x170] sm:$0xf]  ;;  %v5868_v58 = vld [vmem:[#allocation6 + $0x174] sm:$0xf0] }
  0x38   : > { %v353_v2 = vld [vmem:[%s344_s18] sm:$0xff]  ;;  %v355_v3 = vld [vmem:[%s344_s18 + $0x10] sm:$0xff]  ;;  %v354_v4 = vld [vmem:[%s344_s18 + $0x8] sm:$0xff]  ;;  %v4523_v60 = vor.u32 %v5868_v58, %v4522_v57  ;;  %s5812_s21 = sshll.u32 %s7160_s25, 5 }
  0x39   : > { %421 = vperm.xlu1 %6274, %v353_v2   ;;  %365 = vperm.xlu0 %6273, %v353_v2   ;;  %v356_v5 = vld [vmem:[%s344_s18 + $0x18] sm:$0xff]  ;;  %v357_v7 = vld [vmem:[%s344_s18 + $0x20] sm:$0xff]  ;;  %v358_v9 = vld [vmem:[%s344_s18 + $0x28] sm:$0xff]  ;;  %s349_s29 = scalar_lea.vmem %s7149_s5, %s5812_s21 }
  0x3a   : > { %375 = vperm.xlu2 %6275, %v355_v3   ;;  %546 = vmatpush.bf16.msra.mxu0 %v5819_v8  ;;  %v359_v10 = vld [vmem:[%s344_s18 + $0x30] sm:$0xff]  ;;  %v360_v11 = vld [vmem:[%s344_s18 + $0x38] sm:$0xff]  ;;  %v4514_v59 = vld [vmem:[#allocation6 + $0x160] sm:$0xf] }
  0x3b   : > { %v5866_v61 = vld [vmem:[#allocation6 + $0x164] sm:$0xf0]  ;;  %v4458_v62 = vld [vmem:[#allocation6 + $0xf0] sm:$0xf]  ;;  %v5852_v63 = vld [vmem:[#allocation6 + $0xf4] sm:$0xf0] }
  0x3c   : > { %v4459_v2 = vor.u32 %v5852_v63, %v4458_v62  ;;  %v4506_v8 = vld [vmem:[#allocation6 + $0x150] sm:$0xf]  ;;  %v4372_v57 = vld [vmem:[#allocation6 + $0x48] sm:$0xf0]  ;;  %v4418_v63 = vld [vmem:[#allocation6 + $0xa0] sm:$0xf] }
  0x3e   : > { %547 = vmatpush.bf16.msra.mxu0 %v5818_v12  ;;  %1073 = vmatpush.bf16.msra.mxu3 %v4459_v2  ;;  %v5836_v12 = vld [vmem:[#allocation6 + $0x74] sm:$0xf0] }
  0x41   : > { %425 = vperm.xlu1 %6274, %v354_v4   ;;  %370 = vperm.xlu0 %6273, %v354_v4   ;;  %v5850_v4 = vld [vmem:[#allocation6 + $0xe4] sm:$0xf0] }
  0x42   : > { %380 = vperm.xlu2 %6275, %v356_v5   ;;  %548 = vmatpush.bf16.msra.mxu0 %v5817_v13  ;;  %v5835_v13 = vld [vmem:[#allocation6 + $0x74] sm:$0xf] }
  0x46   : > { %549 = vmatpush.bf16.msra.mxu0 %v5816_v14 }
  0x49   : > { %433 = vperm.xlu1 %6274, %v356_v5   ;;  %6276 = vset.pattern.permute.xlu0 %v6464_v0 }
  0x4a   : > { %429 = vperm.xlu0 %6276, %v355_v3   ;;  %385 = vperm.xlu2 %6275, %v357_v7   ;;  %v4450_v3 = vld [vmem:[#allocation6 + $0xe0] sm:$0xf] }
  0x4b   : > { %550 = vmatpush.bf16.msra.mxu0 %v5815_v15  ;;  %v4442_v15 = vld [vmem:[#allocation6 + $0xd0] sm:$0xf] }
  0x4f   : > { %551 = vmatpush.bf16.msra.mxu0 %v5814_v16  ;;  %v5848_v16 = vld [vmem:[#allocation6 + $0xd4] sm:$0xf0] }
  0x51   : > { %6277 = vset.pattern.permute.xlu1 %v6465_v1 }
  0x52   : > { %390 = vperm.xlu1 %6277, %v358_v9   ;;  %441 = vperm.xlu0 %6276, %v358_v9   ;;  %v5864_v9 = vld [vmem:[#allocation6 + $0x154] sm:$0xf0] }
  0x53   : > { %6278 = vset.pattern.permute.xlu2 %v6464_v0  ;;  %552 = vmatpush.bf16.msra.mxu0 %v5813_v17 }
  0x54   : > { %437 = vperm.xlu2 %6278, %v357_v7   ;;  %v4515_v7 = vor.u32 %v5866_v61, %v4514_v59 }
  0x57   : > { %1102 = vmatpush.bf16.msrb.mxu0 %v4523_v60 }
  0x5a   : > { %395 = vperm.xlu1 %6277, %v359_v10   ;;  %445 = vperm.xlu0 %6276, %v359_v10   ;;  %v4451_v10 = vor.u32 %v5850_v4, %v4450_v3 }
  0x5b   : > { %1103 = vmatpush.bf16.msrb.mxu0 %v4515_v7  ;;  %v5840_v7 = vld [vmem:[#allocation6 + $0x94] sm:$0xf0] }
  0x5c   : > { %6279 = vset.pattern.permute.xlu2 %v6465_v1  ;;  %1074 = vmatpush.bf16.msra.mxu3 %v4451_v10 }
  0x5d   : > { %400 = vperm.xlu2 %6279, %v360_v11  }
  0x62   : > { %6280 = vset.pattern.permute.xlu1 %v6464_v0 }
  0x63   : > { %449 = vperm.xlu1 %6280, %v360_v11   ;;  %v4394_v11 = vld [vmem:[#allocation6 + $0x70] sm:$0xf] }
  0x64   : > { %v4395_v17 = vor.u32 %v5836_v12, %v4394_v11 }
  0x66   : > { %689 = vmatpush.bf16.msra.mxu1 %v4395_v17  ;;  %v5827_v17 = vld [vmem:[#allocation6 + $0x34] sm:$0xf] }
  0x94   : > { %v376_v24 = vpop.permute.xlu2 %375 }
  0x95   : > { %v405_v37 = vmul.f32 %v376_v24, %v6624_v18 }
  0x97   : > { %v413_v42 = vadd.f32 %v405_v37, %v6627_v22  ;;  %v4378_v37 = vld [vmem:[#allocation6 + $0x50] sm:$0xf] }
  0x9c   : > { %v381_v34 = vpop.permute.xlu2 %380 }
  0x9d   : > { %v406_v38 = vmul.f32 %v381_v34, %v6624_v18  ;;  %v4388_v34 = vld [vmem:[#allocation6 + $0x68] sm:$0xf0] }
  0x9f   : > { %v414_v43 = vadd.f32 %v406_v38, %v6627_v22  ;;  %v5832_v38 = vld [vmem:[#allocation6 + $0x54] sm:$0xf0] }
  0xa4   : > { %v386_v46 = vpop.permute.xlu2 %385 }
  0xa5   : > { %v407_v54 = vmul.f32 %v386_v46, %v6624_v18  ;;  %v4490_v46 = vld [vmem:[#allocation6 + $0x130] sm:$0xf] }
  0xa7   : > { %v415_v5 = vadd.f32 %v407_v54, %v6627_v22 }
  0xab   : > { %v422_v19 = vpop.permute.xlu1 %421  ;;  %v366_v20 = vpop.permute.xlu0 %365 }
  0xac   : > { %v403_v21 = vmul.f32 %v366_v20, %v6624_v18  ;;  %v452_v25 = vmul.f32 %v422_v19, %v6629_v23  ;;  %v4396_v19 = vld [vmem:[#allocation6 + $0x78] sm:$0xf0] }
  0xae   : > { %v411_v26 = vadd.f32 %v403_v21, %v6627_v22  ;;  %v438_v56 = vpop.permute.xlu2 %437  ;;  %v4399_v21 = vor.u32 %v5835_v13, %v4396_v19  ;;  %v4364_v19 = vld [vmem:[#allocation6 + $0x38] sm:$0xf0] }
  0xaf   : > { %v456_v6 = vmul.f32 %v438_v56, %v6629_v23  ;;  %v5829_v56 = vld [vmem:[#allocation6 + $0x44] sm:$0xf] }
  0xb0   : > { %v460_v32 = vadd.f32 %v452_v25, %v411_v26  ;;  %v4507_v25 = vor.u32 %v5864_v9, %v4506_v8  ;;  %v4434_v26 = vld [vmem:[#allocation6 + $0xc0] sm:$0xf]  ;;  %711 = vmatpush.bf16.msra.mxu2 %v4399_v21  ;;  %v5838_v21 = vld [vmem:[#allocation6 + $0x84] sm:$0xf0] }
  0xb1   : > { %v464_v24 = vadd.f32 %v456_v6, %v415_v5 }
  0xb2   : > { %v468_v35 = vmax.f32 %v460_v32, 0.0  ;;  %v5862_v32 = vld [vmem:[#allocation6 + $0x144] sm:$0xf0]  ;;  %1104 = vmatpush.bf16.msrb.mxu0 %v4507_v25 }
  0xb3   : > { %v426_v27 = vpop.permute.xlu1 %425  ;;  %v371_v28 = vpop.permute.xlu0 %370 }
  0xb4   : > { %v404_v29 = vmul.f32 %v371_v28, %v6624_v18  ;;  %v453_v30 = vmul.f32 %v426_v27, %v6629_v23  ;;  %v4386_v27 = vld [vmem:[#allocation6 + $0x60] sm:$0xf]  ;;  %v5834_v28 = vld [vmem:[#allocation6 + $0x64] sm:$0xf0] }
  0xb6   : > { %v412_v31 = vadd.f32 %v404_v29, %v6627_v22  ;;  %v5833_v29 = vld [vmem:[#allocation6 + $0x64] sm:$0xf] }
  0xb8   : > { %v461_v33 = vadd.f32 %v453_v30, %v412_v31  ;;  %v4443_v30 = vor.u32 %v5848_v16, %v4442_v15  ;;  %v4498_v31 = vld [vmem:[#allocation6 + $0x140] sm:$0xf]  ;;  %v4362_v15 = vld [vmem:[#allocation6 + $0x30] sm:$0xf]  ;;  %v5828_v16 = vld [vmem:[#allocation6 + $0x34] sm:$0xf0] }
  0xba   : > { %v469_v36 = vmax.f32 %v461_v33, 0.0  ;;  %v4387_v33 = vor.u32 %v5834_v28, %v4386_v27  ;;  %1075 = vmatpush.bf16.msra.mxu3 %v4443_v30  ;;  %v6466_v28 = vmov 0.0|0.0   ;;  %v4354_v30 = vld [vmem:[#allocation6 + $0x20] sm:$0xf] }
  0xbb   : > { %v434_v40 = vpop.permute.xlu1 %433 }
  0xbc   : > { %v476_v39 = vpack.c.bf16 %v469_v36, %v468_v35  ;;  %v430_v41 = vpop.permute.xlu0 %429  ;;  %v455_v44 = vmul.f32 %v434_v40, %v6629_v23  ;;  %v5846_v35 = vld [vmem:[#allocation6 + $0xc4] sm:$0xf0]  ;;  %v4391_v36 = vor.u32 %v5833_v29, %v4388_v34  ;;  %v5831_v40 = vld [vmem:[#allocation6 + $0x54] sm:$0xf]  ;;  %690 = vmatpush.bf16.msra.mxu1 %v4387_v33  ;;  %v6655_v29 = vunpack.c.l.b16 %v6466_v28 }
  0xbd   : > { %v454_v45 = vmul.f32 %v430_v41, %v6629_v23  ;;  %v4380_v41 = vld [vmem:[#allocation6 + $0x58] sm:$0xf0] }
  0xbe   : > { %553 = vmatmul.bf16.vlgmr.msra.gmra.mxu0 %v476_v39  ;;  %v463_v47 = vadd.f32 %v455_v44, %v414_v43  ;;  %v401_v43 = vpop.permute.xlu2 %400  ;;  %v4499_v44 = vor.u32 %v5862_v32, %v4498_v31  ;;  %712 = vmatpush.bf16.msra.mxu2 %v4391_v36  ;;  %v5826_v31 = vld [vmem:[#allocation6 + $0x24] sm:$0xf0]  ;;  %v5825_v32 = vld [vmem:[#allocation6 + $0x24] sm:$0xf]  ;;  %v6659_v33 = vpack.c.b16 %v6655_v29, %v6655_v29  ;;  %v4474_v36 = vld [vmem:[#allocation6 + $0x110] sm:$0xf] }
  0xbf   : > { %v462_v48 = vadd.f32 %v454_v45, %v413_v42  ;;  %v472_v42 = vmax.f32 %v464_v24, 0.0  ;;  %v4379_v45 = vor.u32 %v5832_v38, %v4378_v37  ;;  %v410_v54 = vmul.f32 %v401_v43, %v6624_v18  ;;  %v5856_v37 = vld [vmem:[#allocation6 + $0x114] sm:$0xf0] }
  0xc0   : > { %v471_v49 = vmax.f32 %v463_v47, 0.0  ;;  %v4435_v47 = vor.u32 %v5846_v35, %v4434_v26  ;;  %1105 = vmatpush.bf16.msrb.mxu0 %v4499_v44  ;;  %v4367_v24 = vor.u32 %v5827_v17, %v4364_v19  ;;  %v4482_v26 = vld [vmem:[#allocation6 + $0x120] sm:$0xf]  ;;  %v4355_v34 = vor.u32 %v5826_v31, %v4354_v30  ;;  %v4356_v35 = vld [vmem:[#allocation6 + $0x28] sm:$0xf0] }
  0xc1   : > { %v470_v50 = vmax.f32 %v462_v48, 0.0  ;;  %v5860_v48 = vld [vmem:[#allocation6 + $0x134] sm:$0xf0]  ;;  %691 = vmatpush.bf16.msra.mxu1 %v4379_v45  ;;  %v418_v2 = vadd.f32 %v410_v54, %v6627_v22  ;;  %v4359_v38 = vor.u32 %v5825_v32, %v4356_v35  ;;  %v4348_v44 = vld [vmem:[#allocation6 + $0x18] sm:$0xf0] }
  0xc2   : > { %v4491_v59 = vor.u32 %v5860_v48, %v4490_v46  ;;  %1076 = vmatpush.bf16.msra.mxu3 %v4435_v47  ;;  %v4466_v45 = vld [vmem:[#allocation6 + $0x100] sm:$0xf]  ;;  %v5854_v46 = vld [vmem:[#allocation6 + $0x104] sm:$0xf0]  ;;  %v4436_v30 = vld [vmem:[#allocation6 + $0xc8] sm:$0xf0] }
  0xc3   : > { %v477_v53 = vpack.c.bf16 %v471_v49, %v470_v50  ;;  %v4370_v49 = vld [vmem:[#allocation6 + $0x40] sm:$0xf]  ;;  %v5830_v50 = vld [vmem:[#allocation6 + $0x44] sm:$0xf0]  ;;  %v4467_v48 = vor.u32 %v5854_v46, %v4466_v45  ;;  %v5879_v45 = vld [vmem:[#allocation6 + $0x1d4] sm:$0xf] }
  0xc4   : > { %v391_v51 = vpop.permute.xlu1 %390  ;;  %v442_v55 = vpop.permute.xlu0 %441  ;;  %v4371_v60 = vor.u32 %v5830_v50, %v4370_v49  ;;  %1106 = vmatpush.bf16.msrb.mxu0 %v4491_v59  ;;  %v4338_v49 = vld [vmem:[#allocation6] sm:$0xf]  ;;  %v5822_v50 = vld [vmem:[#allocation6 + $0x4] sm:$0xf0]  ;;  %v4524_v59 = vld [vmem:[#allocation6 + $0x178] sm:$0xf0] }
  0xc5   : > { %v408_v52 = vmul.f32 %v391_v51, %v6624_v18  ;;  %v457_v1 = vmul.f32 %v442_v55, %v6629_v23  ;;  %v4426_v51 = vld [vmem:[#allocation6 + $0xb0] sm:$0xf]  ;;  %v5882_v17 = vld [vmem:[#allocation6 + $0x1e4] sm:$0xf0] }
  0xc6   : > { %692 = vmatpush.bf16.msra.mxu1 %v4371_v60  ;;  %v5849_v60 = vld [vmem:[#allocation6 + $0xe4] sm:$0xf] }
  0xc7   : > { %v416_v0 = vadd.f32 %v408_v52, %v6627_v22  ;;  %v5844_v52 = vld [vmem:[#allocation6 + $0xb4] sm:$0xf0] }
  0xc8   : > { %v4427_v62 = vor.u32 %v5844_v52, %v4426_v51  ;;  %v5821_v51 = vld [vmem:[#allocation6 + $0x4] sm:$0xf]  ;;  %v4339_v52 = vor.u32 %v5822_v50, %v4338_v49 }
  0xc9   : > { %v465_v20 = vadd.f32 %v457_v1, %v416_v0  ;;  %v5842_v0 = vld [vmem:[#allocation6 + $0xa4] sm:$0xf0]  ;;  %v4375_v1 = vor.u32 %v5829_v56, %v4372_v57  ;;  %v4460_v56 = vld [vmem:[#allocation6 + $0xf8] sm:$0xf0] }
  0xca   : > { %1077 = vmatpush.bf16.msra.mxu3 %v4427_v62  ;;  %v4419_v6 = vor.u32 %v5842_v0, %v4418_v63  ;;  %v4452_v62 = vld [vmem:[#allocation6 + $0xe8] sm:$0xf0]  ;;  %v6662_v0 = vld [vmem:[#allocation4 + $0x1] ss:$0 sm:$0xff] }
  0xcb   : > { %v473_v39 = vmax.f32 %v465_v20, 0.0  ;;  %v4402_v20 = vld [vmem:[#allocation6 + $0x80] sm:$0xf]  ;;  %v4455_v63 = vor.u32 %v5849_v60, %v4452_v62  ;;  %v5877_v62 = vld [vmem:[#allocation6 + $0x1c4] sm:$0xf] }
  0xcc   : > { %v396_v14 = vpop.permute.xlu1 %395  ;;  %v446_v4 = vpop.permute.xlu0 %445  ;;  %v4403_v25 = vor.u32 %v5838_v21, %v4402_v20  ;;  %v4508_v20 = vld [vmem:[#allocation6 + $0x158] sm:$0xf0]  ;;  %v5881_v21 = vld [vmem:[#allocation6 + $0x1e4] sm:$0xf]  ;;  %v4562_v60 = vld [vmem:[#allocation6 + $0x1c0] sm:$0xf] }
  0xcd   : > { %v478_v55 = vpack.c.bf16 %v473_v39, %v472_v42  ;;  %v409_v61 = vmul.f32 %v396_v14, %v6624_v18  ;;  %v4410_v18 = vld [vmem:[#allocation6 + $0x90] sm:$0xf]  ;;  %v458_v8 = vmul.f32 %v446_v4, %v6629_v23  ;;  %v4475_v39 = vor.u32 %v5856_v37, %v4474_v36  ;;  %v5823_v42 = vld [vmem:[#allocation6 + $0x14] sm:$0xf] }
  0xce   : > { %558 = vmatmul.bf16.gmra.mxu0 %v477_v53  ;;  %v4383_v53 = vor.u32 %v5831_v40, %v4380_v41  ;;  %1078 = vmatpush.bf16.msra.mxu3 %v4419_v6  ;;  %v4411_v11 = vor.u32 %v5840_v7, %v4410_v18  ;;  %v4346_v40 = vld [vmem:[#allocation6 + $0x10] sm:$0xf]  ;;  %v5824_v41 = vld [vmem:[#allocation6 + $0x14] sm:$0xf0]  ;;  %v4351_v47 = vor.u32 %v5823_v42, %v4348_v44  ;;  %v4516_v6 = vld [vmem:[#allocation6 + $0x168] sm:$0xf0] }
  0xcf   : > { %v417_v5 = vadd.f32 %v409_v61, %v6627_v22  ;;  %v4363_v22 = vor.u32 %v5828_v16, %v4362_v15  ;;  %v4347_v43 = vor.u32 %v5824_v41, %v4346_v40  ;;  %v5883_v18 = vld [vmem:[#allocation6 + $0x1f4] sm:$0xf]  ;;  %v4588_v7 = vld [vmem:[#allocation6 + $0x1f8] sm:$0xf0]  ;;  %v4578_v16 = vld [vmem:[#allocation6 + $0x1e0] sm:$0xf] }
  0xd0   : > { %713 = vmatpush.bf16.msra.mxu2 %v4383_v53  ;;  %v4340_v53 = vld [vmem:[#allocation6 + $0x8] sm:$0xf0]  ;;  %v4579_v19 = vor.u32 %v5882_v17, %v4578_v16  ;;  %v5880_v44 = vld [vmem:[#allocation6 + $0x1d4] sm:$0xf0]  ;;  %v4476_v16 = vld [vmem:[#allocation6 + $0x118] sm:$0xf0] }
  0xd1   : > { %v466_v10 = vadd.f32 %v458_v8, %v417_v5  ;;  %693 = vmatpush.bf16.msra.mxu1 %v4363_v22  ;;  %v4343_v54 = vor.u32 %v5821_v51, %v4340_v53  ;;  %v5863_v22 = vld [vmem:[#allocation6 + $0x154] sm:$0xf]  ;;  %v4500_v40 = vld [vmem:[#allocation6 + $0x148] sm:$0xf0]  ;;  %v4428_v53 = vld [vmem:[#allocation6 + $0xb8] sm:$0xf0] }
  0xd2   : > { %1079 = vmatpush.bf16.msra.mxu3 %v4411_v11  ;;  %v5847_v11 = vld [vmem:[#allocation6 + $0xd4] sm:$0xf] }
  0xd3   : > { %v474_v13 = vmax.f32 %v466_v10, 0.0  ;;  %v4591_v10 = vor.u32 %v5883_v18, %v4588_v7  ;;  %v5857_v18 = vld [vmem:[#allocation6 + $0x124] sm:$0xf]  ;;  %v4484_v7 = vld [vmem:[#allocation6 + $0x128] sm:$0xf0] }
  0xd4   : > { %714 = vmatpush.bf16.msra.mxu2 %v4375_v1  ;;  %v4586_v1 = vld [vmem:[#allocation6 + $0x1f0] sm:$0xf] }
  0xd5   : > { %v450_v58 = vpop.permute.xlu1 %449  ;;  %694 = vmatpush.bf16.msra.mxu1 %v4355_v34 }
  0xd6   : > { %v459_v3 = vmul.f32 %v450_v58, %v6629_v23  ;;  %v5858_v23 = vld [vmem:[#allocation6 + $0x124] sm:$0xf0]  ;;  %1080 = vmatpush.bf16.msra.mxu3 %v4403_v25  ;;  %v5867_v58 = vld [vmem:[#allocation6 + $0x174] sm:$0xf] }
  0xd7   : > { %v4483_v27 = vor.u32 %v5858_v23, %v4482_v26  ;;  %v4527_v61 = vor.u32 %v5867_v58, %v4524_v59  ;;  %v4511_v26 = vor.u32 %v5863_v22, %v4508_v20  ;;  %v4554_v22 = vld [vmem:[#allocation6 + $0x1b0] sm:$0xf] }
  0xd8   : > { %v467_v9 = vadd.f32 %v459_v3, %v418_v2  ;;  %715 = vmatpush.bf16.msra.mxu2 %v4367_v24  ;;  %v5884_v2 = vld [vmem:[#allocation6 + $0x1f4] sm:$0xf0]  ;;  %v5865_v3 = vld [vmem:[#allocation6 + $0x164] sm:$0xf]  ;;  %v4580_v24 = vld [vmem:[#allocation6 + $0x1e8] sm:$0xf0] }
  0xd9   : > { %1107 = vmatpush.bf16.msrb.mxu0 %v4483_v27  ;;  %1081 = vmatmul.bf16.vlgmr.msra.gmra.mxu3 %v6659_v33  ;;  %v4587_v5 = vor.u32 %v5884_v2, %v4586_v1  ;;  %v4583_v23 = vor.u32 %v5881_v21, %v4580_v24  ;;  %v5845_v27 = vld [vmem:[#allocation6 + $0xc4] sm:$0xf]  ;;  %v4564_v1 = vld [vmem:[#allocation6 + $0x1c8] sm:$0xf0] }
  0xda   : > { %v475_v12 = vmax.f32 %v467_v9, 0.0  ;;  %695 = vmatpush.bf16.msra.mxu1 %v4347_v43  ;;  %1189 = vmatpush.bf16.msrb.mxu3 %v4527_v61  ;;  %v4519_v9 = vor.u32 %v5865_v3, %v4516_v6  ;;  %v4439_v32 = vor.u32 %v5845_v27, %v4436_v30  ;;  %v4570_v43 = vld [vmem:[#allocation6 + $0x1d0] sm:$0xf]  ;;  %v5878_v61 = vld [vmem:[#allocation6 + $0x1c4] sm:$0xf0] }
  0xdb   : > { %v5841_v2 = vld [vmem:[#allocation6 + $0xa4] sm:$0xf]  ;;  %v4420_v3 = vld [vmem:[#allocation6 + $0xa8] sm:$0xf0] }
  0xdc   : > { %v479_v14 = vpack.c.bf16 %v475_v12, %v474_v13  ;;  %716 = vmatpush.bf16.msra.mxu2 %v4359_v38  ;;  %v4444_v12 = vld [vmem:[#allocation6 + $0xd8] sm:$0xf0]  ;;  %v4423_v6 = vor.u32 %v5841_v2, %v4420_v3  ;;  %v5873_v27 = vld [vmem:[#allocation6 + $0x1a4] sm:$0xf]  ;;  %v5870_v2 = vld [vmem:[#allocation6 + $0x184] sm:$0xf0] }
  0xdd   : > { %1108 = vmatpush.bf16.msrb.mxu0 %v4475_v39  ;;  %v4447_v13 = vor.u32 %v5847_v11, %v4444_v12  ;;  %v5861_v39 = vld [vmem:[#allocation6 + $0x144] sm:$0xf]  ;;  %v5875_v12 = vld [vmem:[#allocation6 + $0x1b4] sm:$0xf] }
  0xde   : > { %563 = vmatmul.bf16.gmra.mxu0 %v478_v55  ;;  %696 = vmatpush.bf16.msra.mxu1 %v4339_v52  ;;  %v5851_v55 = vld [vmem:[#allocation6 + $0xf4] sm:$0xf]  ;;  %v4503_v41 = vor.u32 %v5861_v39, %v4500_v40 }
  0xdf   : > { %v4463_v57 = vor.u32 %v5851_v55, %v4460_v56  ;;  %1190 = vmatpush.bf16.msrb.mxu3 %v4519_v9  ;;  %v5843_v52 = vld [vmem:[#allocation6 + $0xb4] sm:$0xf]  ;;  %v4492_v56 = vld [vmem:[#allocation6 + $0x138] sm:$0xf0]  ;;  %v4487_v9 = vor.u32 %v5857_v18, %v4484_v7 }
  0xe0   : > { %717 = vmatpush.bf16.msra.mxu2 %v4351_v47  ;;  %v4571_v47 = vor.u32 %v5880_v44, %v4570_v43  ;;  %v4431_v55 = vor.u32 %v5843_v52, %v4428_v53  ;;  %v4538_v53 = vld [vmem:[#allocation6 + $0x190] sm:$0xf] }
  0xe1   : > { %1109 = vmatpush.bf16.msrb.mxu0 %v4467_v48  ;;  %v4572_v48 = vld [vmem:[#allocation6 + $0x1d8] sm:$0xf0] }
  0xe2   : > { %1131 = vmatpush.bf16.msrb.mxu1 %v4587_v5  ;;  %v4575_v51 = vor.u32 %v5879_v45, %v4572_v48  ;;  %v4567_v5 = vor.u32 %v5877_v62, %v4564_v1  ;;  %v5871_v45 = vld [vmem:[#allocation6 + $0x194] sm:$0xf]  ;;  %v4530_v1 = vld [vmem:[#allocation6 + $0x180] sm:$0xf] }
  0xe3   : > { %1191 = vmatpush.bf16.msrb.mxu3 %v4511_v26  ;;  %v5853_v26 = vld [vmem:[#allocation6 + $0x104] sm:$0xf]  ;;  %v4531_v3 = vor.u32 %v5870_v2, %v4530_v1  ;;  %v4690_v2 = vld [vmem:[#allocation6 + $0x2c0] sm:$0xf] }
  0xe4   : > { %718 = vmatpush.bf16.msra.mxu2 %v4343_v54  ;;  %v5859_v54 = vld [vmem:[#allocation6 + $0x134] sm:$0xf] }
  0xe5   : > { %1218 = vmatpush.bf16.msra.mxu0 %v4591_v10  ;;  %v4495_v58 = vor.u32 %v5859_v54, %v4492_v56  ;;  %v5872_v54 = vld [vmem:[#allocation6 + $0x194] sm:$0xf0] }
  0xe6   : > { %1132 = vmatpush.bf16.msrb.mxu1 %v4579_v19  ;;  %v5876_v19 = vld [vmem:[#allocation6 + $0x1b4] sm:$0xf0] }
  0xe7   : > { %1192 = vmatpush.bf16.msrb.mxu3 %v4503_v41  ;;  %v4555_v21 = vor.u32 %v5876_v19, %v4554_v22  ;;  %v5874_v41 = vld [vmem:[#allocation6 + $0x1a4] sm:$0xf0] }
  0xe8   : > { %1160 = vmatpush.bf16.msrb.mxu2 %v4463_v57 }
  0xe9   : > { %1219 = vmatpush.bf16.msra.mxu0 %v4583_v23  ;;  %v4468_v23 = vld [vmem:[#allocation6 + $0x108] sm:$0xf0] }
  0xea   : > { %1133 = vmatpush.bf16.msrb.mxu1 %v4571_v47  ;;  %v4471_v30 = vor.u32 %v5853_v26, %v4468_v23  ;;  %v4650_v23 = vld [vmem:[#allocation6 + $0x270] sm:$0xf] }
  0xeb   : > { %1193 = vmatpush.bf16.msrb.mxu3 %v4495_v58  ;;  %v4532_v58 = vld [vmem:[#allocation6 + $0x188] sm:$0xf0] }
  0xec   : > { %1161 = vmatpush.bf16.msrb.mxu2 %v4455_v63  ;;  %v4563_v63 = vor.u32 %v5878_v61, %v4562_v60 }
  0xed   : > { %1220 = vmatpush.bf16.msra.mxu0 %v4575_v51  ;;  %v4404_v51 = vld [vmem:[#allocation6 + $0x88] sm:$0xf0] }
  0xee   : > { %568 = vmatmul.bf16.gmra.mxu0 %v479_v14  ;;  %1134 = vmatpush.bf16.msrb.mxu1 %v4563_v63 }
  0xef   : > { %1194 = vmatpush.bf16.msrb.mxu3 %v4487_v9 }
  0xf0   : > { %1162 = vmatpush.bf16.msrb.mxu2 %v4447_v13  ;;  %v4556_v13 = vld [vmem:[#allocation6 + $0x1b8] sm:$0xf0] }
  0xf1   : > { %1221 = vmatpush.bf16.msra.mxu0 %v4567_v5 }
  0xf2   : > { %1135 = vmatpush.bf16.msrb.mxu1 %v4555_v21 }
  0xf4   : > { %1163 = vmatpush.bf16.msrb.mxu2 %v4439_v32 }
  0xf8   : > { %1164 = vmatpush.bf16.msrb.mxu2 %v4431_v55  ;;  %v5869_v55 = vld [vmem:[#allocation6 + $0x184] sm:$0xf] }
  0xfc   : > { %1165 = vmatpush.bf16.msrb.mxu2 %v4423_v6 }
 0x13b   : > { %v554_v4 = vpop.f32.mrf.mxu0 }
 0x13c   : > { %v555_v8 = vadd.f32 %v554_v4, %v6662_v0 }
 0x13e   : > { %v574_v14 = vmax.f32 %v555_v8, 0.0 }
 0x140   : > { %v734_v15 = vpack.c.bf16 %v574_v14, %v574_v14 }
 0x142   : > { %v750_v25 = vunpack.c.l.b16 %v734_v15  ;;  %v4559_v15 = vor.u32 %v5875_v12, %v4556_v13 }
 0x143   : > { %v556_v31 = vpop.f32.mrf.mxu0 }
 0x144   : > { %v557_v34 = vadd.f32 %v556_v31, %v6662_v0  ;;  %v6667_v35 = vpack.c.b16 %v750_v25, %v6655_v29  ;;  %1222 = vmatpush.bf16.msra.mxu0 %v4559_v15  ;;  %v4548_v31 = vld [vmem:[#allocation6 + $0x1a8] sm:$0xf0] }
 0x146   : > { %v575_v36 = vmax.f32 %v557_v34, 0.0  ;;  %1110 = vmatmul.bf16.vlgmr.msrb.gmra.mxu0 %v6667_v35  ;;  %v5839_v34 = vld [vmem:[#allocation6 + $0x94] sm:$0xf] }
 0x148   : > { %v735_v37 = vpack.c.bf16 %v575_v36, %v575_v36  ;;  %v582_v38 = vpack.c.bf16 %v575_v36, %v574_v14  ;;  %v5855_v14 = vld [vmem:[#allocation6 + $0x114] sm:$0xf]  ;;  %v4412_v36 = vld [vmem:[#allocation6 + $0x98] sm:$0xf0] }
 0x149   : > { %v4479_v20 = vor.u32 %v5855_v14, %v4476_v16  ;;  %v4415_v40 = vor.u32 %v5839_v34, %v4412_v36 }
 0x14a   : > { %v751_v42 = vunpack.c.l.b16 %v735_v37  ;;  %697 = vmatmul.bf16.vlgmr.msra.gmra.mxu1 %v582_v38  ;;  %719 = vmatmul.bf16.vlgmr.msra.gmra.mxu2 %v582_v38  ;;  %v4551_v37 = vor.u32 %v5873_v27, %v4548_v31  ;;  %v4546_v38 = vld [vmem:[#allocation6 + $0x1a0] sm:$0xf]  ;;  %v5900_v27 = vld [vmem:[#allocation6 + $0x274] sm:$0xf0] }
 0x14b   : > { %v559_v46 = vpop.f32.mrf.mxu0  ;;  %1195 = vmatpush.bf16.msrb.mxu3 %v4479_v20  ;;  %v4547_v44 = vor.u32 %v5874_v41, %v4546_v38  ;;  %1166 = vmatpush.bf16.msrb.mxu2 %v4415_v40  ;;  %v4714_v20 = vld [vmem:[#allocation6 + $0x2f0] sm:$0xf]  ;;  %v4706_v31 = vld [vmem:[#allocation6 + $0x2e0] sm:$0xf]  ;;  %v5930_v38 = vld [vmem:[#allocation6 + $0x364] sm:$0xf0] }
 0x14c   : > { %v6670_v49 = vpack.c.b16 %v751_v42, %v750_v25  ;;  %v560_v50 = vadd.f32 %v559_v46, %v6662_v0  ;;  %1223 = vmatpush.bf16.msra.mxu0 %v4551_v37  ;;  %v4540_v46 = vld [vmem:[#allocation6 + $0x198] sm:$0xf0]  ;;  %v4770_v37 = vld [vmem:[#allocation6 + $0x360] sm:$0xf]  ;;  %v5948_v41 = vld [vmem:[#allocation6 + $0x3f4] sm:$0xf0] }
 0x14d   : > { %v4543_v47 = vor.u32 %v5871_v45, %v4540_v46  ;;  %1136 = vmatpush.bf16.msrb.mxu1 %v4547_v44  ;;  %v4771_v40 = vor.u32 %v5930_v38, %v4770_v37  ;;  %v4674_v37 = vld [vmem:[#allocation6 + $0x2a0] sm:$0xf]  ;;  %v5906_v38 = vld [vmem:[#allocation6 + $0x2a4] sm:$0xf0] }
 0x14e   : > { %v576_v57 = vmax.f32 %v560_v50, 0.0  ;;  %1086 = vmatmul.bf16.gmra.mxu3 %v6670_v49  ;;  %v5837_v50 = vld [vmem:[#allocation6 + $0x84] sm:$0xf] }
 0x14f   : > { %1196 = vmatpush.bf16.msrb.mxu3 %v4471_v30  ;;  %v4407_v52 = vor.u32 %v5837_v50, %v4404_v51  ;;  %v4651_v30 = vor.u32 %v5900_v27, %v4650_v23  ;;  %v5912_v50 = vld [vmem:[#allocation6 + $0x2d4] sm:$0xf0]  ;;  %v4618_v23 = vld [vmem:[#allocation6 + $0x230] sm:$0xf] }
 0x150   : > { %v736_v59 = vpack.c.bf16 %v576_v57, %v576_v57  ;;  %1224 = vmatpush.bf16.msra.mxu0 %v4543_v47  ;;  %v5892_v27 = vld [vmem:[#allocation6 + $0x234] sm:$0xf0] }
 0x151   : > { %1167 = vmatpush.bf16.msrb.mxu2 %v4407_v52 }
 0x152   : > { %v752_v4 = vunpack.c.l.b16 %v736_v59  ;;  %v4535_v59 = vor.u32 %v5869_v55, %v4532_v58  ;;  %v4834_v55 = vld [vmem:[#allocation6 + $0x3e0] sm:$0xf]  ;;  %v5946_v58 = vld [vmem:[#allocation6 + $0x3e4] sm:$0xf0] }
 0x153   : > { %v561_v8 = vpop.f32.mrf.mxu0 }
 0x154   : > { %v562_v10 = vadd.f32 %v561_v8, %v6662_v0  ;;  %v6675_v11 = vpack.c.b16 %v752_v4, %v751_v42  ;;  %1225 = vmatpush.bf16.msra.mxu0 %v4535_v59  ;;  %v4634_v59 = vld [vmem:[#allocation6 + $0x250] sm:$0xf] }
 0x156   : > { %v577_v17 = vmax.f32 %v562_v10, 0.0  ;;  %1115 = vmatmul.bf16.gmra.mxu0 %v6675_v11 }
 0x158   : > { %v737_v24 = vpack.c.bf16 %v577_v17, %v577_v17  ;;  %v583_v25 = vpack.c.bf16 %v577_v17, %v576_v57  ;;  %v4539_v57 = vor.u32 %v5872_v54, %v4538_v53  ;;  %v4762_v53 = vld [vmem:[#allocation6 + $0x350] sm:$0xf]  ;;  %v5928_v54 = vld [vmem:[#allocation6 + $0x354] sm:$0xf0] }
 0x15a   : > { %v753_v32 = vunpack.c.l.b16 %v737_v24  ;;  %700 = vmatmul.bf16.gmra.mxu1 %v583_v25  ;;  %722 = vmatmul.bf16.gmra.mxu2 %v583_v25  ;;  %v4778_v24 = vld [vmem:[#allocation6 + $0x370] sm:$0xf]  ;;  %v5932_v25 = vld [vmem:[#allocation6 + $0x374] sm:$0xf0] }
 0x15b   : > { %v564_v39 = vpop.f32.mrf.mxu0  ;;  %1137 = vmatpush.bf16.msrb.mxu1 %v4539_v57  ;;  %v4763_v57 = vor.u32 %v5928_v54, %v4762_v53 }
 0x15c   : > { %v6678_v42 = vpack.c.b16 %v753_v32, %v752_v4  ;;  %v565_v43 = vadd.f32 %v564_v39, %v6662_v0  ;;  %v6694_v26 = vpop.f32.mrf.mxu3  ;;  %v4842_v39 = vld [vmem:[#allocation6 + $0x3f0] sm:$0xf] }
 0x15d   : > { %v4843_v44 = vor.u32 %v5948_v41, %v4842_v39  ;;  %v4675_v39 = vor.u32 %v5906_v38, %v4674_v37  ;;  %v4738_v41 = vld [vmem:[#allocation6 + $0x320] sm:$0xf] }
 0x15e   : > { %v578_v48 = vmax.f32 %v565_v43, 0.0  ;;  %1091 = vmatmul.bf16.gmra.mxu3 %v6678_v42  ;;  %v5898_v43 = vld [vmem:[#allocation6 + $0x264] sm:$0xf0] }
 0x15f   : > { %1138 = vmatpush.bf16.msrb.mxu1 %v4531_v3  ;;  %1979 = vmatpush.bf16.msrb.mxu0 %v4843_v44  ;;  %v5910_v3 = vld [vmem:[#allocation6 + $0x2c4] sm:$0xf0] }
 0x160   : > { %v738_v56 = vpack.c.bf16 %v578_v48, %v578_v48 }
 0x162   : > { %v754_v60 = vunpack.c.l.b16 %v738_v56 }
 0x163   : > { %v566_v61 = vpop.f32.mrf.mxu0  ;;  %1913 = vmatpush.bf16.msra.mxu1 %v4651_v30 }
 0x164   : > { %v567_v62 = vadd.f32 %v566_v61, %v6662_v0  ;;  %v768_v63 = vpack.c.b16 %v754_v60, %v753_v32  ;;  %v5914_v32 = vld [vmem:[#allocation6 + $0x2e4] sm:$0xf0]  ;;  %v6698_v47 = vpop.f32.mrf.mxu3  ;;  %v4835_v61 = vor.u32 %v5946_v58, %v4834_v55  ;;  %v4666_v55 = vld [vmem:[#allocation6 + $0x290] sm:$0xf] }
 0x165   : > { %v4707_v36 = vor.u32 %v5914_v32, %v4706_v31  ;;  %v4619_v31 = vor.u32 %v5892_v27, %v4618_v23 }
 0x166   : > { %v579_v4 = vmax.f32 %v567_v62, 0.0  ;;  %1120 = vmatmul.bf16.gmra.mxu0 %v768_v63 }
 0x167   : > { %1980 = vmatpush.bf16.msrb.mxu0 %v4835_v61 }
 0x168   : > { %v739_v5 = vpack.c.bf16 %v579_v4, %v579_v4  ;;  %v584_v6 = vpack.c.bf16 %v579_v4, %v578_v48  ;;  %v4698_v48 = vld [vmem:[#allocation6 + $0x2d0] sm:$0xf] }
 0x169   : > { %v4699_v52 = vor.u32 %v5912_v50, %v4698_v48  ;;  %v4610_v50 = vld [vmem:[#allocation6 + $0x220] sm:$0xf] }
 0x16a   : > { %v755_v18 = vunpack.c.l.b16 %v739_v5  ;;  %703 = vmatmul.bf16.gmra.mxu1 %v584_v6  ;;  %725 = vmatmul.bf16.gmra.mxu2 %v584_v6  ;;  %v4691_v5 = vor.u32 %v5910_v3, %v4690_v2  ;;  %v4754_v6 = vld [vmem:[#allocation6 + $0x340] sm:$0xf] }
 0x16b   : > { %v569_v7 = vpop.f32.mrf.mxu0  ;;  %v4802_v2 = vld [vmem:[#allocation6 + $0x3a0] sm:$0xf] }
 0x16c   : > { %v759_v8 = vpack.c.b16 %v755_v18, %v754_v60  ;;  %v570_v9 = vadd.f32 %v569_v7, %v6662_v0  ;;  %v5896_v60 = vld [vmem:[#allocation6 + $0x254] sm:$0xf0]  ;;  %v4826_v7 = vld [vmem:[#allocation6 + $0x3d0] sm:$0xf] }
 0x16d   : > { %v4635_v62 = vor.u32 %v5896_v60, %v4634_v59  ;;  %v4602_v59 = vld [vmem:[#allocation6 + $0x210] sm:$0xf]  ;;  %v5888_v60 = vld [vmem:[#allocation6 + $0x214] sm:$0xf0] }
 0x16e   : > { %v580_v10 = vmax.f32 %v570_v9, 0.0  ;;  %1096 = vmatmul.bf16.gmra.mxu3 %v759_v8  ;;  %v4603_v3 = vor.u32 %v5888_v60, %v4602_v59  ;;  %v5978_v59 = vld [vmem:[#allocation6 + $0x4e4] sm:$0xf0]  ;;  %v5897_v60 = vld [vmem:[#allocation6 + $0x264] sm:$0xf] }
 0x170   : > { %v740_v12 = vpack.c.bf16 %v580_v10, %v580_v10 }
 0x172   : > { %v765_v13 = vunpack.c.l.b16 %v740_v12  ;;  %v4626_v12 = vld [vmem:[#allocation6 + $0x240] sm:$0xf] }
 0x173   : > { %v571_v14 = vpop.f32.mrf.mxu0 }
 0x174   : > { %v572_v15 = vadd.f32 %v571_v14, %v6662_v0  ;;  %v769_v16 = vpack.c.b16 %v765_v13, %v755_v18  ;;  %v5926_v18 = vld [vmem:[#allocation6 + $0x344] sm:$0xf0] }
 0x175   : > { %v4755_v9 = vor.u32 %v5926_v18, %v4754_v6  ;;  %v5938_v6 = vld [vmem:[#allocation6 + $0x3a4] sm:$0xf0]  ;;  %v4658_v18 = vld [vmem:[#allocation6 + $0x280] sm:$0xf] }
 0x176   : > { %v581_v17 = vmax.f32 %v572_v15, 0.0  ;;  %1125 = vmatmul.bf16.gmra.mxu0 %v769_v16 }
 0x178   : > { %v585_v22 = vpack.c.bf16 %v581_v17, %v580_v10  ;;  %v741_v0 = vpack.c.bf16 %v581_v17, %v581_v17  ;;  %v5944_v10 = vld [vmem:[#allocation6 + $0x3d4] sm:$0xf0] }
 0x179   : > { %v4827_v14 = vor.u32 %v5944_v10, %v4826_v7  ;;  %v6719_v10 = vunpack.c.h.b16 %v6466_v28 }
 0x17a   : > { %706 = vmatmul.bf16.gmra.mxu1 %v585_v22  ;;  %728 = vmatmul.bf16.gmra.mxu2 %v585_v22  ;;  %v4682_v22 = vld [vmem:[#allocation6 + $0x2b0] sm:$0xf] }
 0x17b   : > { %1981 = vmatpush.bf16.msrb.mxu0 %v4827_v14  ;;  %v5886_v14 = vld [vmem:[#allocation6 + $0x204] sm:$0xf0] }
 0x17e   : > { %1197 = vmatmul.bf16.vlgmr.msrb.gmra.mxu3 %v6667_v35  ;;  %v775_v35 = vunpack.c.l.b16 %v741_v0  ;;  %v5908_v0 = vld [vmem:[#allocation6 + $0x2b4] sm:$0xf0] }
 0x180   : > { %v776_v19 = vpack.c.b16 %v775_v35, %v765_v13  ;;  %v5894_v13 = vld [vmem:[#allocation6 + $0x244] sm:$0xf0] }
 0x181   : > { %v4627_v15 = vor.u32 %v5894_v13, %v4626_v12  ;;  %v4594_v13 = vld [vmem:[#allocation6 + $0x200] sm:$0xf] }
 0x186   : > { %1226 = vmatmul.bf16.vlgmr.msra.gmra.mxu0 %v6670_v49 }
 0x18a   : > { %1139 = vmatmul.bf16.vlgmr.msrb.gmra.mxu1 %v6670_v49  ;;  %1168 = vmatmul.bf16.vlgmr.msrb.gmra.mxu2 %v6659_v33 }
 0x18e   : > { %1202 = vmatmul.bf16.gmra.mxu3 %v6675_v11  ;;  %v5916_v11 = vld [vmem:[#allocation6 + $0x2f4] sm:$0xf0] }
 0x18f   : > { %v4715_v21 = vor.u32 %v5916_v11, %v4714_v20  ;;  %v4746_v20 = vld [vmem:[#allocation6 + $0x330] sm:$0xf]  ;;  %v5924_v11 = vld [vmem:[#allocation6 + $0x334] sm:$0xf0] }
 0x191   : > { %1935 = vmatpush.bf16.msra.mxu2 %v4715_v21  ;;  %v4818_v21 = vld [vmem:[#allocation6 + $0x3c0] sm:$0xf] }
 0x195   : > { %1936 = vmatpush.bf16.msra.mxu2 %v4707_v36 }
 0x196   : > { %1231 = vmatmul.bf16.gmra.mxu0 %v6678_v42 }
 0x199   : > { %1937 = vmatpush.bf16.msra.mxu2 %v4699_v52  ;;  %v5890_v52 = vld [vmem:[#allocation6 + $0x224] sm:$0xf0] }
 0x19a   : > { %1144 = vmatmul.bf16.gmra.mxu1 %v6678_v42  ;;  %1173 = vmatmul.bf16.gmra.mxu2 %v6670_v49  ;;  %v4779_v49 = vor.u32 %v5932_v25, %v4778_v24  ;;  %v4747_v25 = vor.u32 %v5924_v11, %v4746_v20  ;;  %v4611_v54 = vor.u32 %v5890_v52, %v4610_v50  ;;  %v5936_v20 = vld [vmem:[#allocation6 + $0x394] sm:$0xf0]  ;;  %v4906_v52 = vld [vmem:[#allocation6 + $0x470] sm:$0xf] }
 0x19c   : > { %1957 = vmatpush.bf16.msra.mxu3 %v4779_v49  ;;  %v5942_v49 = vld [vmem:[#allocation6 + $0x3c4] sm:$0xf0] }
 0x19d   : > { %1938 = vmatpush.bf16.msra.mxu2 %v4691_v5  ;;  %v4819_v30 = vor.u32 %v5942_v49, %v4818_v21  ;;  %v4786_v49 = vld [vmem:[#allocation6 + $0x380] sm:$0xf] }
 0x19e   : > { %1207 = vmatmul.bf16.gmra.mxu3 %v768_v63 }
 0x19f   : > { %1982 = vmatpush.bf16.msrb.mxu0 %v4819_v30  ;;  %v5934_v30 = vld [vmem:[#allocation6 + $0x384] sm:$0xf0] }
 0x1a0   : > { %1958 = vmatpush.bf16.msra.mxu3 %v4771_v40 }
 0x1a4   : > { %1959 = vmatpush.bf16.msra.mxu3 %v4763_v57 }
 0x1a6   : > { %1236 = vmatmul.bf16.gmra.mxu0 %v759_v8 }
 0x1a8   : > { %1960 = vmatpush.bf16.msra.mxu3 %v4755_v9  ;;  %v5902_v9 = vld [vmem:[#allocation6 + $0x284] sm:$0xf0] }
 0x1a9   : > { %v4659_v12 = vor.u32 %v5902_v9, %v4658_v18 }
 0x1aa   : > { %1149 = vmatmul.bf16.gmra.mxu1 %v759_v8  ;;  %1178 = vmatmul.bf16.gmra.mxu2 %v6678_v42  ;;  %v4642_v42 = vld [vmem:[#allocation6 + $0x260] sm:$0xf] }
 0x1ab   : > { %v4643_v45 = vor.u32 %v5898_v43, %v4642_v42  ;;  %v5922_v42 = vld [vmem:[#allocation6 + $0x324] sm:$0xf0]  ;;  %v4810_v43 = vld [vmem:[#allocation6 + $0x3b0] sm:$0xf] }
 0x1ac   : > { %1961 = vmatpush.bf16.msra.mxu3 %v4747_v25  ;;  %v4739_v44 = vor.u32 %v5922_v42, %v4738_v41  ;;  %v5918_v25 = vld [vmem:[#allocation6 + $0x304] sm:$0xf0]  ;;  %v5980_v41 = vld [vmem:[#allocation6 + $0x4f4] sm:$0xf0]  ;;  %v5899_v42 = vld [vmem:[#allocation6 + $0x274] sm:$0xf] }
 0x1ad   : > { %1914 = vmatpush.bf16.msra.mxu1 %v4643_v45  ;;  %v5940_v45 = vld [vmem:[#allocation6 + $0x3b4] sm:$0xf0] }
 0x1ae   : > { %1212 = vmatmul.bf16.gmra.mxu3 %v769_v16  ;;  %v4811_v48 = vor.u32 %v5940_v45, %v4810_v43  ;;  %v4652_v45 = vld [vmem:[#allocation6 + $0x278] sm:$0xf0] }
 0x1b0   : > { %1962 = vmatpush.bf16.msra.mxu3 %v4739_v44  ;;  %1983 = vmatpush.bf16.msrb.mxu0 %v4811_v48  ;;  %v827_v48 = vld [vmem:[#allocation4 + $0x2] ss:$8 sm:$0x3] }
 0x1b1   : > { %1915 = vmatpush.bf16.msra.mxu1 %v4635_v62  ;;  %v4730_v62 = vld [vmem:[#allocation6 + $0x310] sm:$0xf]  ;;  %v6743_v9 = vperm.slane %v827_v48, 1 }
 0x1b5   : > { %1916 = vmatpush.bf16.msra.mxu1 %v4627_v15 }
 0x1b6   : > { %1241 = vmatmul.bf16.gmra.mxu0 %v776_v19 }
 0x1b9   : > { %1917 = vmatpush.bf16.msra.mxu1 %v4619_v31  ;;  %v4787_v31 = vor.u32 %v5934_v30, %v4786_v49 }
 0x1ba   : > { %1154 = vmatmul.bf16.gmra.mxu1 %v776_v19  ;;  %1183 = vmatmul.bf16.gmra.mxu2 %v759_v8  ;;  %v4683_v19 = vor.u32 %v5908_v0, %v4682_v22  ;;  %v6723_v22 = vpack.c.b16 %v6719_v10, %v6719_v10 }
 0x1bc   : > { %1939 = vmatpush.bf16.msra.mxu2 %v4683_v19  ;;  %v4794_v19 = vld [vmem:[#allocation6 + $0x390] sm:$0xf] }
 0x1bd   : > { %1918 = vmatpush.bf16.msra.mxu1 %v4611_v54  ;;  %v4795_v28 = vor.u32 %v5936_v20, %v4794_v19  ;;  %v4962_v54 = vld [vmem:[#allocation6 + $0x4e0] sm:$0xf]  ;;  %v5962_v19 = vld [vmem:[#allocation6 + $0x464] sm:$0xf0]  ;;  %v4954_v20 = vld [vmem:[#allocation6 + $0x4d0] sm:$0xf] }
 0x1c0   : > { %1940 = vmatpush.bf16.msra.mxu2 %v4675_v39  ;;  %v4970_v39 = vld [vmem:[#allocation6 + $0x4f0] sm:$0xf] }
 0x1c1   : > { %1919 = vmatpush.bf16.msra.mxu1 %v4603_v3  ;;  %v4971_v44 = vor.u32 %v5980_v41, %v4970_v39  ;;  %v5913_v39 = vld [vmem:[#allocation6 + $0x2e4] sm:$0xf]  ;;  %v4708_v41 = vld [vmem:[#allocation6 + $0x2e8] sm:$0xf0] }
 0x1c3   : > { %v6696_v34 = vpop.f32.mrf.mxu0 }
 0x1c7   : > { %v698_v46 = vpop.f32.mrf.mxu1 }
 0x1cb   : > { %v6700_v51 = vpop.f32.mrf.mxu0 }
 0x1cd   : > { %v720_v56 = vpop.f32.mrf.mxu2 }
 0x1ce   : > { %v5904_v56 = vld [vmem:[#allocation6 + $0x294] sm:$0xf0] }
 0x1cf   : > { %v699_v63 = vpop.f32.mrf.mxu1  ;;  %v4667_v58 = vor.u32 %v5904_v56, %v4666_v55 }
 0x1d0   : > { %v5920_v63 = vld [vmem:[#allocation6 + $0x314] sm:$0xf0] }
 0x1d1   : > { %v6702_v1 = vpop.f32.mrf.mxu3  ;;  %1941 = vmatpush.bf16.msra.mxu2 %v4667_v58  ;;  %v4731_v5 = vor.u32 %v5920_v63, %v4730_v62  ;;  %v4644_v62 = vld [vmem:[#allocation6 + $0x268] sm:$0xf0]  ;;  %v6739_v63 = vperm.slane %v827_v48, 0  ;;  %v5960_v48 = vld [vmem:[#allocation6 + $0x454] sm:$0xf0] }
 0x1d2   : > { %v4647_v3 = vor.u32 %v5897_v60, %v4644_v62  ;;  %v4628_v62 = vld [vmem:[#allocation6 + $0x248] sm:$0xf0] }
 0x1d3   : > { %v6704_v4 = vpop.f32.mrf.mxu0  ;;  %1963 = vmatpush.bf16.msra.mxu3 %v4731_v5  ;;  %v5915_v5 = vld [vmem:[#allocation6 + $0x2f4] sm:$0xf] }
 0x1d5   : > { %v721_v8 = vpop.f32.mrf.mxu2  ;;  %1942 = vmatpush.bf16.msra.mxu2 %v4659_v12 }
 0x1d6   : > { %v4803_v8 = vor.u32 %v5938_v6, %v4802_v2  ;;  %v4963_v2 = vor.u32 %v5978_v59, %v4962_v54  ;;  %v4716_v6 = vld [vmem:[#allocation6 + $0x2f8] sm:$0xf0]  ;;  %v5974_v54 = vld [vmem:[#allocation6 + $0x4c4] sm:$0xf0] }
 0x1d7   : > { %v701_v16 = vpop.f32.mrf.mxu1 }
 0x1d8   : > { %1984 = vmatpush.bf16.msrb.mxu0 %v4803_v8  ;;  %v4595_v16 = vor.u32 %v5886_v14, %v4594_v13  ;;  %1943 = vmatmul.bf16.vlgmr.msra.gmra.mxu2 %v6723_v22  ;;  %v1083_v8 = vadd.f32 %v6694_v26, %v6739_v63  ;;  %v1085_v26 = vadd.f32 %v6698_v47, %v6739_v63 }
 0x1d9   : > { %v6706_v17 = vpop.f32.mrf.mxu3  ;;  %2023 = vmatpush.bf16.msrb.mxu2 %v4971_v44 }
 0x1da   : > { %1920 = vmatpush.bf16.msra.mxu1 %v4595_v16  ;;  %v1112_v14 = vadd.f32 %v6696_v34, %v1083_v8  ;;  %v4898_v16 = vld [vmem:[#allocation6 + $0x460] sm:$0xf]  ;;  %v4636_v34 = vld [vmem:[#allocation6 + $0x258] sm:$0xf0]  ;;  %v1114_v47 = vadd.f32 %v6700_v51, %v1085_v26  ;;  %v1088_v51 = vadd.f32 %v6702_v1, %v6739_v63  ;;  %v5958_v26 = vld [vmem:[#allocation6 + $0x444] sm:$0xf0] }
 0x1db   : > { %v6708_v35 = vpop.f32.mrf.mxu0 }
 0x1dc   : > { %1985 = vmatpush.bf16.msrb.mxu0 %v4795_v28 }
 0x1dd   : > { %v723_v24 = vpop.f32.mrf.mxu2  ;;  %1921 = vmatmul.bf16.vlgmr.msra.gmra.mxu1 %v6659_v33  ;;  %2024 = vmatpush.bf16.msrb.mxu2 %v4963_v2  ;;  %v5911_v2 = vld [vmem:[#allocation6 + $0x2d4] sm:$0xf] }
 0x1de   : > { %v4722_v24 = vld [vmem:[#allocation6 + $0x300] sm:$0xf] }
 0x1df   : > { %v702_v32 = vpop.f32.mrf.mxu1  ;;  %v4723_v27 = vor.u32 %v5918_v25, %v4722_v24  ;;  %v4899_v24 = vor.u32 %v5962_v19, %v4898_v16  ;;  %v5976_v25 = vld [vmem:[#allocation6 + $0x4d4] sm:$0xf0] }
 0x1e0   : > { %1986 = vmatpush.bf16.msrb.mxu0 %v4787_v31  ;;  %v5895_v31 = vld [vmem:[#allocation6 + $0x254] sm:$0xf] }
 0x1e1   : > { %v6710_v36 = vpop.f32.mrf.mxu3  ;;  %1964 = vmatpush.bf16.msra.mxu3 %v4723_v27  ;;  %v4955_v27 = vor.u32 %v5976_v25, %v4954_v20 }
 0x1e3   : > { %v6712_v40 = vpop.f32.mrf.mxu0  ;;  %2025 = vmatpush.bf16.msrb.mxu2 %v4955_v27  ;;  %v4882_v27 = vld [vmem:[#allocation6 + $0x440] sm:$0xf] }
 0x1e5   : > { %v724_v46 = vpop.f32.mrf.mxu2 }
 0x1e6   : > { %v4655_v46 = vor.u32 %v5899_v42, %v4652_v45  ;;  %v4711_v45 = vor.u32 %v5913_v39, %v4708_v41 }
 0x1e7   : > { %v704_v53 = vpop.f32.mrf.mxu1 }
 0x1e8   : > { %2045 = vmatpush.bf16.msrb.mxu3 %v4655_v46  ;;  %v5964_v53 = vld [vmem:[#allocation6 + $0x474] sm:$0xf0]  ;;  %v4890_v46 = vld [vmem:[#allocation6 + $0x450] sm:$0xf] }
 0x1e9   : > { %v6714_v57 = vpop.f32.mrf.mxu3  ;;  %v4907_v58 = vor.u32 %v5964_v53, %v4906_v52  ;;  %v4946_v53 = vld [vmem:[#allocation6 + $0x4c0] sm:$0xf] }
 0x1ea   : > { %v4947_v60 = vor.u32 %v5974_v54, %v4946_v53  ;;  %v4620_v53 = vld [vmem:[#allocation6 + $0x238] sm:$0xf0] }
 0x1eb   : > { %v6716_v61 = vpop.f32.mrf.mxu0  ;;  %2001 = vmatpush.bf16.msrb.mxu1 %v4907_v58  ;;  %v5893_v58 = vld [vmem:[#allocation6 + $0x244] sm:$0xf] }
 0x1ec   : > { %2046 = vmatpush.bf16.msrb.mxu3 %v4647_v3  ;;  %v4700_v3 = vld [vmem:[#allocation6 + $0x2d8] sm:$0xf0]  ;;  %2026 = vmatpush.bf16.msrb.mxu2 %v4947_v60 }
 0x1ed   : > { %v726_v7 = vpop.f32.mrf.mxu2 }
 0x1ee   : > { %v4719_v7 = vor.u32 %v5915_v5, %v4716_v6 }
 0x1ef   : > { %v705_v15 = vpop.f32.mrf.mxu1  ;;  %2002 = vmatpush.bf16.msrb.mxu1 %v4899_v24 }
 0x1f0   : > { %2067 = vmatpush.bf16.msra.mxu0 %v4719_v7  ;;  %v4703_v7 = vor.u32 %v5911_v2, %v4700_v3  ;;  %v5956_v2 = vld [vmem:[#allocation6 + $0x434] sm:$0xf0]  ;;  %v4930_v3 = vld [vmem:[#allocation6 + $0x4a0] sm:$0xf] }
 0x1f1   : > { %v6725_v0 = vpop.f32.mrf.mxu3 }
 0x1f3   : > { %v6727_v11 = vpop.f32.mrf.mxu0 }
 0x1f4   : > { %2068 = vmatpush.bf16.msra.mxu0 %v4711_v45 }
 0x1f5   : > { %v727_v21 = vpop.f32.mrf.mxu2 }
 0x1f7   : > { %v707_v23 = vpop.f32.mrf.mxu1 }
 0x1f8   : > { %2069 = vmatpush.bf16.msra.mxu0 %v4703_v7  ;;  %v5970_v7 = vld [vmem:[#allocation6 + $0x4a4] sm:$0xf0] }
 0x1f9   : > { %v6731_v32 = vpop.f32.mrf.mxu3 }
 0x1fb   : > { %v6733_v37 = vpop.f32.mrf.mxu0 }
 0x1fd   : > { %v729_v38 = vpop.f32.mrf.mxu2 }
 0x1fe   : > { %v4639_v38 = vor.u32 %v5895_v31, %v4636_v34  ;;  %v4883_v31 = vor.u32 %v5958_v26, %v4882_v27  ;;  %v5972_v34 = vld [vmem:[#allocation6 + $0x4b4] sm:$0xf0] }
 0x1ff   : > { %v6735_v43 = vpop.f32.mrf.mxu1 }
 0x200   : > { %2047 = vmatpush.bf16.msrb.mxu3 %v4639_v38 }
 0x201   : > { %v1198_v50 = vpop.f32.mrf.mxu3 }
 0x203   : > { %v1227_v55 = vpop.f32.mrf.mxu0 }
 0x205   : > { %v6737_v56 = vpop.f32.mrf.mxu2 }
 0x207   : > { %v1140_v18 = vpop.f32.mrf.mxu1 }
 0x208   : > { %v1141_v49 = vadd.f32 %v1140_v18, %v1112_v14  ;;  %v4631_v18 = vor.u32 %v5893_v58, %v4628_v62 }
 0x209   : > { %v1200_v12 = vpop.f32.mrf.mxu3 }
 0x20a   : > { %v1247_v42 = vmax.f32 %v1141_v49, 0.0  ;;  %2048 = vmatpush.bf16.msrb.mxu3 %v4631_v18 }
 0x20b   : > { %v1229_v28 = vpop.f32.mrf.mxu0 }
 0x20d   : > { %v1169_v13 = vpop.f32.mrf.mxu2 }
 0x20e   : > { %v1170_v15 = vadd.f32 %v1169_v13, %v6743_v9 }
 0x20f   : > { %v1142_v21 = vpop.f32.mrf.mxu1 }
 0x210   : > { %v1199_v23 = vadd.f32 %v1198_v50, %v1170_v15  ;;  %v4891_v50 = vor.u32 %v5960_v48, %v4890_v46  ;;  %v1143_v14 = vadd.f32 %v1142_v21, %v1114_v47  ;;  %v1117_v21 = vadd.f32 %v6704_v4, %v1088_v51  ;;  %v5909_v47 = vld [vmem:[#allocation6 + $0x2c4] sm:$0xf] }
 0x211   : > { %v1203_v5 = vpop.f32.mrf.mxu3 }
 0x212   : > { %v1228_v30 = vadd.f32 %v1227_v55, %v1199_v23  ;;  %2003 = vmatpush.bf16.msrb.mxu1 %v4891_v50  ;;  %v1249_v25 = vmax.f32 %v1143_v14, 0.0  ;;  %v5891_v50 = vld [vmem:[#allocation6 + $0x234] sm:$0xf] }
 0x213   : > { %v1232_v16 = vpop.f32.mrf.mxu0  ;;  %v4623_v58 = vor.u32 %v5891_v50, %v4620_v53  ;;  %v5952_v50 = vld [vmem:[#allocation6 + $0x414] sm:$0xf0] }
 0x214   : > { %v1248_v44 = vmax.f32 %v1228_v30, 0.0 }
 0x215   : > { %v1171_v52 = vpop.f32.mrf.mxu2  ;;  %2049 = vmatpush.bf16.msrb.mxu3 %v4623_v58 }
 0x216   : > { %v1263_v55 = vpack.c.bf16 %v1248_v44, %v1247_v42  ;;  %v1172_v59 = vadd.f32 %v1171_v52, %v6743_v9  ;;  %v1090_v44 = vadd.f32 %v6706_v17, %v6739_v63  ;;  %2004 = vmatpush.bf16.msrb.mxu1 %v4883_v31  ;;  %v1093_v31 = vadd.f32 %v6710_v36, %v6739_v63  ;;  %v5887_v36 = vld [vmem:[#allocation6 + $0x214] sm:$0xf] }
 0x217   : > { %v1145_v6 = vpop.f32.mrf.mxu1 }
 0x218   : > { %v1278_v8 = vunpack.c.l.b16 %v1263_v55  ;;  %v1279_v13 = vunpack.c.h.b16 %v1263_v55  ;;  %v1201_v15 = vadd.f32 %v1200_v12, %v1172_v59  ;;  %v1146_v38 = vadd.f32 %v1145_v6, %v1117_v21  ;;  %v4692_v55 = vld [vmem:[#allocation6 + $0x2c8] sm:$0xf0]  ;;  %v4874_v59 = vld [vmem:[#allocation6 + $0x430] sm:$0xf]  ;;  %v5954_v21 = vld [vmem:[#allocation6 + $0x424] sm:$0xf0] }
 0x219   : > { %v1205_v4 = vpop.f32.mrf.mxu3  ;;  %v4695_v17 = vor.u32 %v5909_v47, %v4692_v55  ;;  %v4875_v18 = vor.u32 %v5956_v2, %v4874_v59  ;;  %v5905_v59 = vld [vmem:[#allocation6 + $0x2a4] sm:$0xf] }
 0x21a   : > { %v6754_v19 = vpack.c.b16 %v1279_v13, %v6719_v10  ;;  %v1230_v20 = vadd.f32 %v1229_v28, %v1201_v15  ;;  %v6757_v24 = vpack.c.b16 %v1278_v8, %v6655_v29  ;;  %v4938_v28 = vld [vmem:[#allocation6 + $0x4b0] sm:$0xf]  ;;  %v1251_v60 = vmax.f32 %v1146_v38, 0.0 }
 0x21b   : > { %v4939_v45 = vor.u32 %v5972_v34, %v4938_v28  ;;  %v1234_v54 = vpop.f32.mrf.mxu0  ;;  %2070 = vmatpush.bf16.msra.mxu0 %v4695_v17  ;;  %2005 = vmatpush.bf16.msrb.mxu1 %v4875_v18  ;;  %v1122_v17 = vadd.f32 %v6712_v40, %v1093_v31  ;;  %v4914_v18 = vld [vmem:[#allocation6 + $0x480] sm:$0xf]  ;;  %v1095_v40 = vadd.f32 %v6714_v57, %v6739_v63  ;;  %v5885_v31 = vld [vmem:[#allocation6 + $0x204] sm:$0xf] }
 0x21c   : > { %v1250_v49 = vmax.f32 %v1230_v20, 0.0  ;;  %1965 = vmatmul.bf16.vlgmr.msra.gmra.mxu3 %v6757_v24  ;;  %1987 = vmatmul.bf16.vlgmr.msrb.gmra.mxu0 %v6754_v19  ;;  %v5907_v20 = vld [vmem:[#allocation6 + $0x2b4] sm:$0xf] }
 0x21d   : > { %v1174_v12 = vpop.f32.mrf.mxu2  ;;  %2027 = vmatpush.bf16.msrb.mxu2 %v4939_v45 }
 0x21e   : > { %v6762_v23 = vpack.c.bf16 %v1250_v49, %v1249_v25  ;;  %v1175_v1 = vadd.f32 %v1174_v12, %v6743_v9  ;;  %v4684_v25 = vld [vmem:[#allocation6 + $0x2b8] sm:$0xf0]  ;;  %v4866_v49 = vld [vmem:[#allocation6 + $0x420] sm:$0xf] }
 0x21f   : > { %v1147_v30 = vpop.f32.mrf.mxu1  ;;  %v4687_v12 = vor.u32 %v5907_v20, %v4684_v25  ;;  %v4867_v28 = vor.u32 %v5954_v21, %v4866_v49  ;;  %v4668_v21 = vld [vmem:[#allocation6 + $0x298] sm:$0xf0] }
 0x220   : > { %v1204_v39 = vadd.f32 %v1203_v5, %v1175_v1  ;;  %v1280_v41 = vunpack.c.l.b16 %v6762_v23  ;;  %v1281_v42 = vunpack.c.h.b16 %v6762_v23  ;;  %v1119_v5 = vadd.f32 %v6708_v35, %v1090_v44  ;;  %v4922_v44 = vld [vmem:[#allocation6 + $0x490] sm:$0xf] }
 0x221   : > { %2071 = vmatpush.bf16.msra.mxu0 %v4687_v12  ;;  %2006 = vmatpush.bf16.msrb.mxu1 %v4867_v28  ;;  %v5903_v12 = vld [vmem:[#allocation6 + $0x294] sm:$0xf] }
 0x222   : > { %v1233_v46 = vadd.f32 %v1232_v16, %v1204_v39  ;;  %v6769_v48 = vpack.c.b16 %v1280_v41, %v1278_v8  ;;  %v6771_v52 = vpack.c.b16 %v1281_v42, %v1279_v13  ;;  %v5889_v8 = vld [vmem:[#allocation6 + $0x224] sm:$0xf]  ;;  %v4612_v13 = vld [vmem:[#allocation6 + $0x228] sm:$0xf0]  ;;  %v4931_v16 = vor.u32 %v5970_v7, %v4930_v3  ;;  %v5966_v7 = vld [vmem:[#allocation6 + $0x484] sm:$0xf0] }
 0x223   : > { %v4615_v51 = vor.u32 %v5889_v8, %v4612_v13  ;;  %v1148_v35 = vadd.f32 %v1147_v30, %v1119_v5  ;;  %v5968_v30 = vld [vmem:[#allocation6 + $0x494] sm:$0xf0]  ;;  %v1237_v47 = vpop.f32.mrf.mxu0  ;;  %v4915_v13 = vor.u32 %v5966_v7, %v4914_v18 }
 0x224   : > { %v1252_v62 = vmax.f32 %v1233_v46, 0.0  ;;  %1924 = vmatmul.bf16.gmra.mxu1 %v6769_v48  ;;  %1946 = vmatmul.bf16.gmra.mxu2 %v6771_v52  ;;  %v4923_v45 = vor.u32 %v5968_v30, %v4922_v44  ;;  %v4858_v46 = vld [vmem:[#allocation6 + $0x410] sm:$0xf]  ;;  %v5901_v30 = vld [vmem:[#allocation6 + $0x284] sm:$0xf] }
 0x225   : > { %v1176_v6 = vpop.f32.mrf.mxu2  ;;  %2028 = vmatpush.bf16.msrb.mxu2 %v4931_v16  ;;  %2050 = vmatpush.bf16.msrb.mxu3 %v4615_v51  ;;  %v1253_v53 = vmax.f32 %v1148_v35, 0.0 }
 0x226   : > { %v1177_v14 = vadd.f32 %v1176_v6, %v6743_v9  ;;  %v6777_v15 = vpack.c.bf16 %v1252_v62, %v1251_v60  ;;  %v4676_v60 = vld [vmem:[#allocation6 + $0x2a8] sm:$0xf0]  ;;  %v4850_v62 = vld [vmem:[#allocation6 + $0x400] sm:$0xf]  ;;  %v5950_v6 = vld [vmem:[#allocation6 + $0x404] sm:$0xf0] }
 0x227   : > { %v1150_v26 = vpop.f32.mrf.mxu1  ;;  %v4679_v5 = vor.u32 %v5905_v59, %v4676_v60  ;;  %v4851_v8 = vor.u32 %v5950_v6, %v4850_v62  ;;  %v1098_v59 = vadd.f32 %v6725_v0, %v6739_v63 }
 0x228   : > { %v1206_v23 = vadd.f32 %v1205_v4, %v1177_v14  ;;  %v1282_v1 = vunpack.c.l.b16 %v6777_v15  ;;  %v1283_v27 = vunpack.c.h.b16 %v6777_v15  ;;  %v1208_v4 = vpop.f32.mrf.mxu3  ;;  %v1151_v14 = vadd.f32 %v1150_v26, %v1122_v17 }
 0x229   : > { %2029 = vmatpush.bf16.msrb.mxu2 %v4923_v45  ;;  %2072 = vmatpush.bf16.msra.mxu0 %v4679_v5  ;;  %v1124_v45 = vadd.f32 %v6716_v61, %v1095_v40  ;;  %v4908_v5 = vld [vmem:[#allocation6 + $0x478] sm:$0xf0]  ;;  %v1127_v0 = vadd.f32 %v6727_v11, %v1098_v59  ;;  %v4836_v40 = vld [vmem:[#allocation6 + $0x3e8] sm:$0xf0] }
 0x22a   : > { %v1235_v34 = vadd.f32 %v1234_v54, %v1206_v23  ;;  %v6783_v38 = vpack.c.b16 %v1282_v1, %v1280_v41  ;;  %v6785_v39 = vpack.c.b16 %v1283_v27, %v1281_v42  ;;  %v4604_v54 = vld [vmem:[#allocation6 + $0x218] sm:$0xf0]  ;;  %v4859_v41 = vor.u32 %v5952_v50, %v4858_v46 }
 0x22b   : > { %v4607_v55 = vor.u32 %v5887_v36, %v4604_v54  ;;  %v4671_v23 = vor.u32 %v5903_v12, %v4668_v21  ;;  %v1255_v28 = vmax.f32 %v1151_v14, 0.0  ;;  %v1239_v36 = vpop.f32.mrf.mxu0  ;;  %v5945_v14 = vld [vmem:[#allocation6 + $0x3e4] sm:$0xf] }
 0x22c   : > { %v1254_v58 = vmax.f32 %v1235_v34, 0.0  ;;  %1968 = vmatmul.bf16.gmra.mxu3 %v6783_v38  ;;  %1990 = vmatmul.bf16.gmra.mxu0 %v6785_v39  ;;  %v4596_v34 = vld [vmem:[#allocation6 + $0x208] sm:$0xf0]  ;;  %v4839_v12 = vor.u32 %v5945_v14, %v4836_v40  ;;  %v5975_v40 = vld [vmem:[#allocation6 + $0x4d4] sm:$0xf] }
 0x22d   : > { %v1179_v42 = vpop.f32.mrf.mxu2  ;;  %2051 = vmatpush.bf16.msrb.mxu3 %v4607_v55  ;;  %2007 = vmatpush.bf16.msrb.mxu1 %v4859_v41  ;;  %v4820_v14 = vld [vmem:[#allocation6 + $0x3c8] sm:$0xf0] }
 0x22e   : > { %v1266_v2 = vpack.c.bf16 %v1254_v58, %v1253_v53  ;;  %v1180_v3 = vadd.f32 %v1179_v42, %v6743_v9  ;;  %2030 = vmatpush.bf16.msrb.mxu2 %v4915_v13  ;;  %2073 = vmatpush.bf16.msra.mxu0 %v4671_v23  ;;  %v4844_v58 = vld [vmem:[#allocation6 + $0x3f8] sm:$0xf0] }
 0x22f   : > { %v1152_v35 = vpop.f32.mrf.mxu1  ;;  %v4780_v13 = vld [vmem:[#allocation6 + $0x378] sm:$0xf0] }
 0x230   : > { %v1284_v15 = vunpack.c.l.b16 %v1266_v2  ;;  %v1209_v16 = vadd.f32 %v1208_v4, %v1180_v3  ;;  %v1285_v51 = vunpack.c.h.b16 %v1266_v2  ;;  %v1210_v44 = vpop.f32.mrf.mxu3  ;;  %v5947_v4 = vld [vmem:[#allocation6 + $0x3f4] sm:$0xf]  ;;  %v1153_v41 = vadd.f32 %v1152_v35, %v1124_v45  ;;  %v4972_v45 = vld [vmem:[#allocation6 + $0x4f8] sm:$0xf0] }
 0x231   : > { %2008 = vmatpush.bf16.msrb.mxu1 %v4851_v8  ;;  %v4847_v54 = vor.u32 %v5947_v4, %v4844_v58  ;;  %v5963_v3 = vld [vmem:[#allocation6 + $0x474] sm:$0xf]  ;;  %v4772_v58 = vld [vmem:[#allocation6 + $0x368] sm:$0xf0] }
 0x232   : > { %v6793_v20 = vpack.c.b16 %v1284_v15, %v1282_v1  ;;  %v1238_v25 = vadd.f32 %v1237_v47, %v1209_v16  ;;  %v6795_v49 = vpack.c.b16 %v1285_v51, %v1283_v27  ;;  %v4599_v1 = vor.u32 %v5885_v31, %v4596_v34  ;;  %v4660_v27 = vld [vmem:[#allocation6 + $0x288] sm:$0xf0]  ;;  %v5931_v8 = vld [vmem:[#allocation6 + $0x374] sm:$0xf] }
 0x233   : > { %v4663_v53 = vor.u32 %v5901_v30, %v4660_v27  ;;  %2111 = vmatpush.bf16.msra.mxu2 %v4847_v54  ;;  %v1257_v17 = vmax.f32 %v1153_v41, 0.0  ;;  %v4911_v7 = vor.u32 %v5963_v3, %v4908_v5  ;;  %v4900_v30 = vld [vmem:[#allocation6 + $0x468] sm:$0xf0]  ;;  %v5979_v4 = vld [vmem:[#allocation6 + $0x4f4] sm:$0xf] }
 0x234   : > { %v1256_v26 = vmax.f32 %v1238_v25, 0.0  ;;  %1927 = vmatmul.bf16.gmra.mxu1 %v6793_v20  ;;  %1949 = vmatmul.bf16.gmra.mxu2 %v6795_v49  ;;  %v4828_v54 = vld [vmem:[#allocation6 + $0x3d8] sm:$0xf0]  ;;  %v5977_v5 = vld [vmem:[#allocation6 + $0x4e4] sm:$0xf] }
 0x235   : > { %v1181_v57 = vpop.f32.mrf.mxu2  ;;  %2052 = vmatpush.bf16.msrb.mxu3 %v4599_v1  ;;  %2074 = vmatpush.bf16.msra.mxu0 %v4663_v53  ;;  %v5961_v1 = vld [vmem:[#allocation6 + $0x464] sm:$0xf]  ;;  %v4975_v53 = vor.u32 %v5979_v4, %v4972_v45  ;;  %v4948_v4 = vld [vmem:[#allocation6 + $0x4c8] sm:$0xf0]  ;;  %v5923_v45 = vld [vmem:[#allocation6 + $0x334] sm:$0xf] }
 0x236   : > { %v1182_v46 = vadd.f32 %v1181_v57, %v6743_v9  ;;  %v1267_v50 = vpack.c.bf16 %v1256_v26, %v1255_v28  ;;  %v1242_v26 = vpop.f32.mrf.mxu0  ;;  %v4903_v27 = vor.u32 %v5961_v1, %v4900_v30  ;;  %v4876_v1 = vld [vmem:[#allocation6 + $0x438] sm:$0xf0]  ;;  %v5973_v30 = vld [vmem:[#allocation6 + $0x4c4] sm:$0xf] }
 0x237   : > { %v1155_v6 = vpop.f32.mrf.mxu1  ;;  %2112 = vmatpush.bf16.msra.mxu2 %v4839_v12  ;;  %v4956_v12 = vld [vmem:[#allocation6 + $0x4d8] sm:$0xf0] }
 0x238   : > { %v1211_v47 = vadd.f32 %v1210_v44, %v1182_v46  ;;  %v1286_v42 = vunpack.c.l.b16 %v1267_v50  ;;  %v1287_v55 = vunpack.c.h.b16 %v1267_v50  ;;  %v1213_v25 = vpop.f32.mrf.mxu3  ;;  %v1156_v21 = vadd.f32 %v1155_v6, %v1127_v0  ;;  %v5929_v46 = vld [vmem:[#allocation6 + $0x364] sm:$0xf]  ;;  %v4964_v6 = vld [vmem:[#allocation6 + $0x4e8] sm:$0xf0] }
 0x239   : > { %2133 = vmatpush.bf16.msra.mxu3 %v4911_v7  ;;  %v4775_v41 = vor.u32 %v5929_v46, %v4772_v58  ;;  %2155 = vmatpush.bf16.msrb.mxu0 %v4975_v53  ;;  %v4967_v7 = vor.u32 %v5977_v5, %v4964_v6  ;;  %v4748_v46 = vld [vmem:[#allocation6 + $0x338] sm:$0xf0]  ;;  %v4951_v53 = vor.u32 %v5973_v30, %v4948_v4  ;;  %v5921_v6 = vld [vmem:[#allocation6 + $0x324] sm:$0xf] }
 0x23a   : > { %v1240_v60 = vadd.f32 %v1239_v36, %v1211_v47  ;;  %v6803_v62 = vpack.c.b16 %v1286_v42, %v1284_v15  ;;  %v6805_v61 = vpack.c.b16 %v1287_v55, %v1285_v51  ;;  %v4783_v51 = vor.u32 %v5931_v8, %v4780_v13  ;;  %v5943_v36 = vld [vmem:[#allocation6 + $0x3d4] sm:$0xf]  ;;  %v4764_v8 = vld [vmem:[#allocation6 + $0x358] sm:$0xf0]  ;;  %v5941_v13 = vld [vmem:[#allocation6 + $0x3c4] sm:$0xf] }
 0x23b   : > { %v1259_v11 = vmax.f32 %v1156_v21, 0.0  ;;  %v4831_v47 = vor.u32 %v5943_v36, %v4828_v54  ;;  %v5925_v21 = vld [vmem:[#allocation6 + $0x344] sm:$0xf]  ;;  %v4751_v58 = vor.u32 %v5923_v45, %v4748_v46  ;;  %v4804_v54 = vld [vmem:[#allocation6 + $0x3a8] sm:$0xf0] }
 0x23c   : > { %v1258_v2 = vmax.f32 %v1240_v60, 0.0  ;;  %1971 = vmatmul.bf16.gmra.mxu3 %v6803_v62  ;;  %1993 = vmatmul.bf16.gmra.mxu0 %v6805_v61  ;;  %v5937_v36 = vld [vmem:[#allocation6 + $0x3a4] sm:$0xf]  ;;  %v4940_v5 = vld [vmem:[#allocation6 + $0x4b8] sm:$0xf0] }
 0x23d   : > { %v1184_v18 = vpop.f32.mrf.mxu2  ;;  %2089 = vmatpush.bf16.msra.mxu1 %v4783_v51  ;;  %2134 = vmatpush.bf16.msra.mxu3 %v4903_v27  ;;  %v4884_v51 = vld [vmem:[#allocation6 + $0x448] sm:$0xf0]  ;;  %v5933_v4 = vld [vmem:[#allocation6 + $0x384] sm:$0xf] }
 0x23e   : > { %v1268_v15 = vpack.c.bf16 %v1258_v2, %v1257_v17  ;;  %v1185_v16 = vadd.f32 %v1184_v18, %v6743_v9  ;;  %2113 = vmatpush.bf16.msra.mxu2 %v4831_v47  ;;  %v5959_v17 = vld [vmem:[#allocation6 + $0x454] sm:$0xf]  ;;  %v4892_v2 = vld [vmem:[#allocation6 + $0x458] sm:$0xf0]  ;;  %2156 = vmatpush.bf16.msrb.mxu0 %v4967_v7  ;;  %v5953_v47 = vld [vmem:[#allocation6 + $0x424] sm:$0xf] }
 0x23f   : > { %v4895_v3 = vor.u32 %v5959_v17, %v4892_v2  ;;  %v5927_v18 = vld [vmem:[#allocation6 + $0x354] sm:$0xf]  ;;  %v4868_v17 = vld [vmem:[#allocation6 + $0x428] sm:$0xf0] }
 0x240   : > { %v1288_v35 = vunpack.c.l.b16 %v1268_v15  ;;  %v1214_v23 = vadd.f32 %v1213_v25, %v1185_v16  ;;  %v1289_v28 = vunpack.c.h.b16 %v1268_v15  ;;  %v4767_v0 = vor.u32 %v5927_v18, %v4764_v8  ;;  %v5957_v16 = vld [vmem:[#allocation6 + $0x444] sm:$0xf]  ;;  %v5971_v2 = vld [vmem:[#allocation6 + $0x4b4] sm:$0xf]  ;;  %v4740_v18 = vld [vmem:[#allocation6 + $0x328] sm:$0xf0] }
 0x241   : > { %2090 = vmatpush.bf16.msra.mxu1 %v4775_v41  ;;  %2135 = vmatpush.bf16.msra.mxu3 %v4895_v3  ;;  %v4823_v15 = vor.u32 %v5941_v13, %v4820_v14  ;;  %v4887_v25 = vor.u32 %v5957_v16, %v4884_v51  ;;  %v4807_v41 = vor.u32 %v5937_v36, %v4804_v54  ;;  %v5935_v13 = vld [vmem:[#allocation6 + $0x394] sm:$0xf]  ;;  %v4796_v14 = vld [vmem:[#allocation6 + $0x398] sm:$0xf0]  ;;  %v1157_v16 = vpop.f32.mrf.mxu1  ;;  %v4788_v45 = vld [vmem:[#allocation6 + $0x388] sm:$0xf0] }
 0x242   : > { %v6811_v31 = vpack.c.b16 %v1288_v35, %v1286_v42  ;;  %v1243_v34 = vadd.f32 %v1242_v26, %v1214_v23  ;;  %v6813_v44 = vpack.c.b16 %v1289_v28, %v1287_v55  ;;  %v4959_v23 = vor.u32 %v5975_v40, %v4956_v12  ;;  %v5939_v26 = vld [vmem:[#allocation6 + $0x3b4] sm:$0xf] }
 0x243   : > { %2114 = vmatpush.bf16.msra.mxu2 %v4823_v15  ;;  %v4871_v3 = vor.u32 %v5953_v47, %v4868_v17  ;;  %v4943_v7 = vor.u32 %v5971_v2, %v4940_v5  ;;  %v4743_v8 = vor.u32 %v5921_v6, %v4740_v18  ;;  %v4799_v15 = vor.u32 %v5935_v13, %v4796_v14  ;;  %v5919_v40 = vld [vmem:[#allocation6 + $0x314] sm:$0xf]  ;;  %v4924_v47 = vld [vmem:[#allocation6 + $0x498] sm:$0xf0]  ;;  %v5965_v18 = vld [vmem:[#allocation6 + $0x484] sm:$0xf] }
 0x244   : > { %v1260_v57 = vmax.f32 %v1243_v34, 0.0  ;;  %1930 = vmatmul.bf16.gmra.mxu1 %v6811_v31  ;;  %1952 = vmatmul.bf16.gmra.mxu2 %v6813_v44  ;;  %v4812_v34 = vld [vmem:[#allocation6 + $0x3b8] sm:$0xf0]  ;;  %v4791_v46 = vor.u32 %v5933_v4, %v4788_v45 }
 0x245   : > { %2091 = vmatpush.bf16.msra.mxu1 %v4767_v0  ;;  %2136 = vmatpush.bf16.msra.mxu3 %v4887_v25  ;;  %v1186_v0 = vpop.f32.mrf.mxu2  ;;  %v4732_v25 = vld [vmem:[#allocation6 + $0x318] sm:$0xf0] }
 0x246   : > { %v6817_v50 = vpack.c.bf16 %v1260_v57, %v1259_v11  ;;  %v4815_v11 = vor.u32 %v5939_v26, %v4812_v34  ;;  %2157 = vmatpush.bf16.msrb.mxu0 %v4959_v23  ;;  %v5955_v57 = vld [vmem:[#allocation6 + $0x434] sm:$0xf]  ;;  %v1187_v51 = vadd.f32 %v1186_v0, %v6743_v9  ;;  %v4735_v12 = vor.u32 %v5919_v40, %v4732_v25  ;;  %v5969_v23 = vld [vmem:[#allocation6 + $0x4a4] sm:$0xf]  ;;  %v4932_v34 = vld [vmem:[#allocation6 + $0x4a8] sm:$0xf0] }
 0x247   : > { %v4879_v27 = vor.u32 %v5955_v57, %v4876_v1  ;;  %v4724_v57 = vld [vmem:[#allocation6 + $0x308] sm:$0xf0]  ;;  %v1100_v1 = vadd.f32 %v6731_v32, %v6739_v63  ;;  %v4935_v30 = vor.u32 %v5969_v23, %v4932_v34  ;;  %v5949_v32 = vld [vmem:[#allocation6 + $0x404] sm:$0xf] }
 0x248   : > { %v1305_v42 = vunpack.c.l.b16 %v6817_v50  ;;  %v1306_v55 = vunpack.c.h.b16 %v6817_v50  ;;  %2115 = vmatpush.bf16.msra.mxu2 %v4815_v11  ;;  %v5917_v11 = vld [vmem:[#allocation6 + $0x304] sm:$0xf]  ;;  %v4852_v63 = vld [vmem:[#allocation6 + $0x408] sm:$0xf0] }
 0x249   : > { %2137 = vmatpush.bf16.msra.mxu3 %v4879_v27  ;;  %v4727_v27 = vor.u32 %v5917_v11, %v4724_v57  ;;  %v1129_v36 = vadd.f32 %v6733_v37, %v1100_v1 }
 0x24a   : > { %v6823_v59 = vpack.c.b16 %v1305_v42, %v1288_v35  ;;  %v6827_v60 = vpack.c.b16 %v1306_v55, %v1289_v28  ;;  %v4756_v35 = vld [vmem:[#allocation6 + $0x348] sm:$0xf0]  ;;  %2158 = vmatpush.bf16.msrb.mxu0 %v4951_v53  ;;  %v1244_v53 = vpop.f32.mrf.mxu0 }
 0x24b   : > { %v4759_v28 = vor.u32 %v5925_v21, %v4756_v35  ;;  %v5951_v21 = vld [vmem:[#allocation6 + $0x414] sm:$0xf]  ;;  %v4860_v35 = vld [vmem:[#allocation6 + $0x418] sm:$0xf0]  ;;  %v1158_v2 = vadd.f32 %v1157_v16, %v1129_v36 }
 0x24c   : > { %1974 = vmatmul.bf16.gmra.mxu3 %v6823_v59  ;;  %1996 = vmatmul.bf16.gmra.mxu0 %v6827_v60  ;;  %v4863_v26 = vor.u32 %v5951_v21, %v4860_v35 }
 0x24d   : > { %2092 = vmatpush.bf16.msra.mxu1 %v4759_v28  ;;  %2116 = vmatpush.bf16.msra.mxu2 %v4807_v41  ;;  %v1215_v28 = vpop.f32.mrf.mxu3  ;;  %v5967_v41 = vld [vmem:[#allocation6 + $0x494] sm:$0xf]  ;;  %v1261_v37 = vmax.f32 %v1158_v2, 0.0 }
 0x24e   : > { %2138 = vmatpush.bf16.msra.mxu3 %v4871_v3  ;;  %2159 = vmatpush.bf16.msrb.mxu0 %v4943_v7  ;;  %v1216_v9 = vadd.f32 %v1215_v28, %v1187_v51  ;;  %v4927_v17 = vor.u32 %v5967_v41, %v4924_v47  ;;  %v4855_v3 = vor.u32 %v5949_v32, %v4852_v63  ;;  %v4916_v7 = vld [vmem:[#allocation6 + $0x488] sm:$0xf0] }
 0x250   : > { %v1245_v54 = vadd.f32 %v1244_v53, %v1216_v9 }
 0x251   : > { %2093 = vmatpush.bf16.msra.mxu1 %v4751_v58  ;;  %2117 = vmatpush.bf16.msra.mxu2 %v4799_v15 }
 0x252   : > { %2139 = vmatpush.bf16.msra.mxu3 %v4863_v26  ;;  %2160 = vmatpush.bf16.msrb.mxu0 %v4935_v30  ;;  %v1262_v5 = vmax.f32 %v1245_v54, 0.0 }
 0x254   : > { %2009 = vmatmul.bf16.vlgmr.msrb.gmra.mxu1 %v6769_v48  ;;  %2031 = vmatmul.bf16.vlgmr.msrb.gmra.mxu2 %v6771_v52  ;;  %v1270_v14 = vpack.c.bf16 %v1262_v5, %v1261_v37 }
 0x255   : > { %2094 = vmatpush.bf16.msra.mxu1 %v4743_v8  ;;  %2118 = vmatpush.bf16.msra.mxu2 %v4791_v46  ;;  %v4919_v8 = vor.u32 %v5965_v18, %v4916_v7  ;;  %v5996_v18 = vld [vmem:[#allocation6 + $0x574] sm:$0xf0] }
 0x256   : > { %2161 = vmatpush.bf16.msrb.mxu0 %v4927_v17  ;;  %2140 = vmatpush.bf16.msra.mxu3 %v4855_v3  ;;  %v1324_v0 = vunpack.c.l.b16 %v1270_v14  ;;  %v1325_v15 = vunpack.c.h.b16 %v1270_v14 }
 0x258   : > { %v1326_v51 = vpack.c.b16 %v1324_v0, %v1305_v42  ;;  %v1327_v40 = vpack.c.b16 %v1325_v15, %v1306_v55  ;;  %v5026_v0 = vld [vmem:[#allocation6 + $0x560] sm:$0xf]  ;;  %v5994_v15 = vld [vmem:[#allocation6 + $0x564] sm:$0xf0] }
 0x259   : > { %2095 = vmatpush.bf16.msra.mxu1 %v4735_v12 }
 0x25a   : > { %v1922_v58 = vpop.f32.mrf.mxu1  ;;  %2162 = vmatpush.bf16.msrb.mxu0 %v4919_v8 }
 0x25b   : > { %v1944_v6 = vpop.f32.mrf.mxu2 }
 0x25c   : > { %2053 = vmatmul.bf16.vlgmr.msrb.gmra.mxu3 %v6659_v33  ;;  %2075 = vmatmul.bf16.vlgmr.msra.gmra.mxu0 %v6723_v22  ;;  %v5034_v6 = vld [vmem:[#allocation6 + $0x570] sm:$0xf] }
 0x25d   : > { %2096 = vmatpush.bf16.msra.mxu1 %v4727_v27  ;;  %v5035_v37 = vor.u32 %v5996_v18, %v5034_v6  ;;  %v5066_v6 = vld [vmem:[#allocation6 + $0x5b0] sm:$0xf]  ;;  %v6004_v18 = vld [vmem:[#allocation6 + $0x5b4] sm:$0xf0] }
 0x261   : > { %2778 = vmatpush.bf16.msrb.mxu1 %v5035_v37  ;;  %v5028_v37 = vld [vmem:[#allocation6 + $0x568] sm:$0xf0] }
 0x262   : > { %v1923_v13 = vpop.f32.mrf.mxu1 }
 0x263   : > { %v1945_v16 = vpop.f32.mrf.mxu2 }
 0x264   : > { %2012 = vmatmul.bf16.gmra.mxu1 %v6793_v20  ;;  %2034 = vmatmul.bf16.gmra.mxu2 %v6795_v49  ;;  %v5027_v16 = vor.u32 %v5994_v15, %v5026_v0 }
 0x266   : > { %2779 = vmatpush.bf16.msrb.mxu1 %v5027_v16  ;;  %v5058_v16 = vld [vmem:[#allocation6 + $0x5a0] sm:$0xf] }
 0x26c   : > { %2056 = vmatmul.bf16.gmra.mxu3 %v6769_v48  ;;  %2078 = vmatmul.bf16.gmra.mxu0 %v6771_v52 }
 0x274   : > { %2015 = vmatmul.bf16.gmra.mxu1 %v6811_v31  ;;  %2037 = vmatmul.bf16.gmra.mxu2 %v6813_v44 }
 0x27c   : > { %2059 = vmatmul.bf16.gmra.mxu3 %v6793_v20  ;;  %2081 = vmatmul.bf16.gmra.mxu0 %v6795_v49 }
 0x284   : > { %2018 = vmatmul.bf16.gmra.mxu1 %v1326_v51  ;;  %2040 = vmatmul.bf16.gmra.mxu2 %v1327_v40 }
 0x28c   : > { %2062 = vmatmul.bf16.gmra.mxu3 %v6811_v31  ;;  %2084 = vmatmul.bf16.gmra.mxu0 %v6813_v44 }
 0x294   : > { %2097 = vmatmul.bf16.vlgmr.msra.gmra.mxu1 %v6757_v24  ;;  %2119 = vmatmul.bf16.vlgmr.msra.gmra.mxu2 %v6754_v19 }
 0x299   : > { %v1988_v25 = vpop.f32.mrf.mxu0 }
 0x29c   : > { %2141 = vmatmul.bf16.vlgmr.msra.gmra.mxu3 %v6769_v48  ;;  %2163 = vmatmul.bf16.vlgmr.msrb.gmra.mxu0 %v6771_v52 }
 0x29f   : > { %v1966_v12 = vpop.f32.mrf.mxu3 }
 0x2a1   : > { %v1925_v42 = vpop.f32.mrf.mxu1  ;;  %v1989_v21 = vpop.f32.mrf.mxu0 }
 0x2a2   : > { %v5018_v42 = vld [vmem:[#allocation6 + $0x550] sm:$0xf]  ;;  %v5992_v21 = vld [vmem:[#allocation6 + $0x554] sm:$0xf0] }
 0x2a4   : > { %2100 = vmatmul.bf16.gmra.mxu1 %v6783_v38  ;;  %2122 = vmatmul.bf16.gmra.mxu2 %v6785_v39 }
 0x2a7   : > { %v1947_v50 = vpop.f32.mrf.mxu2  ;;  %v1967_v55 = vpop.f32.mrf.mxu3 }
 0x2a8   : > { %v5019_v50 = vor.u32 %v5992_v21, %v5018_v42  ;;  %v4994_v42 = vld [vmem:[#allocation6 + $0x520] sm:$0xf]  ;;  %v5986_v21 = vld [vmem:[#allocation6 + $0x524] sm:$0xf0] }
 0x2a9   : > { %v1926_v35 = vpop.f32.mrf.mxu1  ;;  %v1991_v23 = vpop.f32.mrf.mxu0 }
 0x2aa   : > { %v5098_v23 = vld [vmem:[#allocation6 + $0x5f0] sm:$0xf]  ;;  %2780 = vmatpush.bf16.msrb.mxu1 %v5019_v50 }
 0x2ac   : > { %2144 = vmatmul.bf16.gmra.mxu3 %v6793_v20  ;;  %2166 = vmatmul.bf16.gmra.mxu0 %v6795_v49 }
 0x2af   : > { %v1948_v19 = vpop.f32.mrf.mxu2  ;;  %v1969_v24 = vpop.f32.mrf.mxu3 }
 0x2b0   : > { %v6012_v19 = vld [vmem:[#allocation6 + $0x5f4] sm:$0xf0]  ;;  %v5162_v24 = vld [vmem:[#allocation6 + $0x670] sm:$0xf] }
 0x2b1   : > { %v1928_v48 = vpop.f32.mrf.mxu1  ;;  %v1992_v28 = vpop.f32.mrf.mxu0 }
 0x2b2   : > { %v5099_v48 = vor.u32 %v6012_v19, %v5098_v23  ;;  %v6028_v28 = vld [vmem:[#allocation6 + $0x674] sm:$0xf0]  ;;  %v4995_v23 = vor.u32 %v5986_v21, %v4994_v42 }
 0x2b4   : > { %2103 = vmatmul.bf16.gmra.mxu1 %v6803_v62  ;;  %2125 = vmatmul.bf16.gmra.mxu2 %v6805_v61 }
 0x2b5   : > { %2797 = vmatpush.bf16.msrb.mxu2 %v5099_v48 }
 0x2b7   : > { %v1950_v52 = vpop.f32.mrf.mxu2  ;;  %v1970_v38 = vpop.f32.mrf.mxu3 }
 0x2b8   : > { %v5163_v52 = vor.u32 %v6028_v28, %v5162_v24  ;;  %v5090_v38 = vld [vmem:[#allocation6 + $0x5e0] sm:$0xf]  ;;  %v5050_v28 = vld [vmem:[#allocation6 + $0x590] sm:$0xf] }
 0x2b9   : > { %v1929_v26 = vpop.f32.mrf.mxu1  ;;  %v1994_v39 = vpop.f32.mrf.mxu0 }
 0x2ba   : > { %2816 = vmatpush.bf16.msrb.mxu3 %v5163_v52  ;;  %v6010_v26 = vld [vmem:[#allocation6 + $0x5e4] sm:$0xf0]  ;;  %v6000_v52 = vld [vmem:[#allocation6 + $0x594] sm:$0xf0] }
 0x2bc   : > { %2147 = vmatmul.bf16.gmra.mxu3 %v6811_v31  ;;  %2169 = vmatmul.bf16.gmra.mxu0 %v6813_v44 }
 0x2bf   : > { %v1951_v34 = vpop.f32.mrf.mxu2  ;;  %v1972_v20 = vpop.f32.mrf.mxu3 }
 0x2c0   : > { %v5010_v20 = vld [vmem:[#allocation6 + $0x540] sm:$0xf] }
 0x2c1   : > { %v1931_v11 = vpop.f32.mrf.mxu1  ;;  %v1995_v49 = vpop.f32.mrf.mxu0 }
 0x2c2   : > { %v5990_v11 = vld [vmem:[#allocation6 + $0x544] sm:$0xf0]  ;;  %v5091_v49 = vor.u32 %v6010_v26, %v5090_v38  ;;  %v5989_v38 = vld [vmem:[#allocation6 + $0x544] sm:$0xf]  ;;  %v5051_v26 = vor.u32 %v6000_v52, %v5050_v28  ;;  %v6060_v28 = vld [vmem:[#allocation6 + $0x774] sm:$0xf0] }
 0x2c3   : > { %v6059_v52 = vld [vmem:[#allocation6 + $0x774] sm:$0xf] }
 0x2c4   : > { %2106 = vmatmul.bf16.gmra.mxu1 %v6823_v59  ;;  %2128 = vmatmul.bf16.gmra.mxu2 %v6827_v60 }
 0x2c5   : > { %2798 = vmatpush.bf16.msrb.mxu2 %v5091_v49 }
 0x2c7   : > { %v1953_v57 = vpop.f32.mrf.mxu2  ;;  %v1973_v62 = vpop.f32.mrf.mxu3 }
 0x2c8   : > { %v5011_v57 = vor.u32 %v5990_v11, %v5010_v20  ;;  %v5138_v20 = vld [vmem:[#allocation6 + $0x640] sm:$0xf]  ;;  %v6022_v11 = vld [vmem:[#allocation6 + $0x644] sm:$0xf0] }
 0x2c9   : > { %v6867_v1 = vpop.f32.mrf.mxu1  ;;  %v1997_v61 = vpop.f32.mrf.mxu0 }
 0x2ca   : > { %2781 = vmatpush.bf16.msrb.mxu1 %v5011_v57  ;;  %v5139_v57 = vor.u32 %v6022_v11, %v5138_v20 }
 0x2cc   : > { %2150 = vmatmul.bf16.gmra.mxu3 %v1326_v51  ;;  %2172 = vmatmul.bf16.gmra.mxu0 %v1327_v40 }
 0x2cf   : > { %v6869_v9 = vpop.f32.mrf.mxu2  ;;  %v1975_v31 = vpop.f32.mrf.mxu3 }
 0x2d0   : > { %v5082_v31 = vld [vmem:[#allocation6 + $0x5d0] sm:$0xf] }
 0x2d1   : > { %v6871_v30 = vpop.f32.mrf.mxu0  ;;  %v2010_v44 = vpop.f32.mrf.mxu1 }
 0x2d2   : > { %v6008_v44 = vld [vmem:[#allocation6 + $0x5d4] sm:$0xf0] }
 0x2d7   : > { %v6873_v27 = vpop.f32.mrf.mxu3  ;;  %v2032_v4 = vpop.f32.mrf.mxu2 }
 0x2d8   : > { %v5154_v4 = vld [vmem:[#allocation6 + $0x660] sm:$0xf] }
 0x2d9   : > { %v2011_v45 = vpop.f32.mrf.mxu1  ;;  %v2076_v59 = vpop.f32.mrf.mxu0 }
 0x2da   : > { %v5083_v45 = vor.u32 %v6008_v44, %v5082_v31  ;;  %v6026_v59 = vld [vmem:[#allocation6 + $0x664] sm:$0xf0]  ;;  %v5984_v31 = vld [vmem:[#allocation6 + $0x514] sm:$0xf0]  ;;  %v5042_v44 = vld [vmem:[#allocation6 + $0x580] sm:$0xf] }
 0x2dc   : > { %2799 = vmatpush.bf16.msrb.mxu2 %v5083_v45 }
 0x2df   : > { %v2033_v46 = vpop.f32.mrf.mxu2  ;;  %v2054_v60 = vpop.f32.mrf.mxu3 }
 0x2e0   : > { %v5155_v46 = vor.u32 %v6026_v59, %v5154_v4  ;;  %v5074_v60 = vld [vmem:[#allocation6 + $0x5c0] sm:$0xf] }
 0x2e1   : > { %v2013_v53 = vpop.f32.mrf.mxu1  ;;  %v2077_v58 = vpop.f32.mrf.mxu0 }
 0x2e2   : > { %2817 = vmatpush.bf16.msrb.mxu3 %v5155_v46  ;;  %v6006_v53 = vld [vmem:[#allocation6 + $0x5c4] sm:$0xf0] }
 0x2e3   : > { %v5998_v46 = vld [vmem:[#allocation6 + $0x584] sm:$0xf0] }
 0x2e7   : > { %v2035_v36 = vpop.f32.mrf.mxu2  ;;  %v2055_v54 = vpop.f32.mrf.mxu3 }
 0x2e8   : > { %v5002_v54 = vld [vmem:[#allocation6 + $0x530] sm:$0xf] }
 0x2e9   : > { %v2014_v41 = vpop.f32.mrf.mxu1  ;;  %v2079_v47 = vpop.f32.mrf.mxu0 }
 0x2ea   : > { %v5988_v41 = vld [vmem:[#allocation6 + $0x534] sm:$0xf0]  ;;  %v5075_v47 = vor.u32 %v6006_v53, %v5074_v60  ;;  %v5987_v60 = vld [vmem:[#allocation6 + $0x534] sm:$0xf]  ;;  %v5004_v53 = vld [vmem:[#allocation6 + $0x538] sm:$0xf0] }
 0x2ec   : > { %2800 = vmatpush.bf16.msrb.mxu2 %v5075_v47 }
 0x2ef   : > { %v2036_v17 = vpop.f32.mrf.mxu2  ;;  %v2057_v2 = vpop.f32.mrf.mxu3 }
 0x2f0   : > { %v5995_v17 = vld [vmem:[#allocation6 + $0x574] sm:$0xf]  ;;  %v5003_v2 = vor.u32 %v5988_v41, %v5002_v54  ;;  %v5007_v54 = vor.u32 %v5987_v60, %v5004_v53  ;;  %v6886_v60 = vld [vmem:[#allocation4 + $0x3] ss:$8 sm:$0x3] }
 0x2f1   : > { %v2016_v32 = vpop.f32.mrf.mxu1  ;;  %v2080_v63 = vpop.f32.mrf.mxu0  ;;  %v5114_v53 = vld [vmem:[#allocation6 + $0x610] sm:$0xf] }
 0x2f2   : > { %v5036_v32 = vld [vmem:[#allocation6 + $0x578] sm:$0xf0]  ;;  %2782 = vmatpush.bf16.msrb.mxu1 %v5003_v2  ;;  %v5982_v2 = vld [vmem:[#allocation6 + $0x504] sm:$0xf0] }
 0x2f6   : > { %2783 = vmatpush.bf16.msrb.mxu1 %v4995_v23  ;;  %v5290_v23 = vld [vmem:[#allocation6 + $0x770] sm:$0xf] }
 0x2f7   : > { %v2038_v3 = vpop.f32.mrf.mxu2  ;;  %v2058_v5 = vpop.f32.mrf.mxu3 }
 0x2f8   : > { %v5039_v5 = vor.u32 %v5995_v17, %v5036_v32  ;;  %v4978_v17 = vld [vmem:[#allocation6 + $0x500] sm:$0xf]  ;;  %v5985_v32 = vld [vmem:[#allocation6 + $0x524] sm:$0xf] }
 0x2f9   : > { %v2017_v7 = vpop.f32.mrf.mxu1  ;;  %v2082_v8 = vpop.f32.mrf.mxu0 }
 0x2fa   : > { %v5993_v7 = vld [vmem:[#allocation6 + $0x564] sm:$0xf]  ;;  %v5067_v8 = vor.u32 %v6004_v18, %v5066_v6  ;;  %2892 = vmatpush.bf16.msra.mxu0 %v5039_v5  ;;  %v5130_v5 = vld [vmem:[#allocation6 + $0x630] sm:$0xf]  ;;  %v6020_v6 = vld [vmem:[#allocation6 + $0x634] sm:$0xf0] }
 0x2fb   : > { %v5031_v0 = vor.u32 %v5993_v7, %v5028_v37  ;;  %v5131_v7 = vor.u32 %v6020_v6, %v5130_v5  ;;  %v4988_v37 = vld [vmem:[#allocation6 + $0x518] sm:$0xf0]  ;;  %v6055_v6 = vld [vmem:[#allocation6 + $0x754] sm:$0xf] }
 0x2fc   : > { %2801 = vmatpush.bf16.msrb.mxu2 %v5067_v8  ;;  %v5983_v8 = vld [vmem:[#allocation6 + $0x514] sm:$0xf] }
 0x2fe   : > { %2893 = vmatpush.bf16.msra.mxu0 %v5031_v0  ;;  %v4991_v0 = vor.u32 %v5983_v8, %v4988_v37 }
 0x2ff   : > { %v2039_v13 = vpop.f32.mrf.mxu2  ;;  %v2060_v14 = vpop.f32.mrf.mxu3 }
 0x300   : > { %v5146_v13 = vld [vmem:[#allocation6 + $0x650] sm:$0xf]  ;;  %v6024_v14 = vld [vmem:[#allocation6 + $0x654] sm:$0xf0] }
 0x301   : > { %v2019_v51 = vpop.f32.mrf.mxu1  ;;  %v2083_v40 = vpop.f32.mrf.mxu0  ;;  %v5147_v15 = vor.u32 %v6024_v14, %v5146_v13 }
 0x302   : > { %v6002_v51 = vld [vmem:[#allocation6 + $0x5a4] sm:$0xf0]  ;;  %v5991_v40 = vld [vmem:[#allocation6 + $0x554] sm:$0xf] }
 0x303   : > { %2818 = vmatpush.bf16.msrb.mxu3 %v5147_v15  ;;  %v5059_v50 = vor.u32 %v6002_v51, %v5058_v16  ;;  %v5981_v51 = vld [vmem:[#allocation6 + $0x504] sm:$0xf] }
 0x305   : > { %2802 = vmatpush.bf16.msrb.mxu2 %v5059_v50  ;;  %v5226_v50 = vld [vmem:[#allocation6 + $0x6f0] sm:$0xf] }
 0x307   : > { %v2041_v25 = vpop.f32.mrf.mxu2  ;;  %v2061_v12 = vpop.f32.mrf.mxu3  ;;  %2819 = vmatpush.bf16.msrb.mxu3 %v5139_v57  ;;  %v6042_v57 = vld [vmem:[#allocation6 + $0x6e4] sm:$0xf0] }
 0x309   : > { %v6875_v55 = vpop.f32.mrf.mxu1  ;;  %v2085_v35 = vpop.f32.mrf.mxu0  ;;  %2803 = vmatpush.bf16.msrb.mxu2 %v5051_v26  ;;  %v5291_v26 = vor.u32 %v6060_v28, %v5290_v23  ;;  %v5194_v28 = vld [vmem:[#allocation6 + $0x6b0] sm:$0xf] }
 0x30a   : > { %v5020_v35 = vld [vmem:[#allocation6 + $0x558] sm:$0xf0] }
 0x30b   : > { %v5023_v19 = vor.u32 %v5991_v40, %v5020_v35  ;;  %2820 = vmatpush.bf16.msrb.mxu3 %v5131_v7  ;;  %v4980_v40 = vld [vmem:[#allocation6 + $0x508] sm:$0xf0]  ;;  %v6044_v35 = vld [vmem:[#allocation6 + $0x6f4] sm:$0xf0]  ;;  %v1429_v7 = vperm.slane %v6886_v60, 0 }
 0x30c   : > { %v4983_v42 = vor.u32 %v5981_v51, %v4980_v40  ;;  %v6014_v51 = vld [vmem:[#allocation6 + $0x604] sm:$0xf0]  ;;  %v5266_v40 = vld [vmem:[#allocation6 + $0x740] sm:$0xf] }
 0x30d   : > { %2894 = vmatpush.bf16.msra.mxu0 %v5023_v19  ;;  %v1933_v23 = vadd.f32 %v6867_v1, %v1429_v7 }
 0x30f   : > { %v6877_v39 = vpop.f32.mrf.mxu2  ;;  %v2063_v34 = vpop.f32.mrf.mxu3 }
 0x310   : > { %v5012_v34 = vld [vmem:[#allocation6 + $0x548] sm:$0xf0] }
 0x311   : > { %v6879_v62 = vpop.f32.mrf.mxu0  ;;  %v2098_v61 = vpop.f32.mrf.mxu1  ;;  %v5015_v49 = vor.u32 %v5989_v38, %v5012_v34  ;;  %v5292_v38 = vld [vmem:[#allocation6 + $0x778] sm:$0xf0] }
 0x312   : > { %v4986_v61 = vld [vmem:[#allocation6 + $0x510] sm:$0xf]  ;;  %v5295_v34 = vor.u32 %v6059_v52, %v5292_v38  ;;  %v6036_v52 = vld [vmem:[#allocation6 + $0x6b4] sm:$0xf0] }
 0x313   : > { %2895 = vmatpush.bf16.msra.mxu0 %v5015_v49  ;;  %v4987_v59 = vor.u32 %v5984_v31, %v4986_v61  ;;  %v5218_v49 = vld [vmem:[#allocation6 + $0x6e0] sm:$0xf]  ;;  %v5258_v38 = vld [vmem:[#allocation6 + $0x730] sm:$0xf] }
 0x314   : > { %v5282_v61 = vld [vmem:[#allocation6 + $0x760] sm:$0xf]  ;;  %v5219_v31 = vor.u32 %v6042_v57, %v5218_v49  ;;  %v6076_v49 = vld [vmem:[#allocation6 + $0x7f4] sm:$0xf0] }
 0x315   : > { %2784 = vmatpush.bf16.msrb.mxu1 %v4987_v59 }
 0x317   : > { %v6881_v58 = vpop.f32.mrf.mxu3  ;;  %v2120_v36 = vpop.f32.mrf.mxu2  ;;  %2896 = vmatpush.bf16.msra.mxu0 %v5007_v54  ;;  %v5210_v54 = vld [vmem:[#allocation6 + $0x6d0] sm:$0xf] }
 0x318   : > { %v5043_v36 = vor.u32 %v5998_v46, %v5042_v44  ;;  %v6058_v44 = vld [vmem:[#allocation6 + $0x764] sm:$0xf0] }
 0x319   : > { %v2099_v63 = vpop.f32.mrf.mxu1  ;;  %v2164_v3 = vpop.f32.mrf.mxu0  ;;  %v5283_v59 = vor.u32 %v6058_v44, %v5282_v61  ;;  %v5260_v44 = vld [vmem:[#allocation6 + $0x738] sm:$0xf0] }
 0x31a   : > { %2804 = vmatpush.bf16.msrb.mxu2 %v5043_v36  ;;  %v4979_v63 = vor.u32 %v5982_v2, %v4978_v17  ;;  %v4996_v3 = vld [vmem:[#allocation6 + $0x528] sm:$0xf0]  ;;  %v6016_v36 = vld [vmem:[#allocation6 + $0x614] sm:$0xf0] }
 0x31b   : > { %v4999_v18 = vor.u32 %v5985_v32, %v4996_v3  ;;  %v5115_v17 = vor.u32 %v6016_v36, %v5114_v53  ;;  %v6040_v2 = vld [vmem:[#allocation6 + $0x6d4] sm:$0xf0]  ;;  %v5274_v32 = vld [vmem:[#allocation6 + $0x750] sm:$0xf]  ;;  %v6050_v53 = vld [vmem:[#allocation6 + $0x724] sm:$0xf0] }
 0x31c   : > { %2785 = vmatpush.bf16.msrb.mxu1 %v4979_v63  ;;  %v6056_v63 = vld [vmem:[#allocation6 + $0x754] sm:$0xf0]  ;;  %v5211_v3 = vor.u32 %v6040_v2, %v5210_v54  ;;  %v5346_v54 = vld [vmem:[#allocation6 + $0x7e0] sm:$0xf]  ;;  %v5252_v2 = vld [vmem:[#allocation6 + $0x728] sm:$0xf0] }
 0x31d   : > { %2805 = vmatmul.bf16.vlgmr.msrb.gmra.mxu2 %v6723_v22  ;;  %2897 = vmatpush.bf16.msra.mxu0 %v4999_v18  ;;  %v5275_v5 = vor.u32 %v6056_v63, %v5274_v32  ;;  %v5276_v18 = vld [vmem:[#allocation6 + $0x758] sm:$0xf0]  ;;  %v5178_v32 = vld [vmem:[#allocation6 + $0x690] sm:$0xf]  ;;  %v6032_v63 = vld [vmem:[#allocation6 + $0x694] sm:$0xf0] }
 0x31e   : > { %2854 = vmatpush.bf16.msra.mxu2 %v5291_v26  ;;  %v1955_v26 = vadd.f32 %v6869_v9, %v1933_v23  ;;  %v5236_v23 = vld [vmem:[#allocation6 + $0x708] sm:$0xf0] }
 0x31f   : > { %v2121_v25 = vpop.f32.mrf.mxu2  ;;  %v2142_v12 = vpop.f32.mrf.mxu3  ;;  %2786 = vmatmul.bf16.vlgmr.msrb.gmra.mxu1 %v6659_v33 }
 0x320   : > { %v5122_v25 = vld [vmem:[#allocation6 + $0x620] sm:$0xf]  ;;  %v6018_v12 = vld [vmem:[#allocation6 + $0x624] sm:$0xf0] }
 0x321   : > { %v2101_v24 = vpop.f32.mrf.mxu1  ;;  %v2165_v48 = vpop.f32.mrf.mxu0  ;;  %2898 = vmatpush.bf16.msra.mxu0 %v4991_v0  ;;  %v5123_v21 = vor.u32 %v6018_v12, %v5122_v25  ;;  %v6038_v0 = vld [vmem:[#allocation6 + $0x6c4] sm:$0xf0] }
 0x322   : > { %v5227_v48 = vor.u32 %v6044_v35, %v5226_v50  ;;  %2855 = vmatpush.bf16.msra.mxu2 %v5283_v59  ;;  %v6054_v25 = vld [vmem:[#allocation6 + $0x744] sm:$0xf0]  ;;  %v5268_v50 = vld [vmem:[#allocation6 + $0x748] sm:$0xf0] }
 0x323   : > { %2821 = vmatpush.bf16.msrb.mxu3 %v5123_v21  ;;  %v6053_v21 = vld [vmem:[#allocation6 + $0x744] sm:$0xf] }
 0x324   : > { %2835 = vmatpush.bf16.msra.mxu1 %v5227_v48  ;;  %v5271_v35 = vor.u32 %v6053_v21, %v5268_v50  ;;  %v5330_v21 = vld [vmem:[#allocation6 + $0x7c0] sm:$0xf] }
 0x325   : > { %2899 = vmatpush.bf16.msra.mxu0 %v4983_v42  ;;  %v5267_v42 = vor.u32 %v6054_v25, %v5266_v40  ;;  %v6030_v40 = vld [vmem:[#allocation6 + $0x684] sm:$0xf0]  ;;  %v5234_v25 = vld [vmem:[#allocation6 + $0x700] sm:$0xf] }
 0x326   : > { %2856 = vmatpush.bf16.msra.mxu2 %v5275_v5  ;;  %v5242_v5 = vld [vmem:[#allocation6 + $0x710] sm:$0xf] }
 0x327   : > { %v2123_v4 = vpop.f32.mrf.mxu2  ;;  %v2143_v45 = vpop.f32.mrf.mxu3  ;;  %2822 = vmatpush.bf16.msrb.mxu3 %v5115_v17 }
 0x328   : > { %2900 = vmatmul.bf16.vlgmr.msra.gmra.mxu0 %v6659_v33  ;;  %v6057_v4 = vld [vmem:[#allocation6 + $0x764] sm:$0xf]  ;;  %v5284_v45 = vld [vmem:[#allocation6 + $0x768] sm:$0xf0]  ;;  %2836 = vmatpush.bf16.msra.mxu1 %v5219_v31  ;;  %v6051_v31 = vld [vmem:[#allocation6 + $0x734] sm:$0xf] }
 0x329   : > { %v2102_v41 = vpop.f32.mrf.mxu1  ;;  %v2167_v47 = vpop.f32.mrf.mxu0  ;;  %2968 = vmatpush.bf16.msrb.mxu0 %v5295_v34  ;;  %v5287_v46 = vor.u32 %v6057_v4, %v5284_v45  ;;  %v5195_v34 = vor.u32 %v6036_v52, %v5194_v28  ;;  %v5186_v4 = vld [vmem:[#allocation6 + $0x6a0] sm:$0xf]  ;;  %v1977_v45 = vadd.f32 %v6873_v27, %v1955_v26  ;;  %v5263_v59 = vor.u32 %v6051_v31, %v5260_v44  ;;  %v6048_v27 = vld [vmem:[#allocation6 + $0x714] sm:$0xf0] }
 0x32a   : > { %2857 = vmatpush.bf16.msra.mxu2 %v5267_v42  ;;  %v603_v28 = vld [vmem:[#allocation4 + $0x4] ss:$8 sm:$0x3] }
 0x32c   : > { %2837 = vmatpush.bf16.msra.mxu1 %v5211_v3 }
 0x32d   : > { %2969 = vmatpush.bf16.msrb.mxu0 %v5287_v46  ;;  %v6034_v46 = vld [vmem:[#allocation6 + $0x6a4] sm:$0xf0] }
 0x32e   : > { %v5187_v9 = vor.u32 %v6034_v46, %v5186_v4  ;;  %v6068_v4 = vld [vmem:[#allocation6 + $0x7b4] sm:$0xf0] }
 0x32f   : > { %v2124_v13 = vpop.f32.mrf.mxu2  ;;  %v2145_v14 = vpop.f32.mrf.mxu3 }
 0x330   : > { %v5279_v13 = vor.u32 %v6055_v6, %v5276_v18  ;;  %v5202_v14 = vld [vmem:[#allocation6 + $0x6c0] sm:$0xf]  ;;  %v5338_v6 = vld [vmem:[#allocation6 + $0x7d0] sm:$0xf]  ;;  %v1999_v18 = vadd.f32 %v6871_v30, %v1977_v45  ;;  %v6046_v30 = vld [vmem:[#allocation6 + $0x704] sm:$0xf0] }
 0x331   : > { %v2104_v15 = vpop.f32.mrf.mxu1  ;;  %v2168_v16 = vpop.f32.mrf.mxu0  ;;  %v6027_v45 = vld [vmem:[#allocation6 + $0x674] sm:$0xf] }
 0x332   : > { %v5106_v15 = vld [vmem:[#allocation6 + $0x600] sm:$0xf]  ;;  %2970 = vmatpush.bf16.msrb.mxu0 %v5279_v13  ;;  %v5203_v16 = vor.u32 %v6038_v0, %v5202_v14  ;;  %v6047_v13 = vld [vmem:[#allocation6 + $0x714] sm:$0xf]  ;;  %v5244_v14 = vld [vmem:[#allocation6 + $0x718] sm:$0xf0] }
 0x333   : > { %v5107_v12 = vor.u32 %v6014_v51, %v5106_v15  ;;  %v5243_v15 = vor.u32 %v6048_v27, %v5242_v5  ;;  %v5170_v51 = vld [vmem:[#allocation6 + $0x680] sm:$0xf]  ;;  %v5247_v42 = vor.u32 %v6047_v13, %v5244_v14  ;;  %v6007_v27 = vld [vmem:[#allocation6 + $0x5d4] sm:$0xf]  ;;  %v6064_v13 = vld [vmem:[#allocation6 + $0x794] sm:$0xf0] }
 0x334   : > { %2838 = vmatpush.bf16.msra.mxu1 %v5203_v16  ;;  %v6023_v14 = vld [vmem:[#allocation6 + $0x654] sm:$0xf] }
 0x335   : > { %2823 = vmatpush.bf16.msrb.mxu3 %v5107_v12  ;;  %v2021_v12 = vadd.f32 %v6875_v55, %v1999_v18  ;;  %v5306_v18 = vld [vmem:[#allocation6 + $0x790] sm:$0xf] }
 0x336   : > { %2971 = vmatpush.bf16.msrb.mxu0 %v5271_v35  ;;  %v6045_v35 = vld [vmem:[#allocation6 + $0x704] sm:$0xf] }
 0x337   : > { %v2126_v19 = vpop.f32.mrf.mxu2  ;;  %v2146_v24 = vpop.f32.mrf.mxu3 }
 0x338   : > { %v1430_v19 = vperm.slane %v6886_v60, 1  ;;  %2839 = vmatpush.bf16.msra.mxu1 %v5195_v34  ;;  %v5250_v60 = vld [vmem:[#allocation6 + $0x720] sm:$0xf]  ;;  %v5239_v34 = vor.u32 %v6045_v35, %v5236_v23 }
 0x339   : > { %v2105_v20 = vpop.f32.mrf.mxu1  ;;  %v2170_v11 = vpop.f32.mrf.mxu0  ;;  %v5251_v36 = vor.u32 %v6050_v53, %v5250_v60 }
 0x33a   : > { %v6052_v20 = vld [vmem:[#allocation6 + $0x734] sm:$0xf0]  ;;  %v5354_v11 = vld [vmem:[#allocation6 + $0x7f0] sm:$0xf]  ;;  %2972 = vmatpush.bf16.msrb.mxu0 %v5263_v59  ;;  %v2065_v7 = vadd.f32 %v6881_v58, %v1430_v19  ;;  %v6070_v58 = vld [vmem:[#allocation6 + $0x7c4] sm:$0xf0]  ;;  %v2043_v19 = vadd.f32 %v6877_v39, %v2021_v12 }
 0x33b   : > { %v5259_v61 = vor.u32 %v6052_v20, %v5258_v38  ;;  %v5355_v1 = vor.u32 %v6076_v49, %v5354_v11  ;;  %v5235_v38 = vor.u32 %v6046_v30, %v5234_v25  ;;  %v5331_v55 = vor.u32 %v6070_v58, %v5330_v21  ;;  %v6011_v39 = vld [vmem:[#allocation6 + $0x5f4] sm:$0xf]  ;;  %v5164_v59 = vld [vmem:[#allocation6 + $0x678] sm:$0xf0]  ;;  %v5076_v25 = vld [vmem:[#allocation6 + $0x5c8] sm:$0xf0] }
 0x33c   : > { %2840 = vmatpush.bf16.msra.mxu1 %v5187_v9  ;;  %v605_v20 = vperm.slane %v603_v28, 0  ;;  %v606_v11 = vperm.slane %v603_v28, 1  ;;  %v2177_v49 = vmax.f32 %v2043_v19, 0.0  ;;  %v5167_v53 = vor.u32 %v6027_v45, %v5164_v59  ;;  %v6009_v9 = vld [vmem:[#allocation6 + $0x5e4] sm:$0xf] }
 0x33d   : > { %2858 = vmatpush.bf16.msra.mxu2 %v5259_v61  ;;  %2873 = vmatpush.bf16.msra.mxu3 %v5355_v1  ;;  %v5322_v1 = vld [vmem:[#allocation6 + $0x7b0] sm:$0xf]  ;;  %v5298_v12 = vld [vmem:[#allocation6 + $0x780] sm:$0xf]  ;;  %v5140_v58 = vld [vmem:[#allocation6 + $0x648] sm:$0xf0] }
 0x33e   : > { %v5323_v60 = vor.u32 %v6068_v4, %v5322_v1  ;;  %v5060_v1 = vld [vmem:[#allocation6 + $0x5a8] sm:$0xf0]  ;;  %v6041_v45 = vld [vmem:[#allocation6 + $0x6e4] sm:$0xf] }
 0x33f   : > { %v2127_v41 = vpop.f32.mrf.mxu2  ;;  %v2148_v47 = vpop.f32.mrf.mxu3  ;;  %v5124_v4 = vld [vmem:[#allocation6 + $0x628] sm:$0xf0] }
 0x340   : > { %v6074_v41 = vld [vmem:[#allocation6 + $0x7e4] sm:$0xf0]  ;;  %v6049_v47 = vld [vmem:[#allocation6 + $0x724] sm:$0xf]  ;;  %v5220_v59 = vld [vmem:[#allocation6 + $0x6e8] sm:$0xf0] }
 0x341   : > { %v2107_v8 = vpop.f32.mrf.mxu1  ;;  %v2171_v37 = vpop.f32.mrf.mxu0  ;;  %v5347_v17 = vor.u32 %v6074_v41, %v5346_v54  ;;  %v5255_v3 = vor.u32 %v6049_v47, %v5252_v2  ;;  %2859 = vmatpush.bf16.msra.mxu2 %v5251_v36  ;;  %v5092_v36 = vld [vmem:[#allocation6 + $0x5e8] sm:$0xf0]  ;;  %v5314_v54 = vld [vmem:[#allocation6 + $0x7a0] sm:$0xf]  ;;  %v709_v41 = vadd.f32 %v6735_v43, %v605_v20  ;;  %v6066_v2 = vld [vmem:[#allocation6 + $0x7a4] sm:$0xf0] }
 0x342   : > { %v5179_v8 = vor.u32 %v6032_v63, %v5178_v32  ;;  %v6072_v37 = vld [vmem:[#allocation6 + $0x7d4] sm:$0xf0]  ;;  %v6025_v32 = vld [vmem:[#allocation6 + $0x664] sm:$0xf]  ;;  %v5156_v63 = vld [vmem:[#allocation6 + $0x668] sm:$0xf0] }
 0x343   : > { %2874 = vmatpush.bf16.msra.mxu3 %v5347_v17  ;;  %v5339_v16 = vor.u32 %v6072_v37, %v5338_v6  ;;  %2973 = vmatpush.bf16.msrb.mxu0 %v5255_v3  ;;  %v5095_v17 = vor.u32 %v6009_v9, %v5092_v36  ;;  %v5315_v3 = vor.u32 %v6066_v2, %v5314_v54  ;;  %v5084_v6 = vld [vmem:[#allocation6 + $0x5d8] sm:$0xf0]  ;;  %v6015_v36 = vld [vmem:[#allocation6 + $0x614] sm:$0xf] }
 0x344   : > { %2841 = vmatpush.bf16.msra.mxu1 %v5179_v8  ;;  %v5159_v5 = vor.u32 %v6025_v32, %v5156_v63  ;;  %v2179_v8 = vadd.f32 %v2177_v49, %v709_v41  ;;  %v5148_v43 = vld [vmem:[#allocation6 + $0x658] sm:$0xf0]  ;;  %v6043_v49 = vld [vmem:[#allocation6 + $0x6f4] sm:$0xf]  ;;  %v5997_v63 = vld [vmem:[#allocation6 + $0x584] sm:$0xf] }
 0x345   : > { %2860 = vmatpush.bf16.msra.mxu2 %v5243_v15  ;;  %v5087_v15 = vor.u32 %v6007_v27, %v5084_v6  ;;  %v5052_v9 = vld [vmem:[#allocation6 + $0x598] sm:$0xf0]  ;;  %v6039_v41 = vld [vmem:[#allocation6 + $0x6d4] sm:$0xf]  ;;  %v5108_v27 = vld [vmem:[#allocation6 + $0x608] sm:$0xf0] }
 0x346   : > { %v6900_v30 = vmax.f32 %v2179_v8, 0.0  ;;  %v5116_v54 = vld [vmem:[#allocation6 + $0x618] sm:$0xf0]  ;;  %v6037_v6 = vld [vmem:[#allocation6 + $0x6c4] sm:$0xf] }
 0x347   : > { %v2129_v24 = vpop.f32.mrf.mxu2  ;;  %v2149_v48 = vpop.f32.mrf.mxu3  ;;  %2875 = vmatpush.bf16.msra.mxu3 %v5339_v16  ;;  %2974 = vmatpush.bf16.msrb.mxu0 %v5247_v42  ;;  %v6005_v16 = vld [vmem:[#allocation6 + $0x5c4] sm:$0xf]  ;;  %v6062_v42 = vld [vmem:[#allocation6 + $0x784] sm:$0xf0]  ;;  %v5119_v2 = vor.u32 %v6015_v36, %v5116_v54 }
 0x348   : > { %v2087_v24 = vadd.f32 %v6879_v62, %v2065_v7  ;;  %v5171_v48 = vor.u32 %v6030_v40, %v5170_v51  ;;  %v5100_v62 = vld [vmem:[#allocation6 + $0x5f8] sm:$0xf0]  ;;  %v731_v7 = vadd.f32 %v6737_v56, %v606_v11  ;;  %v5307_v51 = vor.u32 %v6064_v13, %v5306_v18  ;;  %v6021_v56 = vld [vmem:[#allocation6 + $0x644] sm:$0xf]  ;;  %v5204_v18 = vld [vmem:[#allocation6 + $0x6c8] sm:$0xf0] }
 0x349   : > { %v2173_v57 = vpop.f32.mrf.mxu0  ;;  %v2108_v50 = vpop.f32.mrf.mxu1  ;;  %2861 = vmatpush.bf16.msra.mxu2 %v5235_v38  ;;  %v5103_v44 = vor.u32 %v6011_v39, %v5100_v62  ;;  %v5151_v40 = vor.u32 %v6023_v14, %v5148_v43  ;;  %v5079_v35 = vor.u32 %v6005_v16, %v5076_v25  ;;  %v5299_v23 = vor.u32 %v6062_v42, %v5298_v12  ;;  %v5132_v11 = vld [vmem:[#allocation6 + $0x638] sm:$0xf0]  ;;  %v6001_v62 = vld [vmem:[#allocation6 + $0x5a4] sm:$0xf]  ;;  %v6075_v14 = vld [vmem:[#allocation6 + $0x7f4] sm:$0xf] }
 0x34a   : > { %v2109_v26 = vadd.f32 %v2108_v50, %v2087_v24  ;;  %2842 = vmatpush.bf16.msra.mxu1 %v5171_v48  ;;  %v5143_v19 = vor.u32 %v6021_v56, %v5140_v58  ;;  %v5356_v43 = vld [vmem:[#allocation6 + $0x7f8] sm:$0xf0]  ;;  %v5348_v25 = vld [vmem:[#allocation6 + $0x7e8] sm:$0xf0]  ;;  %v6033_v12 = vld [vmem:[#allocation6 + $0x6a4] sm:$0xf] }
 0x34b   : > { %2876 = vmatpush.bf16.msra.mxu3 %v5331_v55  ;;  %2975 = vmatpush.bf16.msrb.mxu0 %v5239_v34  ;;  %v6003_v55 = vld [vmem:[#allocation6 + $0x5b4] sm:$0xf]  ;;  %v5196_v16 = vld [vmem:[#allocation6 + $0x6b8] sm:$0xf0]  ;;  %v5188_v56 = vld [vmem:[#allocation6 + $0x6a8] sm:$0xf0] }
 0x34c   : > { %v6019_v34 = vld [vmem:[#allocation6 + $0x634] sm:$0xf]  ;;  %v5191_v58 = vor.u32 %v6033_v12, %v5188_v56  ;;  %v6086_v12 = vld [vmem:[#allocation6 + $0x844] sm:$0xf0] }
 0x34d   : > { %2930 = vmatpush.bf16.msrb.mxu2 %v5167_v53  ;;  %v5999_v53 = vld [vmem:[#allocation6 + $0x594] sm:$0xf] }
 0x34e   : > { %2911 = vmatpush.bf16.msrb.mxu1 %v5103_v44  ;;  %v5063_v44 = vor.u32 %v6001_v62, %v5060_v1  ;;  %v6065_v62 = vld [vmem:[#allocation6 + $0x7a4] sm:$0xf]  ;;  %v5316_v1 = vld [vmem:[#allocation6 + $0x7a8] sm:$0xf0] }
 0x34f   : > { %v2151_v0 = vpop.f32.mrf.mxu3  ;;  %v2130_v52 = vpop.f32.mrf.mxu2  ;;  %2877 = vmatpush.bf16.msra.mxu3 %v5323_v60  ;;  %v5223_v60 = vor.u32 %v6041_v45, %v5220_v59  ;;  %v6061_v59 = vld [vmem:[#allocation6 + $0x784] sm:$0xf] }
 0x350   : > { %v2131_v57 = vadd.f32 %v2130_v52, %v2109_v26  ;;  %v5068_v26 = vld [vmem:[#allocation6 + $0x5b8] sm:$0xf0] }
 0x351   : > { %v2174_v46 = vpop.f32.mrf.mxu0  ;;  %2931 = vmatpush.bf16.msrb.mxu2 %v5159_v5  ;;  %v5071_v20 = vor.u32 %v6003_v55, %v5068_v26  ;;  %v6013_v5 = vld [vmem:[#allocation6 + $0x604] sm:$0xf]  ;;  %v5332_v26 = vld [vmem:[#allocation6 + $0x7c8] sm:$0xf0] }
 0x352   : > { %2912 = vmatpush.bf16.msrb.mxu1 %v5095_v17  ;;  %v5055_v17 = vor.u32 %v5999_v53, %v5052_v9  ;;  %v5111_v8 = vor.u32 %v6013_v5, %v5108_v27  ;;  %v6069_v55 = vld [vmem:[#allocation6 + $0x7c4] sm:$0xf]  ;;  %v5410_v27 = vld [vmem:[#allocation6 + $0x860] sm:$0xf] }
 0x353   : > { %2878 = vmatpush.bf16.msra.mxu3 %v5315_v3  ;;  %v5044_v3 = vld [vmem:[#allocation6 + $0x588] sm:$0xf0] }
 0x355   : > { %2932 = vmatpush.bf16.msrb.mxu2 %v5151_v40  ;;  %v6073_v40 = vld [vmem:[#allocation6 + $0x7e4] sm:$0xf] }
 0x356   : > { %2913 = vmatpush.bf16.msrb.mxu1 %v5087_v15  ;;  %v5359_v15 = vor.u32 %v6075_v14, %v5356_v43  ;;  %v5351_v42 = vor.u32 %v6073_v40, %v5348_v25  ;;  %v5402_v43 = vld [vmem:[#allocation6 + $0x850] sm:$0xf]  ;;  %v5394_v25 = vld [vmem:[#allocation6 + $0x840] sm:$0xf] }
 0x357   : > { %v2152_v61 = vpop.f32.mrf.mxu3  ;;  %2879 = vmatpush.bf16.msra.mxu3 %v5307_v51 }
 0x358   : > { %v2153_v31 = vadd.f32 %v2152_v61, %v2131_v57  ;;  %v5228_v57 = vld [vmem:[#allocation6 + $0x6f8] sm:$0xf0]  ;;  %v5135_v61 = vor.u32 %v6019_v34, %v5132_v11  ;;  %v6029_v34 = vld [vmem:[#allocation6 + $0x684] sm:$0xf]  ;;  %v5335_v11 = vor.u32 %v6069_v55, %v5332_v26  ;;  %v5546_v55 = vld [vmem:[#allocation6 + $0x970] sm:$0xf] }
 0x359   : > { %2933 = vmatpush.bf16.msrb.mxu2 %v5143_v19  ;;  %v5231_v39 = vor.u32 %v6043_v49, %v5228_v57  ;;  %v5180_v19 = vld [vmem:[#allocation6 + $0x698] sm:$0xf0]  ;;  %v6067_v57 = vld [vmem:[#allocation6 + $0x7b4] sm:$0xf] }
 0x35a   : > { %v2175_v47 = vadd.f32 %v2174_v46, %v2153_v31  ;;  %2914 = vmatpush.bf16.msrb.mxu1 %v5079_v35  ;;  %v6017_v31 = vld [vmem:[#allocation6 + $0x624] sm:$0xf]  ;;  %v5340_v35 = vld [vmem:[#allocation6 + $0x7d8] sm:$0xf0] }
 0x35b   : > { %2880 = vmatpush.bf16.msra.mxu3 %v5299_v23  ;;  %v5127_v46 = vor.u32 %v6017_v31, %v5124_v4  ;;  %v6031_v23 = vld [vmem:[#allocation6 + $0x694] sm:$0xf]  ;;  %v5319_v31 = vor.u32 %v6065_v62, %v5316_v1  ;;  %v5308_v4 = vld [vmem:[#allocation6 + $0x798] sm:$0xf0]  ;;  %v5378_v1 = vld [vmem:[#allocation6 + $0x820] sm:$0xf] }
 0x35c   : > { %v2178_v37 = vmax.f32 %v2175_v47, 0.0  ;;  %v5212_v47 = vld [vmem:[#allocation6 + $0x6d8] sm:$0xf0] }
 0x35d   : > { %2934 = vmatpush.bf16.msrb.mxu2 %v5135_v61  ;;  %v5215_v32 = vor.u32 %v6039_v41, %v5212_v47  ;;  %v5324_v61 = vld [vmem:[#allocation6 + $0x7b8] sm:$0xf0] }
 0x35e   : > { %v2180_v0 = vadd.f32 %v2178_v37, %v731_v7  ;;  %2915 = vmatpush.bf16.msrb.mxu1 %v5071_v20  ;;  %v5047_v7 = vor.u32 %v5997_v63, %v5044_v3  ;;  %v5207_v37 = vor.u32 %v6037_v6, %v5204_v18  ;;  %v5172_v20 = vld [vmem:[#allocation6 + $0x688] sm:$0xf0]  ;;  %v6108_v63 = vld [vmem:[#allocation6 + $0x8f4] sm:$0xf0]  ;;  %v6090_v6 = vld [vmem:[#allocation6 + $0x864] sm:$0xf0] }
 0x35f   : > { %v5175_v49 = vor.u32 %v6029_v34, %v5172_v20  ;;  %v6124_v34 = vld [vmem:[#allocation6 + $0x974] sm:$0xf0]  ;;  %v5610_v20 = vld [vmem:[#allocation6 + $0x9f0] sm:$0xf] }
 0x360   : > { %v6902_v21 = vmax.f32 %v2180_v0, 0.0  ;;  %v6035_v0 = vld [vmem:[#allocation6 + $0x6b4] sm:$0xf] }
 0x361   : > { %2935 = vmatpush.bf16.msrb.mxu2 %v5127_v46  ;;  %v5199_v51 = vor.u32 %v6035_v0, %v5196_v16  ;;  %v5300_v46 = vld [vmem:[#allocation6 + $0x788] sm:$0xf0]  ;;  %v6088_v0 = vld [vmem:[#allocation6 + $0x854] sm:$0xf0]  ;;  %v5466_v16 = vld [vmem:[#allocation6 + $0x8d0] sm:$0xf] }
 0x362   : > { %v2183_v50 = vpack.c.bf16 %v6902_v21, %v6900_v30  ;;  %2916 = vmatpush.bf16.msrb.mxu1 %v5063_v44  ;;  %v6063_v44 = vld [vmem:[#allocation6 + $0x794] sm:$0xf] }
 0x363   : > { %v5311_v45 = vor.u32 %v6063_v44, %v5308_v4  ;;  %v5538_v44 = vld [vmem:[#allocation6 + $0x960] sm:$0xf] }
 0x364   : > { %v2185_v24 = vunpack.c.l.b16 %v2183_v50  ;;  %v2186_v48 = vunpack.c.h.b16 %v2183_v50  ;;  %v6071_v50 = vld [vmem:[#allocation6 + $0x7d4] sm:$0xf] }
 0x365   : > { %2936 = vmatpush.bf16.msrb.mxu2 %v5119_v2  ;;  %v6092_v2 = vld [vmem:[#allocation6 + $0x874] sm:$0xf0] }
 0x366   : > { %v6906_v28 = vpack.c.b16 %v2185_v24, %v2185_v24  ;;  %v6908_v52 = vpack.c.b16 %v2186_v48, %v2186_v48  ;;  %v6911_v38 = vpack.c.b16 %v2185_v24, %v6655_v29  ;;  %2917 = vmatpush.bf16.msrb.mxu1 %v5055_v17  ;;  %v6918_v13 = vpack.c.b16 %v2186_v48, %v6719_v10  ;;  %v5418_v17 = vld [vmem:[#allocation6 + $0x870] sm:$0xf] }
 0x367   : > { %v5343_v24 = vor.u32 %v6071_v50, %v5340_v35  ;;  %v5183_v48 = vor.u32 %v6031_v23, %v5180_v19  ;;  %v5458_v35 = vld [vmem:[#allocation6 + $0x8c0] sm:$0xf]  ;;  %v6102_v23 = vld [vmem:[#allocation6 + $0x8c4] sm:$0xf0] }
 0x368   : > { %2791 = vmatmul.bf16.gmra.mxu1 %v6906_v28  ;;  %2810 = vmatmul.bf16.gmra.mxu2 %v6908_v52  ;;  %v5459_v19 = vor.u32 %v6102_v23, %v5458_v35  ;;  %v6078_v35 = vld [vmem:[#allocation6 + $0x804] sm:$0xf0]  ;;  %v5522_v23 = vld [vmem:[#allocation6 + $0x940] sm:$0xf] }
 0x369   : > { %2824 = vmatmul.bf16.vlgmr.msrb.gmra.mxu3 %v6911_v38  ;;  %2905 = vmatmul.bf16.gmra.mxu0 %v6906_v28 }
 0x36a   : > { %2949 = vmatpush.bf16.msrb.mxu3 %v5231_v39  ;;  %2918 = vmatpush.bf16.msrb.mxu1 %v5047_v7  ;;  %v5327_v39 = vor.u32 %v6067_v57, %v5324_v61  ;;  %v5411_v7 = vor.u32 %v6090_v6, %v5410_v27  ;;  %v5450_v61 = vld [vmem:[#allocation6 + $0x8b0] sm:$0xf] }
 0x36b   : > { %2937 = vmatpush.bf16.msrb.mxu2 %v5111_v8 }
 0x36e   : > { %2950 = vmatpush.bf16.msrb.mxu3 %v5223_v60  ;;  %v5303_v60 = vor.u32 %v6061_v59, %v5300_v46  ;;  %v6122_v59 = vld [vmem:[#allocation6 + $0x964] sm:$0xf0]  ;;  %v5602_v46 = vld [vmem:[#allocation6 + $0x9e0] sm:$0xf] }
 0x372   : > { %2951 = vmatpush.bf16.msrb.mxu3 %v5215_v32  ;;  %v5419_v32 = vor.u32 %v6092_v2, %v5418_v17 }
 0x376   : > { %2952 = vmatpush.bf16.msrb.mxu3 %v5207_v37  ;;  %v5474_v37 = vld [vmem:[#allocation6 + $0x8e0] sm:$0xf] }
 0x378   : > { %2843 = vmatmul.bf16.vlgmr.msra.gmra.mxu1 %v6918_v13  ;;  %2862 = vmatmul.bf16.vlgmr.msra.gmra.mxu2 %v6906_v28 }
 0x379   : > { %2829 = vmatmul.bf16.gmra.mxu3 %v6906_v28  ;;  %2976 = vmatmul.bf16.vlgmr.msrb.gmra.mxu0 %v6906_v28 }
 0x37a   : > { %2987 = vmatpush.bf16.msra.mxu1 %v5359_v15  ;;  %2953 = vmatpush.bf16.msrb.mxu3 %v5199_v51  ;;  %v5403_v15 = vor.u32 %v6088_v0, %v5402_v43  ;;  %v6104_v51 = vld [vmem:[#allocation6 + $0x8d4] sm:$0xf0]  ;;  %v5594_v0 = vld [vmem:[#allocation6 + $0x9d0] sm:$0xf] }
 0x37b   : > { %3629 = vmatpush.bf16.msra.mxu2 %v5419_v32  ;;  %v5467_v40 = vor.u32 %v6104_v51, %v5466_v16  ;;  %v5539_v32 = vor.u32 %v6122_v59, %v5538_v44  ;;  %v6120_v43 = vld [vmem:[#allocation6 + $0x954] sm:$0xf0] }
 0x37e   : > { %2988 = vmatpush.bf16.msra.mxu1 %v5351_v42  ;;  %2954 = vmatpush.bf16.msrb.mxu3 %v5191_v58  ;;  %v5395_v58 = vor.u32 %v6086_v12, %v5394_v25  ;;  %v6096_v25 = vld [vmem:[#allocation6 + $0x894] sm:$0xf0] }
 0x37f   : > { %3630 = vmatpush.bf16.msra.mxu2 %v5411_v7  ;;  %v5370_v7 = vld [vmem:[#allocation6 + $0x810] sm:$0xf] }
 0x382   : > { %2989 = vmatpush.bf16.msra.mxu1 %v5343_v24  ;;  %2955 = vmatpush.bf16.msrb.mxu3 %v5183_v48  ;;  %v5386_v24 = vld [vmem:[#allocation6 + $0x830] sm:$0xf]  ;;  %v6084_v48 = vld [vmem:[#allocation6 + $0x834] sm:$0xf0] }
 0x383   : > { %3631 = vmatpush.bf16.msra.mxu2 %v5403_v15  ;;  %v5387_v26 = vor.u32 %v6084_v48, %v5386_v24  ;;  %v6136_v15 = vld [vmem:[#allocation6 + $0x9d4] sm:$0xf0]  ;;  %v6118_v48 = vld [vmem:[#allocation6 + $0x944] sm:$0xf0] }
 0x384   : > { %v5595_v51 = vor.u32 %v6136_v15, %v5594_v0  ;;  %v5498_v0 = vld [vmem:[#allocation6 + $0x910] sm:$0xf]  ;;  %v6112_v15 = vld [vmem:[#allocation6 + $0x914] sm:$0xf0] }
 0x386   : > { %2990 = vmatpush.bf16.msra.mxu1 %v5335_v11  ;;  %2956 = vmatpush.bf16.msrb.mxu3 %v5175_v49  ;;  %v6140_v11 = vld [vmem:[#allocation6 + $0x9f4] sm:$0xf0]  ;;  %v5547_v49 = vor.u32 %v6124_v34, %v5546_v55  ;;  %v5586_v55 = vld [vmem:[#allocation6 + $0x9c0] sm:$0xf] }
 0x387   : > { %3632 = vmatpush.bf16.msra.mxu2 %v5395_v58  ;;  %v5611_v57 = vor.u32 %v6140_v11, %v5610_v20  ;;  %v5362_v58 = vld [vmem:[#allocation6 + $0x800] sm:$0xf]  ;;  %v5523_v20 = vor.u32 %v6118_v48, %v5522_v23 }
 0x388   : > { %2848 = vmatmul.bf16.gmra.mxu1 %v6908_v52  ;;  %2867 = vmatmul.bf16.gmra.mxu2 %v6906_v28  ;;  %v5363_v24 = vor.u32 %v6078_v35, %v5362_v58  ;;  %v6172_v58 = vld [vmem:[#allocation6 + $0xaf4] sm:$0xf0]  ;;  %v5666_v48 = vld [vmem:[#allocation6 + $0xa60] sm:$0xf] }
 0x389   : > { %2881 = vmatmul.bf16.vlgmr.msra.gmra.mxu3 %v6908_v52  ;;  %2981 = vmatmul.bf16.gmra.mxu0 %v6906_v28 }
 0x38a   : > { %2991 = vmatpush.bf16.msra.mxu1 %v5327_v39  ;;  %v6100_v39 = vld [vmem:[#allocation6 + $0x8b4] sm:$0xf0]  ;;  %3667 = vmatpush.bf16.msra.mxu0 %v5547_v49  ;;  %v5426_v49 = vld [vmem:[#allocation6 + $0x880] sm:$0xf] }
 0x38b   : > { %3633 = vmatpush.bf16.msra.mxu2 %v5387_v26  ;;  %v5451_v62 = vor.u32 %v6100_v39, %v5450_v61  ;;  %v6134_v26 = vld [vmem:[#allocation6 + $0x9c4] sm:$0xf0]  ;;  %v5514_v39 = vld [vmem:[#allocation6 + $0x930] sm:$0xf] }
 0x38c   : > { %v5587_v11 = vor.u32 %v6134_v26, %v5586_v55  ;;  %v6154_v55 = vld [vmem:[#allocation6 + $0xa64] sm:$0xf0]  ;;  %v5490_v26 = vld [vmem:[#allocation6 + $0x900] sm:$0xf] }
 0x38e   : > { %2992 = vmatpush.bf16.msra.mxu1 %v5319_v31  ;;  %v6082_v31 = vld [vmem:[#allocation6 + $0x824] sm:$0xf0]  ;;  %3668 = vmatpush.bf16.msra.mxu0 %v5539_v32 }
 0x38f   : > { %v6114_v32 = vld [vmem:[#allocation6 + $0x924] sm:$0xf0] }
 0x392   : > { %2993 = vmatpush.bf16.msra.mxu1 %v5311_v45  ;;  %v5379_v45 = vor.u32 %v6082_v31, %v5378_v1  ;;  %v5578_v1 = vld [vmem:[#allocation6 + $0x9b0] sm:$0xf] }
 0x394   : > { %3634 = vmatpush.bf16.msra.mxu2 %v5379_v45  ;;  %v6132_v45 = vld [vmem:[#allocation6 + $0x9b4] sm:$0xf0] }
 0x396   : > { %2994 = vmatpush.bf16.msra.mxu1 %v5303_v60  ;;  %v6138_v60 = vld [vmem:[#allocation6 + $0x9e4] sm:$0xf0] }
 0x398   : > { %2919 = vmatmul.bf16.vlgmr.msrb.gmra.mxu1 %v6723_v22  ;;  %2938 = vmatmul.bf16.vlgmr.msrb.gmra.mxu2 %v6911_v38 }
 0x399   : > { %2886 = vmatmul.bf16.gmra.mxu3 %v6908_v52 }
 0x39a   : > { %3686 = vmatpush.bf16.msrb.mxu1 %v5611_v57  ;;  %v6094_v57 = vld [vmem:[#allocation6 + $0x884] sm:$0xf0] }
 0x39b   : > { %v5427_v61 = vor.u32 %v6094_v57, %v5426_v49  ;;  %v6110_v49 = vld [vmem:[#allocation6 + $0x904] sm:$0xf0]  ;;  %v5554_v57 = vld [vmem:[#allocation6 + $0x980] sm:$0xf] }
 0x39c   : > { %v6937_v53 = vpop.f32.mrf.mxu1 }
 0x3a0   : > { %v6939_v9 = vpop.f32.mrf.mxu2 }
 0x3a4   : > { %v6941_v36 = vpop.f32.mrf.mxu1 }
 0x3a5   : > { %v6967_v17 = vpop.f32.mrf.mxu0 }
 0x3a8   : > { %2924 = vmatmul.bf16.gmra.mxu1 %v6908_v52  ;;  %2943 = vmatmul.bf16.gmra.mxu2 %v6906_v28  ;;  %v6943_v38 = vpop.f32.mrf.mxu2 }
 0x3a9   : > { %2957 = vmatmul.bf16.vlgmr.msrb.gmra.mxu3 %v6918_v13  ;;  %v6106_v13 = vld [vmem:[#allocation6 + $0x8e4] sm:$0xf0] }
 0x3aa   : > { %v5475_v14 = vor.u32 %v6106_v13, %v5474_v37  ;;  %v6080_v37 = vld [vmem:[#allocation6 + $0x814] sm:$0xf0]  ;;  %v5530_v13 = vld [vmem:[#allocation6 + $0x950] sm:$0xf] }
 0x3ab   : > { %v5531_v16 = vor.u32 %v6120_v43, %v5530_v13  ;;  %v5674_v13 = vld [vmem:[#allocation6 + $0xa70] sm:$0xf] }
 0x3ad   : > { %3669 = vmatpush.bf16.msra.mxu0 %v5531_v16  ;;  %v6977_v31 = vpop.f32.mrf.mxu0  ;;  %v5562_v16 = vld [vmem:[#allocation6 + $0x990] sm:$0xf] }
 0x3b1   : > { %3670 = vmatpush.bf16.msra.mxu0 %v5523_v20 }
 0x3b8   : > { %2995 = vmatmul.bf16.vlgmr.msra.gmra.mxu1 %v6908_v52 }
 0x3b9   : > { %2962 = vmatmul.bf16.gmra.mxu3 %v6908_v52 }
 0x3c8   : > { %3000 = vmatmul.bf16.gmra.mxu1 %v6908_v52  ;;  %v5482_v52 = vld [vmem:[#allocation6 + $0x8f0] sm:$0xf] }
 0x3c9   : > { %v5483_v3 = vor.u32 %v6108_v63, %v5482_v52  ;;  %v5603_v52 = vor.u32 %v6138_v60, %v5602_v46  ;;  %v5442_v63 = vld [vmem:[#allocation6 + $0x8a0] sm:$0xf]  ;;  %v5579_v46 = vor.u32 %v6132_v45, %v5578_v1  ;;  %v6170_v45 = vld [vmem:[#allocation6 + $0xae4] sm:$0xf0] }
 0x3ca   : > { %v5506_v60 = vld [vmem:[#allocation6 + $0x920] sm:$0xf] }
 0x3cb   : > { %3648 = vmatpush.bf16.msra.mxu3 %v5483_v3  ;;  %v6098_v3 = vld [vmem:[#allocation6 + $0x8a4] sm:$0xf0]  ;;  %3687 = vmatpush.bf16.msrb.mxu1 %v5603_v52  ;;  %v5570_v52 = vld [vmem:[#allocation6 + $0x9a0] sm:$0xf] }
 0x3cc   : > { %v5443_v6 = vor.u32 %v6098_v3, %v5442_v63  ;;  %v5507_v3 = vor.u32 %v6114_v32, %v5506_v60  ;;  %v5658_v32 = vld [vmem:[#allocation6 + $0xa50] sm:$0xf] }
 0x3cf   : > { %3649 = vmatpush.bf16.msra.mxu3 %v5475_v14  ;;  %v5371_v14 = vor.u32 %v6080_v37, %v5370_v7  ;;  %3688 = vmatpush.bf16.msrb.mxu1 %v5595_v51 }
 0x3d1   : > { %3635 = vmatpush.bf16.msra.mxu2 %v5371_v14  ;;  %v6156_v14 = vld [vmem:[#allocation6 + $0xa74] sm:$0xf0] }
 0x3d2   : > { %v5675_v43 = vor.u32 %v6156_v14, %v5674_v13  ;;  %v6091_v13 = vld [vmem:[#allocation6 + $0x874] sm:$0xf] }
 0x3d3   : > { %3650 = vmatpush.bf16.msra.mxu3 %v5467_v40  ;;  %v5434_v40 = vld [vmem:[#allocation6 + $0x890] sm:$0xf]  ;;  %3689 = vmatpush.bf16.msrb.mxu1 %v5587_v11  ;;  %v5667_v11 = vor.u32 %v6154_v55, %v5666_v48 }
 0x3d4   : > { %v5435_v12 = vor.u32 %v6096_v25, %v5434_v40  ;;  %v5499_v40 = vor.u32 %v6112_v15, %v5498_v0  ;;  %v6128_v25 = vld [vmem:[#allocation6 + $0x994] sm:$0xf0]  ;;  %v6107_v0 = vld [vmem:[#allocation6 + $0x8f4] sm:$0xf]  ;;  %v5484_v15 = vld [vmem:[#allocation6 + $0x8f8] sm:$0xf0] }
 0x3d5   : > { %3636 = vmatpush.bf16.msra.mxu2 %v5363_v24  ;;  %v5563_v23 = vor.u32 %v6128_v25, %v5562_v16  ;;  %v5487_v25 = vor.u32 %v6107_v0, %v5484_v15  ;;  %v6087_v0 = vld [vmem:[#allocation6 + $0x854] sm:$0xf] }
 0x3d7   : > { %3651 = vmatpush.bf16.msra.mxu3 %v5459_v19  ;;  %3690 = vmatpush.bf16.msrb.mxu1 %v5579_v46  ;;  %v2292_v46 = vld [vmem:[#allocation4 + $0x5] ss:$8 sm:$0x3] }
 0x3d8   : > { %3637 = vmatmul.bf16.vlgmr.msra.gmra.mxu2 %v6659_v33  ;;  %v6995_v16 = vperm.slane %v2292_v46, 0 }
 0x3d9   : > { %3705 = vmatpush.bf16.msrb.mxu2 %v5675_v43  ;;  %v5420_v43 = vld [vmem:[#allocation6 + $0x878] sm:$0xf0] }
 0x3db   : > { %3652 = vmatpush.bf16.msra.mxu3 %v5451_v62  ;;  %v6116_v62 = vld [vmem:[#allocation6 + $0x934] sm:$0xf0] }
 0x3dc   : > { %v5515_v44 = vor.u32 %v6116_v62, %v5514_v39  ;;  %v5491_v62 = vor.u32 %v6110_v49, %v5490_v26  ;;  %v6089_v49 = vld [vmem:[#allocation6 + $0x864] sm:$0xf] }
 0x3dd   : > { %3706 = vmatpush.bf16.msrb.mxu2 %v5667_v11  ;;  %v6166_v11 = vld [vmem:[#allocation6 + $0xac4] sm:$0xf0] }
 0x3de   : > { %3671 = vmatpush.bf16.msra.mxu0 %v5515_v44  ;;  %v5730_v44 = vld [vmem:[#allocation6 + $0xae0] sm:$0xf] }
 0x3df   : > { %3653 = vmatpush.bf16.msra.mxu3 %v5443_v6  ;;  %v6130_v6 = vld [vmem:[#allocation6 + $0x9a4] sm:$0xf0]  ;;  %v5731_v60 = vor.u32 %v6170_v45, %v5730_v44  ;;  %v6105_v44 = vld [vmem:[#allocation6 + $0x8e4] sm:$0xf]  ;;  %v5476_v45 = vld [vmem:[#allocation6 + $0x8e8] sm:$0xf0] }
 0x3e0   : > { %v5571_v37 = vor.u32 %v6130_v6, %v5570_v52  ;;  %v6152_v52 = vld [vmem:[#allocation6 + $0xa54] sm:$0xf0]  ;;  %v5722_v6 = vld [vmem:[#allocation6 + $0xad0] sm:$0xf] }
 0x3e2   : > { %3672 = vmatpush.bf16.msra.mxu0 %v5507_v3  ;;  %3691 = vmatpush.bf16.msrb.mxu1 %v5571_v37  ;;  %v5659_v3 = vor.u32 %v6152_v52, %v5658_v32  ;;  %v6168_v37 = vld [vmem:[#allocation6 + $0xad4] sm:$0xf0]  ;;  %v5479_v32 = vor.u32 %v6105_v44, %v5476_v45  ;;  %v2788_v52 = vadd.f32 %v6937_v53, %v6995_v16  ;;  %v5396_v44 = vld [vmem:[#allocation6 + $0x848] sm:$0xf0] }
 0x3e3   : > { %3654 = vmatpush.bf16.msra.mxu3 %v5435_v12  ;;  %v5738_v12 = vld [vmem:[#allocation6 + $0xaf0] sm:$0xf]  ;;  %v5723_v14 = vor.u32 %v6168_v37, %v5722_v6  ;;  %v6148_v6 = vld [vmem:[#allocation6 + $0xa34] sm:$0xf0] }
 0x3e4   : > { %v5739_v24 = vor.u32 %v6172_v58, %v5738_v12  ;;  %3707 = vmatpush.bf16.msrb.mxu2 %v5659_v3  ;;  %v5650_v58 = vld [vmem:[#allocation6 + $0xa40] sm:$0xf]  ;;  %v5642_v3 = vld [vmem:[#allocation6 + $0xa30] sm:$0xf]  ;;  %v2807_v53 = vadd.f32 %v6939_v9, %v2788_v52  ;;  %v6101_v52 = vld [vmem:[#allocation6 + $0x8c4] sm:$0xf] }
 0x3e5   : > { %v6945_v54 = vpop.f32.mrf.mxu1 }
 0x3e6   : > { %v6987_v51 = vpop.f32.mrf.mxu0  ;;  %3673 = vmatpush.bf16.msra.mxu0 %v5499_v40  ;;  %3692 = vmatpush.bf16.msrb.mxu1 %v5563_v23  ;;  %v5423_v40 = vor.u32 %v6091_v13, %v5420_v43  ;;  %v6150_v23 = vld [vmem:[#allocation6 + $0xa44] sm:$0xf0]  ;;  %v5643_v13 = vor.u32 %v6148_v6, %v5642_v3  ;;  %v6164_v43 = vld [vmem:[#allocation6 + $0xab4] sm:$0xf0] }
 0x3e7   : > { %3655 = vmatpush.bf16.msra.mxu3 %v5427_v61  ;;  %v6126_v61 = vld [vmem:[#allocation6 + $0x984] sm:$0xf0]  ;;  %v5651_v26 = vor.u32 %v6150_v23, %v5650_v58 }
 0x3e8   : > { %v5555_v1 = vor.u32 %v6126_v61, %v5554_v57  ;;  %v5412_v57 = vld [vmem:[#allocation6 + $0x868] sm:$0xf0] }
 0x3e9   : > { %3708 = vmatpush.bf16.msrb.mxu2 %v5651_v26  ;;  %v6146_v26 = vld [vmem:[#allocation6 + $0xa24] sm:$0xf0] }
 0x3ea   : > { %3656 = vmatmul.bf16.vlgmr.msra.gmra.mxu3 %v6723_v22  ;;  %3674 = vmatpush.bf16.msra.mxu0 %v5491_v62 }
 0x3eb   : > { %v6947_v41 = vpop.f32.mrf.mxu2  ;;  %3724 = vmatpush.bf16.msrb.mxu3 %v5739_v24  ;;  %3693 = vmatpush.bf16.msrb.mxu1 %v5555_v1  ;;  %v5714_v24 = vld [vmem:[#allocation6 + $0xac0] sm:$0xf]  ;;  %v5415_v1 = vor.u32 %v6089_v49, %v5412_v57 }
 0x3ec   : > { %v6949_v28 = vpop.f32.mrf.mxu3  ;;  %v5715_v62 = vor.u32 %v6166_v11, %v5714_v24  ;;  %v5634_v24 = vld [vmem:[#allocation6 + $0xa20] sm:$0xf] }
 0x3ed   : > { %v6951_v47 = vpop.f32.mrf.mxu1  ;;  %3709 = vmatpush.bf16.msrb.mxu2 %v5643_v13  ;;  %v5698_v11 = vld [vmem:[#allocation6 + $0xaa0] sm:$0xf]  ;;  %v5635_v57 = vor.u32 %v6146_v26, %v5634_v24  ;;  %v2826_v45 = vadd.f32 %v6949_v28, %v2807_v53  ;;  %v5460_v13 = vld [vmem:[#allocation6 + $0x8c8] sm:$0xf0]  ;;  %v5690_v28 = vld [vmem:[#allocation6 + $0xa90] sm:$0xf] }
 0x3ee   : > { %v6997_v12 = vpop.f32.mrf.mxu0  ;;  %3743 = vmatpush.bf16.msrb.mxu0 %v5423_v40  ;;  %v6103_v40 = vld [vmem:[#allocation6 + $0x8d4] sm:$0xf]  ;;  %v5388_v53 = vld [vmem:[#allocation6 + $0x838] sm:$0xf0] }
 0x3ef   : > { %3725 = vmatpush.bf16.msrb.mxu3 %v5731_v60  ;;  %3762 = vmatpush.bf16.msra.mxu1 %v5487_v25  ;;  %v7003_v60 = vperm.slane %v2292_v46, 1  ;;  %v5404_v46 = vld [vmem:[#allocation6 + $0x858] sm:$0xf0] }
 0x3f0   : > { %v5468_v25 = vld [vmem:[#allocation6 + $0x8d8] sm:$0xf0]  ;;  %v5407_v58 = vor.u32 %v6087_v0, %v5404_v46  ;;  %v6144_v46 = vld [vmem:[#allocation6 + $0xa14] sm:$0xf0] }
 0x3f1   : > { %v2902_v37 = vadd.f32 %v6967_v17, %v7003_v60  ;;  %v5471_v23 = vor.u32 %v6103_v40, %v5468_v25  ;;  %3710 = vmatpush.bf16.msrb.mxu2 %v5635_v57 }
 0x3f2   : > { %3744 = vmatpush.bf16.msrb.mxu0 %v5415_v1  ;;  %v6085_v1 = vld [vmem:[#allocation6 + $0x844] sm:$0xf] }
 0x3f3   : > { %v6953_v5 = vpop.f32.mrf.mxu2  ;;  %3726 = vmatpush.bf16.msrb.mxu3 %v5723_v14  ;;  %v5706_v14 = vld [vmem:[#allocation6 + $0xab0] sm:$0xf]  ;;  %3763 = vmatpush.bf16.msra.mxu1 %v5479_v32  ;;  %v5399_v9 = vor.u32 %v6085_v1, %v5396_v44  ;;  %v6142_v1 = vld [vmem:[#allocation6 + $0xa04] sm:$0xf0]  ;;  %v5682_v44 = vld [vmem:[#allocation6 + $0xa80] sm:$0xf] }
 0x3f4   : > { %v6955_v18 = vpop.f32.mrf.mxu3  ;;  %v5707_v15 = vor.u32 %v6164_v43, %v5706_v14 }
 0x3f5   : > { %v6957_v8 = vpop.f32.mrf.mxu1 }
 0x3f6   : > { %3745 = vmatpush.bf16.msrb.mxu0 %v5407_v58  ;;  %v2977_v32 = vpop.f32.mrf.mxu0  ;;  %v2845_v0 = vadd.f32 %v6957_v8, %v2826_v45  ;;  %v6160_v58 = vld [vmem:[#allocation6 + $0xa94] sm:$0xf0] }
 0x3f7   : > { %3727 = vmatpush.bf16.msrb.mxu3 %v5715_v62  ;;  %v6162_v62 = vld [vmem:[#allocation6 + $0xaa4] sm:$0xf0]  ;;  %3764 = vmatpush.bf16.msra.mxu1 %v5471_v23  ;;  %v6083_v23 = vld [vmem:[#allocation6 + $0x834] sm:$0xf]  ;;  %v5691_v24 = vor.u32 %v6160_v58, %v5690_v28 }
 0x3f8   : > { %v5699_v6 = vor.u32 %v6162_v62, %v5698_v11  ;;  %v5391_v26 = vor.u32 %v6083_v23, %v5388_v53  ;;  %v6099_v11 = vld [vmem:[#allocation6 + $0x8b4] sm:$0xf]  ;;  %v5618_v62 = vld [vmem:[#allocation6 + $0xa00] sm:$0xf] }
 0x3f9   : > { %v6079_v58 = vld [vmem:[#allocation6 + $0x814] sm:$0xf] }
 0x3fa   : > { %3746 = vmatpush.bf16.msrb.mxu0 %v5399_v9  ;;  %v5619_v9 = vor.u32 %v6142_v1, %v5618_v62 }
 0x3fb   : > { %v6961_v56 = vpop.f32.mrf.mxu2  ;;  %3728 = vmatpush.bf16.msrb.mxu3 %v5707_v15  ;;  %v5626_v15 = vld [vmem:[#allocation6 + $0xa10] sm:$0xf] }
 0x3fc   : > { %v6959_v42 = vpop.f32.mrf.mxu3  ;;  %v5627_v25 = vor.u32 %v6144_v46, %v5626_v15 }
 0x3fd   : > { %v6963_v50 = vpop.f32.mrf.mxu1 }
 0x3fe   : > { %3711 = vmatpush.bf16.msrb.mxu2 %v5627_v25  ;;  %3747 = vmatpush.bf16.msrb.mxu0 %v5391_v26  ;;  %v2979_v28 = vpop.f32.mrf.mxu0  ;;  %v5548_v25 = vld [vmem:[#allocation6 + $0x978] sm:$0xf0] }
 0x3ff   : > { %3729 = vmatpush.bf16.msrb.mxu3 %v5699_v6  ;;  %v5372_v26 = vld [vmem:[#allocation6 + $0x818] sm:$0xf0] }
 0x402   : > { %3712 = vmatpush.bf16.msrb.mxu2 %v5619_v9 }
 0x403   : > { %v6971_v27 = vpop.f32.mrf.mxu2  ;;  %3730 = vmatpush.bf16.msrb.mxu3 %v5691_v24 }
 0x404   : > { %v6965_v4 = vpop.f32.mrf.mxu3 }
 0x405   : > { %v6969_v2 = vpop.f32.mrf.mxu1 }
 0x40b   : > { %v6979_v59 = vpop.f32.mrf.mxu2 }
 0x40c   : > { %v6973_v19 = vpop.f32.mrf.mxu3 }
 0x40d   : > { %v6975_v34 = vpop.f32.mrf.mxu1 }
 0x413   : > { %v6989_v35 = vpop.f32.mrf.mxu2 }
 0x414   : > { %v6982_v63 = vpop.f32.mrf.mxu3 }
 0x415   : > { %v6985_v7 = vpop.f32.mrf.mxu1 }
 0x416   : > { %v2921_v17 = vadd.f32 %v6985_v7, %v2902_v37  ;;  %v5463_v7 = vor.u32 %v6101_v52, %v5460_v13  ;;  %v2790_v37 = vadd.f32 %v6941_v36, %v6995_v16  ;;  %v2904_v36 = vadd.f32 %v6977_v31, %v7003_v60  ;;  %v6158_v52 = vld [vmem:[#allocation6 + $0xa84] sm:$0xf0]  ;;  %v6081_v13 = vld [vmem:[#allocation6 + $0x824] sm:$0xf] }
 0x418   : > { %3765 = vmatpush.bf16.msra.mxu1 %v5463_v7 }
 0x41b   : > { %v2939_v48 = vpop.f32.mrf.mxu2 }
 0x41c   : > { %v6991_v20 = vpop.f32.mrf.mxu3  ;;  %v2940_v14 = vadd.f32 %v2939_v48, %v2921_v17  ;;  %v2864_v48 = vadd.f32 %v6961_v56, %v2845_v0  ;;  %v5452_v17 = vld [vmem:[#allocation6 + $0x8b8] sm:$0xf0]  ;;  %v5444_v0 = vld [vmem:[#allocation6 + $0x8a8] sm:$0xf0] }
 0x41d   : > { %v6993_v39 = vpop.f32.mrf.mxu1  ;;  %v5455_v8 = vor.u32 %v6099_v11, %v5452_v17  ;;  %v6095_v11 = vld [vmem:[#allocation6 + $0x894] sm:$0xf]  ;;  %v2907_v17 = vadd.f32 %v6987_v51, %v7003_v60 }
 0x41e   : > { %v2883_v57 = vadd.f32 %v6973_v19, %v2864_v48  ;;  %v2923_v45 = vadd.f32 %v6993_v39, %v2904_v36  ;;  %v6097_v19 = vld [vmem:[#allocation6 + $0x8a4] sm:$0xf]  ;;  %v5436_v36 = vld [vmem:[#allocation6 + $0x898] sm:$0xf0] }
 0x41f   : > { %3766 = vmatpush.bf16.msra.mxu1 %v5455_v8  ;;  %v5447_v39 = vor.u32 %v6097_v19, %v5444_v0  ;;  %v6139_v8 = vld [vmem:[#allocation6 + $0x9f4] sm:$0xf]  ;;  %v5439_v1 = vor.u32 %v6095_v11, %v5436_v36  ;;  %v6137_v19 = vld [vmem:[#allocation6 + $0x9e4] sm:$0xf]  ;;  %v5604_v0 = vld [vmem:[#allocation6 + $0x9e8] sm:$0xf0] }
 0x420   : > { %v3006_v23 = vmax.f32 %v2883_v57, 0.0  ;;  %v6155_v11 = vld [vmem:[#allocation6 + $0xa74] sm:$0xf] }
 0x423   : > { %v2941_v43 = vpop.f32.mrf.mxu2  ;;  %3767 = vmatpush.bf16.msra.mxu1 %v5447_v39 }
 0x424   : > { %v6999_v55 = vpop.f32.mrf.mxu3  ;;  %v2942_v15 = vadd.f32 %v2941_v43, %v2923_v45  ;;  %v2793_v43 = vadd.f32 %v6945_v54, %v6995_v16  ;;  %v6121_v45 = vld [vmem:[#allocation6 + $0x964] sm:$0xf] }
 0x425   : > { %v7001_v61 = vpop.f32.mrf.mxu1 }
 0x426   : > { %v2812_v54 = vadd.f32 %v6947_v41, %v2793_v43  ;;  %v2926_v9 = vadd.f32 %v7001_v61, %v2907_v17  ;;  %v6171_v43 = vld [vmem:[#allocation6 + $0xaf4] sm:$0xf]  ;;  %v5740_v17 = vld [vmem:[#allocation6 + $0xaf8] sm:$0xf0] }
 0x427   : > { %3768 = vmatpush.bf16.msra.mxu1 %v5439_v1  ;;  %v5524_v1 = vld [vmem:[#allocation6 + $0x948] sm:$0xf0] }
 0x428   : > { %v2831_v41 = vadd.f32 %v6959_v42, %v2812_v54  ;;  %v2795_v42 = vadd.f32 %v6951_v47, %v6995_v16  ;;  %v2982_v16 = vpop.f32.mrf.mxu0  ;;  %v5668_v54 = vld [vmem:[#allocation6 + $0xa68] sm:$0xf0] }
 0x42a   : > { %v2814_v47 = vadd.f32 %v6953_v5, %v2795_v42 }
 0x42b   : > { %v2944_v53 = vpop.f32.mrf.mxu2 }
 0x42c   : > { %v2958_v49 = vpop.f32.mrf.mxu3  ;;  %v2833_v5 = vadd.f32 %v6965_v4, %v2814_v47 }
 0x42d   : > { %v7012_v3 = vpop.f32.mrf.mxu1  ;;  %v2959_v40 = vadd.f32 %v2958_v49, %v2940_v14  ;;  %v2809_v49 = vadd.f32 %v6943_v38, %v2790_v37  ;;  %v5380_v14 = vld [vmem:[#allocation6 + $0x828] sm:$0xf0]  ;;  %v5683_v38 = vor.u32 %v6158_v52, %v5682_v44 }
 0x42e   : > { %v5383_v37 = vor.u32 %v6081_v13, %v5380_v14  ;;  %v5364_v52 = vld [vmem:[#allocation6 + $0x808] sm:$0xf0]  ;;  %v6093_v13 = vld [vmem:[#allocation6 + $0x884] sm:$0xf] }
 0x42f   : > { %v2978_v6 = vadd.f32 %v2977_v32, %v2959_v40  ;;  %v2828_v31 = vadd.f32 %v6955_v18, %v2809_v49  ;;  %v6123_v40 = vld [vmem:[#allocation6 + $0x974] sm:$0xf]  ;;  %3731 = vmatpush.bf16.msrb.mxu3 %v5683_v38  ;;  %v5612_v49 = vld [vmem:[#allocation6 + $0x9f8] sm:$0xf0]  ;;  %v5428_v14 = vld [vmem:[#allocation6 + $0x888] sm:$0xf0] }
 0x430   : > { %3748 = vmatpush.bf16.msrb.mxu0 %v5383_v37  ;;  %v5551_v24 = vor.u32 %v6123_v40, %v5548_v25  ;;  %v5615_v44 = vor.u32 %v6139_v8, %v5612_v49  ;;  %v5431_v39 = vor.u32 %v6093_v13, %v5428_v14  ;;  %v5607_v40 = vor.u32 %v6137_v19, %v5604_v0  ;;  %v6169_v14 = vld [vmem:[#allocation6 + $0xae4] sm:$0xf]  ;;  %v2984_v47 = vpop.f32.mrf.mxu0 }
 0x431   : > { %v2847_v32 = vadd.f32 %v6963_v50, %v2828_v31  ;;  %v5375_v50 = vor.u32 %v6079_v58, %v5372_v26  ;;  %v2909_v25 = vadd.f32 %v6997_v12, %v7003_v60  ;;  %v2850_v58 = vadd.f32 %v6969_v2, %v2831_v41  ;;  %v5596_v26 = vld [vmem:[#allocation6 + $0x9d8] sm:$0xf0] }
 0x432   : > { %3781 = vmatpush.bf16.msra.mxu2 %v5551_v24  ;;  %3769 = vmatpush.bf16.msra.mxu1 %v5431_v39  ;;  %v5676_v60 = vld [vmem:[#allocation6 + $0xa78] sm:$0xf0]  ;;  %v5743_v49 = vor.u32 %v6171_v43, %v5740_v17 }
 0x433   : > { %v2866_v57 = vadd.f32 %v6971_v27, %v2847_v32  ;;  %3800 = vmatpush.bf16.msra.mxu3 %v5615_v44  ;;  %v2869_v12 = vadd.f32 %v6979_v59, %v2850_v58  ;;  %v5679_v8 = vor.u32 %v6155_v11, %v5676_v60  ;;  %v6133_v44 = vld [vmem:[#allocation6 + $0x9c4] sm:$0xf]  ;;  %v2928_v59 = vadd.f32 %v7012_v3, %v2909_v25  ;;  %v5516_v39 = vld [vmem:[#allocation6 + $0x938] sm:$0xf0]  ;;  %v6151_v58 = vld [vmem:[#allocation6 + $0xa54] sm:$0xf] }
 0x434   : > { %v2960_v56 = vpop.f32.mrf.mxu3  ;;  %3749 = vmatpush.bf16.msrb.mxu0 %v5375_v50  ;;  %v2946_v50 = vpop.f32.mrf.mxu2  ;;  %v6129_v11 = vld [vmem:[#allocation6 + $0x9a4] sm:$0xf] }
 0x435   : > { %v2996_v7 = vpop.f32.mrf.mxu1  ;;  %v2961_v48 = vadd.f32 %v2960_v56, %v2942_v15  ;;  %v5540_v56 = vld [vmem:[#allocation6 + $0x968] sm:$0xf0]  ;;  %v2885_v31 = vadd.f32 %v6982_v63, %v2866_v57  ;;  %v2945_v15 = vadd.f32 %v2944_v53, %v2926_v9  ;;  %v5532_v53 = vld [vmem:[#allocation6 + $0x958] sm:$0xf0]  ;;  %v6117_v57 = vld [vmem:[#allocation6 + $0x944] sm:$0xf]  ;;  %v2888_v9 = vadd.f32 %v6991_v20, %v2869_v12 }
 0x436   : > { %v2997_v46 = vadd.f32 %v2996_v7, %v2978_v6  ;;  %v6077_v6 = vld [vmem:[#allocation6 + $0x804] sm:$0xf]  ;;  %v5543_v51 = vor.u32 %v6121_v45, %v5540_v56  ;;  %v5527_v45 = vor.u32 %v6117_v57, %v5524_v1  ;;  %v5588_v56 = vld [vmem:[#allocation6 + $0x9c8] sm:$0xf0] }
 0x437   : > { %v2980_v37 = vadd.f32 %v2979_v28, %v2961_v48  ;;  %v3008_v48 = vmax.f32 %v2885_v31, 0.0  ;;  %3801 = vmatpush.bf16.msra.mxu3 %v5607_v40  ;;  %v5732_v31 = vld [vmem:[#allocation6 + $0xae8] sm:$0xf0]  ;;  %v5591_v19 = vor.u32 %v6133_v44, %v5588_v56  ;;  %v3010_v40 = vmax.f32 %v2888_v9, 0.0  ;;  %v6111_v56 = vld [vmem:[#allocation6 + $0x914] sm:$0xf] }
 0x438   : > { %v3007_v18 = vmax.f32 %v2997_v46, 0.0  ;;  %v5367_v46 = vor.u32 %v6077_v6, %v5364_v52  ;;  %3782 = vmatpush.bf16.msra.mxu2 %v5543_v51  ;;  %v6153_v6 = vld [vmem:[#allocation6 + $0xa64] sm:$0xf]  ;;  %v5735_v0 = vor.u32 %v6169_v14, %v5732_v31  ;;  %v5572_v12 = vld [vmem:[#allocation6 + $0x9a8] sm:$0xf0] }
 0x439   : > { %v5671_v3 = vor.u32 %v6153_v6, %v5668_v54  ;;  %v5575_v1 = vor.u32 %v6129_v11, %v5572_v12  ;;  %v5500_v6 = vld [vmem:[#allocation6 + $0x918] sm:$0xf0]  ;;  %v6127_v54 = vld [vmem:[#allocation6 + $0x994] sm:$0xf]  ;;  %v6141_v11 = vld [vmem:[#allocation6 + $0xa04] sm:$0xf] }
 0x43a   : > { %v7030_v62 = vpack.c.bf16 %v3007_v18, %v3006_v23  ;;  %v6119_v23 = vld [vmem:[#allocation6 + $0x954] sm:$0xf]  ;;  %3750 = vmatpush.bf16.msrb.mxu0 %v5367_v46  ;;  %v5503_v14 = vor.u32 %v6111_v56, %v5500_v6  ;;  %v5564_v31 = vld [vmem:[#allocation6 + $0x998] sm:$0xf0]  ;;  %v5684_v12 = vld [vmem:[#allocation6 + $0xa88] sm:$0xf0] }
 0x43b   : > { %v6115_v46 = vld [vmem:[#allocation6 + $0x934] sm:$0xf]  ;;  %v6173_v56 = vld [vmem:[#allocation7 + $0x40] sm:$0xff] }
 0x43c   : > { %v3020_v27 = vunpack.c.l.b16 %v7030_v62  ;;  %v3021_v7 = vunpack.c.h.b16 %v7030_v62  ;;  %v2963_v38 = vpop.f32.mrf.mxu3  ;;  %v5519_v62 = vor.u32 %v6115_v46, %v5516_v39  ;;  %v5556_v39 = vld [vmem:[#allocation6 + $0x988] sm:$0xf0] }
 0x43d   : > { %v2998_v61 = vpop.f32.mrf.mxu1  ;;  %v2964_v18 = vadd.f32 %v2963_v38, %v2945_v15  ;;  %v2947_v38 = vadd.f32 %v2946_v50, %v2928_v59 }
 0x43e   : > { %v7041_v63 = vpack.c.b16 %v3020_v27, %v6655_v29  ;;  %v7046_v32 = vpack.c.b16 %v3021_v7, %v6719_v10  ;;  %v2999_v28 = vadd.f32 %v2998_v61, %v2980_v37  ;;  %v6135_v29 = vld [vmem:[#allocation6 + $0x9d4] sm:$0xf]  ;;  %v5535_v10 = vor.u32 %v6119_v23, %v5532_v53  ;;  %v5660_v53 = vld [vmem:[#allocation6 + $0xa58] sm:$0xf0] }
 0x43f   : > { %v5599_v2 = vor.u32 %v6135_v29, %v5596_v26  ;;  %v2983_v13 = vadd.f32 %v2982_v16, %v2964_v18  ;;  %v2852_v61 = vadd.f32 %v6975_v34, %v2833_v5  ;;  %v6167_v34 = vld [vmem:[#allocation6 + $0xad4] sm:$0xf]  ;;  %v5724_v29 = vld [vmem:[#allocation6 + $0xad8] sm:$0xf0]  ;;  %v5663_v18 = vor.u32 %v6151_v58, %v5660_v53  ;;  %v5508_v26 = vld [vmem:[#allocation6 + $0x928] sm:$0xf0] }
 0x440   : > { %v3009_v24 = vmax.f32 %v2999_v28, 0.0  ;;  %3675 = vmatmul.bf16.vlgmr.msra.gmra.mxu0 %v7041_v63  ;;  %3694 = vmatmul.bf16.vlgmr.msrb.gmra.mxu1 %v7046_v32  ;;  %v6131_v28 = vld [vmem:[#allocation6 + $0x9b4] sm:$0xf] }
 0x441   : > { %3783 = vmatpush.bf16.msra.mxu2 %v5535_v10  ;;  %3819 = vmatpush.bf16.msra.mxu0 %v5679_v8  ;;  %v6113_v10 = vld [vmem:[#allocation6 + $0x924] sm:$0xf] }
 0x442   : > { %v7057_v36 = vpack.c.bf16 %v3009_v24, %v3008_v48  ;;  %3838 = vmatpush.bf16.msrb.mxu1 %v5743_v49  ;;  %3802 = vmatpush.bf16.msra.mxu3 %v5599_v2  ;;  %v5727_v24 = vor.u32 %v6167_v34, %v5724_v29  ;;  %v5511_v16 = vor.u32 %v6113_v10, %v5508_v26  ;;  %v6149_v2 = vld [vmem:[#allocation6 + $0xa44] sm:$0xf]  ;;  %v5716_v49 = vld [vmem:[#allocation6 + $0xac8] sm:$0xf0]  ;;  %v6143_v29 = vld [vmem:[#allocation6 + $0xa14] sm:$0xf] }
 0x443   : > { %v6165_v8 = vld [vmem:[#allocation6 + $0xac4] sm:$0xf] }
 0x444   : > { %v3022_v51 = vunpack.c.l.b16 %v7057_v36  ;;  %v3023_v52 = vunpack.c.h.b16 %v7057_v36  ;;  %v2965_v37 = vpop.f32.mrf.mxu3  ;;  %v5719_v5 = vor.u32 %v6165_v8, %v5716_v49  ;;  %v5644_v36 = vld [vmem:[#allocation6 + $0xa38] sm:$0xf0]  ;;  %v6175_v49 = vld [vmem:[#allocation7 + $0x50] sm:$0xff] }
 0x445   : > { %v3001_v4 = vpop.f32.mrf.mxu1  ;;  %3784 = vmatpush.bf16.msra.mxu2 %v5527_v45  ;;  %v2966_v42 = vadd.f32 %v2965_v37, %v2947_v38  ;;  %3820 = vmatpush.bf16.msra.mxu0 %v5671_v3  ;;  %v6147_v38 = vld [vmem:[#allocation6 + $0xa34] sm:$0xf]  ;;  %v5708_v37 = vld [vmem:[#allocation6 + $0xab8] sm:$0xf0] }
 0x446   : > { %v7068_v20 = vpack.c.b16 %v3022_v51, %v3020_v27  ;;  %v7074_v41 = vpack.c.b16 %v3023_v52, %v3021_v7  ;;  %v3002_v15 = vadd.f32 %v3001_v4, %v2983_v13  ;;  %v5580_v27 = vld [vmem:[#allocation6 + $0x9b8] sm:$0xf0]  ;;  %v2871_v7 = vadd.f32 %v6989_v35, %v2852_v61  ;;  %3839 = vmatpush.bf16.msrb.mxu1 %v5735_v0  ;;  %v5652_v35 = vld [vmem:[#allocation6 + $0xa48] sm:$0xf0]  ;;  %v6109_v0 = vld [vmem:[#allocation6 + $0x904] sm:$0xf] }
 0x447   : > { %v5583_v23 = vor.u32 %v6131_v28, %v5580_v27  ;;  %3803 = vmatpush.bf16.msra.mxu3 %v5591_v19  ;;  %v2985_v50 = vadd.f32 %v2984_v47, %v2966_v42  ;;  %v5655_v44 = vor.u32 %v6149_v2, %v5652_v35  ;;  %v5647_v19 = vor.u32 %v6147_v38, %v5644_v36  ;;  %v6125_v61 = vld [vmem:[#allocation6 + $0x984] sm:$0xf]  ;;  %v5700_v27 = vld [vmem:[#allocation6 + $0xaa8] sm:$0xf0]  ;;  %v6188_v38 = vld [vmem:[#allocation7 + $0xb8] sm:$0xff] }
 0x448   : > { %v3011_v25 = vmax.f32 %v3002_v15, 0.0  ;;  %3642 = vmatmul.bf16.gmra.mxu2 %v7068_v20  ;;  %3661 = vmatmul.bf16.gmra.mxu3 %v7074_v41  ;;  %v2890_v60 = vadd.f32 %v6999_v55, %v2871_v7  ;;  %v5492_v15 = vld [vmem:[#allocation6 + $0x908] sm:$0xf0]  ;;  %v6145_v28 = vld [vmem:[#allocation6 + $0xa24] sm:$0xf]  ;;  %v5559_v34 = vor.u32 %v6125_v61, %v5556_v39 }
 0x449   : > { %3785 = vmatpush.bf16.msra.mxu2 %v5519_v62  ;;  %3821 = vmatpush.bf16.msra.mxu0 %v5663_v18  ;;  %v5495_v46 = vor.u32 %v6109_v0, %v5492_v15  ;;  %v6161_v62 = vld [vmem:[#allocation6 + $0xaa4] sm:$0xf]  ;;  %v6159_v18 = vld [vmem:[#allocation6 + $0xa94] sm:$0xf]  ;;  %v5620_v47 = vld [vmem:[#allocation6 + $0xa08] sm:$0xf0] }
 0x44a   : > { %v7080_v48 = vpack.c.bf16 %v3011_v25, %v3010_v40  ;;  %3840 = vmatpush.bf16.msrb.mxu1 %v5727_v24  ;;  %v3012_v9 = vmax.f32 %v2890_v60, 0.0  ;;  %v5636_v40 = vld [vmem:[#allocation6 + $0xa28] sm:$0xf0]  ;;  %v5703_v7 = vor.u32 %v6161_v62, %v5700_v27  ;;  %v5692_v24 = vld [vmem:[#allocation6 + $0xa98] sm:$0xf0]  ;;  %v5623_v2 = vor.u32 %v6141_v11, %v5620_v47  ;;  %v6185_v62 = vld [vmem:[#allocation7 + $0xa0] sm:$0xff] }
 0x44b   : > { %3804 = vmatpush.bf16.msra.mxu3 %v5583_v23  ;;  %v5639_v58 = vor.u32 %v6145_v28, %v5636_v40  ;;  %v5695_v26 = vor.u32 %v6159_v18, %v5692_v24  ;;  %v6178_v60 = vld [vmem:[#allocation7 + $0x68] sm:$0xff] }
 0x44c   : > { %v3029_v43 = vunpack.c.l.b16 %v7080_v48  ;;  %v3030_v17 = vunpack.c.h.b16 %v7080_v48  ;;  %v5628_v48 = vld [vmem:[#allocation6 + $0xa18] sm:$0xf0] }
 0x44d   : > { %v3003_v57 = vpop.f32.mrf.mxu1  ;;  %3786 = vmatpush.bf16.msra.mxu2 %v5511_v16  ;;  %3822 = vmatpush.bf16.msra.mxu0 %v5655_v44  ;;  %v5631_v10 = vor.u32 %v6143_v29, %v5628_v48  ;;  %v6157_v16 = vld [vmem:[#allocation6 + $0xa84] sm:$0xf]  ;;  %v6184_v29 = vld [vmem:[#allocation7 + $0x98] sm:$0xff] }
 0x44e   : > { %v3004_v59 = vadd.f32 %v3003_v57, %v2985_v50  ;;  %v7087_v45 = vpack.c.b16 %v3029_v43, %v3022_v51  ;;  %v7091_v55 = vpack.c.b16 %v3030_v17, %v3023_v52  ;;  %3841 = vmatpush.bf16.msrb.mxu1 %v5719_v5  ;;  %v5567_v51 = vor.u32 %v6127_v54, %v5564_v31  ;;  %v6163_v52 = vld [vmem:[#allocation6 + $0xab4] sm:$0xf]  ;;  %v7107_v44 = vld [vmem:[#allocation4 + $0x6] ss:$8 sm:$0x3] }
 0x44f   : > { %3805 = vmatpush.bf16.msra.mxu3 %v5575_v1  ;;  %v5711_v3 = vor.u32 %v6163_v52, %v5708_v37  ;;  %v5687_v35 = vor.u32 %v6157_v16, %v5684_v12  ;;  %v6174_v5 = vld [vmem:[#allocation7 + $0x48] sm:$0xff]  ;;  %v6183_v16 = vld [vmem:[#allocation7 + $0x90] sm:$0xff] }
 0x450   : > { %v3013_v13 = vmax.f32 %v3004_v59, 0.0  ;;  %3680 = vmatmul.bf16.gmra.mxu0 %v7087_v45  ;;  %3699 = vmatmul.bf16.gmra.mxu1 %v7091_v55  ;;  %v3145_v59 = vperm.slane %v7107_v44, 0 }
 0x451   : > { %3787 = vmatpush.bf16.msra.mxu2 %v5503_v14  ;;  %3823 = vmatpush.bf16.msra.mxu0 %v5647_v19 }
 0x452   : > { %v3017_v4 = vpack.c.bf16 %v3013_v13, %v3012_v9  ;;  %3842 = vmatpush.bf16.msrb.mxu1 %v5711_v3 }
 0x453   : > { %3806 = vmatpush.bf16.msra.mxu3 %v5567_v51 }
 0x454   : > { %v3040_v42 = vunpack.c.l.b16 %v3017_v4  ;;  %v3041_v25 = vunpack.c.h.b16 %v3017_v4  ;;  %v6187_v4 = vld [vmem:[#allocation7 + $0xb0] sm:$0xff] }
 0x455   : > { %3788 = vmatpush.bf16.msra.mxu2 %v5495_v46  ;;  %3824 = vmatpush.bf16.msra.mxu0 %v5639_v58  ;;  %v6186_v46 = vld [vmem:[#allocation7 + $0xa8] sm:$0xff] }
 0x456   : > { %v3042_v23 = vpack.c.b16 %v3040_v42, %v3029_v43  ;;  %v3043_v53 = vpack.c.b16 %v3041_v25, %v3030_v17  ;;  %3843 = vmatpush.bf16.msrb.mxu1 %v5703_v7 }
 0x457   : > { %3807 = vmatpush.bf16.msra.mxu3 %v5559_v34 }
 0x458   : > { %3713 = vmatmul.bf16.vlgmr.msrb.gmra.mxu2 %v7068_v20  ;;  %3732 = vmatmul.bf16.vlgmr.msrb.gmra.mxu3 %v7074_v41 }
 0x459   : > { %3825 = vmatpush.bf16.msra.mxu0 %v5631_v10 }
 0x45a   : > { %3844 = vmatpush.bf16.msrb.mxu1 %v5695_v26 }
 0x45b   : > { %v3638_v43 = vpop.f32.mrf.mxu2  ;;  %4033 = vmatpush.bf16.msrb.mxu3 %v6188_v38 }
 0x45c   : > { %v3639_v9 = vadd.f32 %v3638_v43, %v3145_v59 }
 0x45d   : > { %3826 = vmatpush.bf16.msra.mxu0 %v5623_v2 }
 0x45e   : > { %3845 = vmatpush.bf16.msrb.mxu1 %v5687_v35 }
 0x45f   : > { %4034 = vmatpush.bf16.msrb.mxu3 %v6187_v4 }
 0x460   : > { %3751 = vmatmul.bf16.vlgmr.msrb.gmra.mxu0 %v6659_v33  ;;  %3770 = vmatmul.bf16.vlgmr.msra.gmra.mxu1 %v6723_v22  ;;  %v6180_v33 = vld [vmem:[#allocation7 + $0x78] sm:$0xff]  ;;  %v6179_v22 = vld [vmem:[#allocation7 + $0x70] sm:$0xff] }
 0x461   : > { %4014 = vmatpush.bf16.msrb.mxu2 %v6180_v33 }
 0x463   : > { %4035 = vmatpush.bf16.msrb.mxu3 %v6186_v46 }
 0x465   : > { %4015 = vmatpush.bf16.msrb.mxu2 %v6179_v22 }
 0x467   : > { %4036 = vmatpush.bf16.msrb.mxu3 %v6185_v62 }
 0x468   : > { %3718 = vmatmul.bf16.gmra.mxu2 %v3042_v23  ;;  %3737 = vmatmul.bf16.gmra.mxu3 %v3043_v53 }
 0x469   : > { %4016 = vmatpush.bf16.msrb.mxu2 %v6178_v60 }
 0x46b   : > { %4037 = vmatpush.bf16.msrb.mxu3 %v6184_v29 }
 0x46d   : > { %v3657_v17 = vpop.f32.mrf.mxu3 }
 0x46e   : > { %v3658_v13 = vadd.f32 %v3657_v17, %v3639_v9 }
 0x46f   : > { %4038 = vmatpush.bf16.msrb.mxu3 %v6183_v16 }
 0x470   : > { %3756 = vmatmul.bf16.gmra.mxu0 %v7068_v20  ;;  %3775 = vmatmul.bf16.gmra.mxu1 %v7074_v41 }
 0x475   : > { %v3659_v8 = vpop.f32.mrf.mxu3 }
 0x478   : > { %3789 = vmatmul.bf16.vlgmr.msra.gmra.mxu2 %v7041_v63  ;;  %3808 = vmatmul.bf16.vlgmr.msra.gmra.mxu3 %v7046_v32  ;;  %v6177_v63 = vld [vmem:[#allocation7 + $0x60] sm:$0xff] }
 0x479   : > { %4017 = vmatpush.bf16.msrb.mxu2 %v6177_v63  ;;  %v6182_v63 = vld [vmem:[#allocation7 + $0x88] sm:$0xff] }
 0x47a   : > { %4039 = vmatpush.bf16.msrb.mxu3 %v6182_v63 }
 0x480   : > { %3827 = vmatmul.bf16.vlgmr.msra.gmra.mxu0 %v7068_v20  ;;  %3846 = vmatmul.bf16.vlgmr.msrb.gmra.mxu1 %v7074_v41  ;;  %v6176_v20 = vld [vmem:[#allocation7 + $0x58] sm:$0xff]  ;;  %v3640_v41 = vpop.f32.mrf.mxu2 }
 0x481   : > { %4018 = vmatpush.bf16.msrb.mxu2 %v6176_v20  ;;  %v3641_v37 = vadd.f32 %v3640_v41, %v3145_v59 }
 0x483   : > { %v3660_v15 = vadd.f32 %v3659_v8, %v3641_v37 }
 0x485   : > { %4019 = vmatpush.bf16.msrb.mxu2 %v6175_v49  ;;  %v6181_v49 = vld [vmem:[#allocation7 + $0x80] sm:$0xff] }
 0x486   : > { %4040 = vmatpush.bf16.msrb.mxu3 %v6181_v49 }
 0x488   : > { %3794 = vmatmul.bf16.gmra.mxu2 %v7087_v45  ;;  %3813 = vmatmul.bf16.gmra.mxu3 %v7091_v55 }
 0x489   : > { %4020 = vmatpush.bf16.msrb.mxu2 %v6174_v5 }
 0x48d   : > { %4021 = vmatpush.bf16.msrb.mxu2 %v6173_v56 }
 0x490   : > { %3832 = vmatmul.bf16.gmra.mxu0 %v3042_v23  ;;  %3851 = vmatmul.bf16.gmra.mxu1 %v3043_v53 }
 0x4bd   : > { %v3676_v32 = vpop.f32.mrf.mxu0  ;;  %v3695_v50 = vpop.f32.mrf.mxu1 }
 0x4be   : > { %v3677_v52 = vadd.f32 %v3676_v32, %v3658_v13 }
 0x4c0   : > { %v3696_v19 = vadd.f32 %v3695_v50, %v3677_v52 }
 0x4c5   : > { %v3678_v57 = vpop.f32.mrf.mxu0  ;;  %v3697_v1 = vpop.f32.mrf.mxu1 }
 0x4c6   : > { %v3679_v40 = vadd.f32 %v3678_v57, %v3660_v15 }
 0x4c8   : > { %v3698_v27 = vadd.f32 %v3697_v1, %v3679_v40  ;;  %v3146_v1 = vperm.slane %v7107_v44, 1 }
 0x4cb   : > { %v3643_v45 = vpop.f32.mrf.mxu2  ;;  %v3662_v55 = vpop.f32.mrf.mxu3 }
 0x4cc   : > { %v3644_v42 = vadd.f32 %v3643_v45, %v3145_v59 }
 0x4cd   : > { %v3681_v6 = vpop.f32.mrf.mxu0  ;;  %v3700_v54 = vpop.f32.mrf.mxu1 }
 0x4ce   : > { %v3663_v58 = vadd.f32 %v3662_v55, %v3644_v42 }
 0x4d0   : > { %v3682_v24 = vadd.f32 %v3681_v6, %v3663_v58 }
 0x4d2   : > { %v3701_v12 = vadd.f32 %v3700_v54, %v3682_v24 }
 0x4d3   : > { %v3645_v14 = vpop.f32.mrf.mxu2  ;;  %v3664_v31 = vpop.f32.mrf.mxu3 }
 0x4d4   : > { %v3646_v10 = vadd.f32 %v3645_v14, %v3145_v59 }
 0x4d5   : > { %v3683_v51 = vpop.f32.mrf.mxu0  ;;  %v3702_v36 = vpop.f32.mrf.mxu1 }
 0x4d6   : > { %v3665_v2 = vadd.f32 %v3664_v31, %v3646_v10 }
 0x4d8   : > { %v3684_v20 = vadd.f32 %v3683_v51, %v3665_v2 }
 0x4da   : > { %v3703_v57 = vadd.f32 %v3702_v36, %v3684_v20 }
 0x4db   : > { %v3714_v3 = vpop.f32.mrf.mxu2  ;;  %v3733_v0 = vpop.f32.mrf.mxu3 }
 0x4dc   : > { %v3715_v61 = vadd.f32 %v3714_v3, %v3696_v19 }
 0x4dd   : > { %v3752_v39 = vpop.f32.mrf.mxu0  ;;  %v3771_v28 = vpop.f32.mrf.mxu1 }
 0x4de   : > { %v3734_v25 = vadd.f32 %v3733_v0, %v3715_v61  ;;  %v3753_v54 = vadd.f32 %v3752_v39, %v3146_v1 }
 0x4e0   : > { %v3857_v53 = vmax.f32 %v3734_v25, 0.0  ;;  %v3772_v31 = vadd.f32 %v3771_v28, %v3753_v54 }
 0x4e2   : > { %v3865_v11 = vadd.f32 %v3857_v53, %v6900_v30 }
 0x4e3   : > { %v3716_v7 = vpop.f32.mrf.mxu2  ;;  %v3735_v23 = vpop.f32.mrf.mxu3 }
 0x4e4   : > { %v3717_v34 = vadd.f32 %v3716_v7, %v3698_v27  ;;  %v3873_v60 = vmax.f32 %v3865_v11, 0.0 }
 0x4e5   : > { %v3754_v48 = vpop.f32.mrf.mxu0  ;;  %v3773_v18 = vpop.f32.mrf.mxu1 }
 0x4e6   : > { %v3736_v26 = vadd.f32 %v3735_v23, %v3717_v34  ;;  %v3755_v3 = vadd.f32 %v3754_v48, %v3146_v1 }
 0x4e8   : > { %v3859_v47 = vmax.f32 %v3736_v26, 0.0  ;;  %v3774_v46 = vadd.f32 %v3773_v18, %v3755_v3 }
 0x4ea   : > { %v3867_v35 = vadd.f32 %v3859_v47, %v6900_v30 }
 0x4eb   : > { %v3719_v33 = vpop.f32.mrf.mxu2  ;;  %v3738_v22 = vpop.f32.mrf.mxu3 }
 0x4ec   : > { %v3875_v43 = vmax.f32 %v3867_v35, 0.0  ;;  %v3720_v17 = vadd.f32 %v3719_v33, %v3701_v12 }
 0x4ed   : > { %v3757_v32 = vpop.f32.mrf.mxu0  ;;  %v3776_v50 = vpop.f32.mrf.mxu1 }
 0x4ee   : > { %v3881_v41 = vpack.c.bf16 %v3875_v43, %v3873_v60  ;;  %v3739_v8 = vadd.f32 %v3738_v22, %v3720_v17 }
 0x4f0   : > { %4022 = vmatmul.bf16.vlgmr.msrb.gmra.mxu2 %v3881_v41  ;;  %v3861_v45 = vmax.f32 %v3739_v8, 0.0 }
 0x4f2   : > { %v3869_v13 = vadd.f32 %v3861_v45, %v6900_v30 }
 0x4f3   : > { %v3721_v5 = vpop.f32.mrf.mxu2  ;;  %v3740_v59 = vpop.f32.mrf.mxu3 }
 0x4f4   : > { %v3722_v55 = vadd.f32 %v3721_v5, %v3703_v57  ;;  %v3877_v36 = vmax.f32 %v3869_v13, 0.0 }
 0x4f5   : > { %v3759_v56 = vpop.f32.mrf.mxu0  ;;  %v3778_v6 = vpop.f32.mrf.mxu1 }
 0x4f6   : > { %v3741_v9 = vadd.f32 %v3740_v59, %v3722_v55  ;;  %v3760_v18 = vadd.f32 %v3759_v56, %v3146_v1 }
 0x4f8   : > { %v3863_v14 = vmax.f32 %v3741_v9, 0.0  ;;  %v3779_v33 = vadd.f32 %v3778_v6, %v3760_v18  ;;  %v3917_v6 = vld [vmem:[#allocation4 + $0x7] ss:$0 sm:$0xff] }
 0x4fa   : > { %v3871_v38 = vadd.f32 %v3863_v14, %v6900_v30  ;;  %v3758_v30 = vadd.f32 %v3757_v32, %v3146_v1  ;;  %v4056_v14 = vld [vmem:[%s6602_s20] sm:$0xff] }
 0x4fb   : > { %v3790_v51 = vpop.f32.mrf.mxu2  ;;  %v3809_v52 = vpop.f32.mrf.mxu3 }
 0x4fc   : > { %v3879_v37 = vmax.f32 %v3871_v38, 0.0  ;;  %v3791_v44 = vadd.f32 %v3790_v51, %v3772_v31  ;;  %v3777_v23 = vadd.f32 %v3776_v50, %v3758_v30 }
 0x4fd   : > { %v3828_v4 = vpop.f32.mrf.mxu0  ;;  %v3847_v19 = vpop.f32.mrf.mxu1 }
 0x4fe   : > { %v3810_v0 = vadd.f32 %v3809_v52, %v3791_v44  ;;  %v3883_v15 = vpack.c.bf16 %v3879_v37, %v3877_v36  ;;  %v4057_v36 = vld [vmem:[%s6602_s20 + $0x8] sm:$0xff] }
 0x500   : > { %v3829_v61 = vadd.f32 %v3828_v4, %v3810_v0  ;;  %4027 = vmatmul.bf16.gmra.mxu2 %v3883_v15  ;;  %v4058_v15 = vld [vmem:[%s6602_s20 + $0x10] sm:$0xff] }
 0x502   : > { %v3848_v42 = vadd.f32 %v3847_v19, %v3829_v61 }
 0x503   : > { %v3792_v39 = vpop.f32.mrf.mxu2  ;;  %v3811_v40 = vpop.f32.mrf.mxu3 }
 0x504   : > { %v3793_v25 = vadd.f32 %v3792_v39, %v3774_v46  ;;  %v3858_v58 = vmax.f32 %v3848_v42, 0.0 }
 0x505   : > { %v3830_v28 = vpop.f32.mrf.mxu0  ;;  %v3849_v62 = vpop.f32.mrf.mxu1 }
 0x506   : > { %v3812_v27 = vadd.f32 %v3811_v40, %v3793_v25  ;;  %v3866_v48 = vadd.f32 %v3858_v58, %v6902_v21 }
 0x508   : > { %v3831_v7 = vadd.f32 %v3830_v28, %v3812_v27  ;;  %v3874_v12 = vmax.f32 %v3866_v48, 0.0  ;;  %v4059_v28 = vld [vmem:[%s6602_s20 + $0x18] sm:$0xff] }
 0x50a   : > { %v3850_v53 = vadd.f32 %v3849_v62, %v3831_v7 }
 0x50b   : > { %v3795_v34 = vpop.f32.mrf.mxu2  ;;  %v3814_v29 = vpop.f32.mrf.mxu3 }
 0x50c   : > { %v3860_v24 = vmax.f32 %v3850_v53, 0.0  ;;  %v3796_v10 = vadd.f32 %v3795_v34, %v3777_v23 }
 0x50d   : > { %v3833_v26 = vpop.f32.mrf.mxu0  ;;  %v3852_v16 = vpop.f32.mrf.mxu1 }
 0x50e   : > { %v3868_v11 = vadd.f32 %v3860_v24, %v6902_v21  ;;  %v3815_v47 = vadd.f32 %v3814_v29, %v3796_v10 }
 0x510   : > { %v3876_v2 = vmax.f32 %v3868_v11, 0.0  ;;  %v3834_v35 = vadd.f32 %v3833_v26, %v3815_v47 }
 0x512   : > { %v3882_v22 = vpack.c.bf16 %v3876_v2, %v3874_v12  ;;  %v3853_v43 = vadd.f32 %v3852_v16, %v3834_v35 }
 0x513   : > { %v3797_v60 = vpop.f32.mrf.mxu2  ;;  %v3816_v63 = vpop.f32.mrf.mxu3 }
 0x514   : > { %v3798_v17 = vadd.f32 %v3797_v60, %v3779_v33  ;;  %4041 = vmatmul.bf16.vlgmr.msrb.gmra.mxu3 %v3882_v22  ;;  %v3862_v20 = vmax.f32 %v3853_v43, 0.0 }
 0x515   : > { %v3835_v50 = vpop.f32.mrf.mxu0  ;;  %v3854_v8 = vpop.f32.mrf.mxu1 }
 0x516   : > { %v3817_v32 = vadd.f32 %v3816_v63, %v3798_v17  ;;  %v3870_v57 = vadd.f32 %v3862_v20, %v6902_v21 }
 0x518   : > { %v3836_v41 = vadd.f32 %v3835_v50, %v3817_v32  ;;  %v3878_v59 = vmax.f32 %v3870_v57, 0.0 }
 0x51a   : > { %v3855_v49 = vadd.f32 %v3854_v8, %v3836_v41 }
 0x51c   : > { %v3864_v1 = vmax.f32 %v3855_v49, 0.0 }
 0x51e   : > { %v3872_v5 = vadd.f32 %v3864_v1, %v6902_v21 }
 0x520   : > { %v3880_v45 = vmax.f32 %v3872_v5, 0.0 }
 0x522   : > { %v3884_v55 = vpack.c.bf16 %v3880_v45, %v3878_v59 }
 0x524   : > { %4046 = vmatmul.bf16.gmra.mxu3 %v3884_v55 }
 0x573   : > { %v4023_v56 = vpop.f32.mrf.mxu2 }
 0x574   : > { %v4024_v54 = vadd.f32 %v4023_v56, %v3917_v6 }
 0x57b   : > { %v4025_v9 = vpop.f32.mrf.mxu2 }
 0x57c   : > { %v4026_v51 = vadd.f32 %v4025_v9, %v3917_v6 }
 0x583   : > { %v4028_v44 = vpop.f32.mrf.mxu2 }
 0x584   : > { %v4029_v3 = vadd.f32 %v4028_v44, %v3917_v6 }
 0x58b   : > { %v4030_v39 = vpop.f32.mrf.mxu2 }
 0x58c   : > { %v4031_v42 = vadd.f32 %v4030_v39, %v3917_v6 }
 0x597   : > { %v4042_v13 = vpop.f32.mrf.mxu3 }
 0x598   : > { %v4043_v31 = vadd.f32 %v4042_v13, %v4024_v54 }
 0x59a   : > { %4052 = vst [vmem:[%s349_s29] sm:$0xff] %v4043_v31  ;;  %v4060_v21 = vsub.f32 %v4043_v31, %v4056_v14 }
 0x59c   : > { %v4064_v38 = vmul.f32 %v4060_v21, %v4060_v21 }
 0x59e   : > { %4068 = vadd.xlane.f32.xlu2 %v4064_v38 }
 0x59f   : > { %v4044_v52 = vpop.f32.mrf.mxu3 }
 0x5a0   : > { %v4045_v37 = vadd.f32 %v4044_v52, %v4026_v51 }
 0x5a2   : > { %4053 = vst [vmem:[%s349_s29 + $0x8] sm:$0xff] %v4045_v37  ;;  %v4061_v4 = vsub.f32 %v4045_v37, %v4057_v36 }
 0x5a4   : > { %v4065_v19 = vmul.f32 %v4061_v4, %v4061_v4 }
 0x5a6   : > { %4070 = vadd.xlane.f32.xlu0 %v4065_v19 }
 0x5a7   : > { %v4047_v0 = vpop.f32.mrf.mxu3 }
 0x5a8   : > { %v4048_v61 = vadd.f32 %v4047_v0, %v4029_v3  ;;  %v6467_v3 = vmov 32.0  }
 0x5aa   : > { %4054 = vst [vmem:[%s349_s29 + $0x10] sm:$0xff] %v4048_v61  ;;  %v4062_v46 = vsub.f32 %v4048_v61, %v4058_v15 }
 0x5ac   : > { %v4066_v40 = vmul.f32 %v4062_v46, %v4062_v46 }
 0x5ae   : > { %4072 = vadd.xlane.f32.xlu1 %v4066_v40 }
 0x5af   : > { %v4049_v25 = vpop.f32.mrf.mxu3 }
 0x5b0   : > { %v4050_v62 = vadd.f32 %v4049_v25, %v4031_v42 }
 0x5b2   : > { %4055 = vst [vmem:[%s349_s29 + $0x18] sm:$0xff] %v4050_v62  ;;  %v4063_v30 = vsub.f32 %v4050_v62, %v4059_v28 }
 0x5b4   : > { %v4067_v27 = vmul.f32 %v4063_v30, %v4063_v30 }
 0x5b6   : > { %4074 = vadd.xlane.f32.xlu2 %v4067_v27 }
 0x611   : > { %v4069_v58 = vpop.xlane.xlu2 %4068 }
 0x612   : > { %6281 = vrsqrt.f32 %v4069_v58  ;;  %vm4083_vm1 = vcmp.eq.f32.partialorder %v4069_v58, inf  ;;  %v4086_v45 = vand.u32 2147483648, %v4069_v58  ;;  %vm4085_vm4 = vcmp.eq.f32.partialorder %v4069_v58, 0.0 }
 0x618   : > { %v6282_v23 = vpop.eup %6281 }
 0x619   : > { %v4071_v7 = vpop.xlane.xlu0 %4070  ;;  %v4077_v53 = vmul.f32 %v6282_v23, %v4069_v58 }
 0x61a   : > { %6283 = vrsqrt.f32 %v4071_v7  ;;  %vm4095_vm0 = vcmp.eq.f32.partialorder %v4071_v7, inf  ;;  %v4098_v57 = vand.u32 2147483648, %v4071_v7  ;;  %vm4097_vm3 = vcmp.eq.f32.partialorder %v4071_v7, 0.0 }
 0x61b   : > { %v4078_v29 = vmul.f32 %v6282_v23, %v4077_v53 }
 0x61d   : > { %v4079_v26 = vmul.f32 0.5, %v4078_v29 }
 0x61f   : > { %v4080_v2 = vsub.f32 1.5, %v4079_v26 }
 0x620   : > { %v6284_v34 = vpop.eup %6283 }
 0x621   : > { %v4089_v48 = vmul.f32 %v6284_v34, %v4071_v7  ;;  %v4073_v24 = vpop.xlane.xlu1 %4072  ;;  %v4081_v60 = vmul.f32 %v6282_v23, %v4080_v2 }
 0x622   : > { %6285 = vrsqrt.f32 %v4073_v24  ;;  %vm4107_vm2 = vcmp.eq.f32.partialorder %v4073_v24, inf  ;;  %v4110_v56 = vand.u32 2147483648, %v4073_v24  ;;  %vm4109_vm5 = vcmp.eq.f32.partialorder %v4073_v24, 0.0 }
 0x623   : > { %v4090_v10 = vmul.f32 %v6284_v34, %v4089_v48  ;;  %v4082_v20 = vmul.f32 %v4081_v60, %v4069_v58 }
 0x625   : > { %v4091_v18 = vmul.f32 0.5, %v4090_v10  ;;  %v4084_v1 = vsel %vm4083_vm1, %v4069_v58, %v4082_v20 }
 0x626   : > { %v4087_v54 = vsel %vm4085_vm4, %v4086_v45, %v4084_v1 }
 0x627   : > { %v4092_v11 = vsub.f32 1.5, %v4091_v18  ;;  %v4125_v21 = vsel %vm4124_vm6, %v4087_v54, 0.0 }
 0x628   : > { %v6286_v47 = vpop.eup %6285 }
 0x629   : > { %v4101_v16 = vmul.f32 %v6286_v47, %v4073_v24  ;;  %v4075_v12 = vpop.xlane.xlu2 %4074  ;;  %v4093_v35 = vmul.f32 %v6284_v34, %v4092_v11 }
 0x62a   : > { %6287 = vrsqrt.f32 %v4075_v12  ;;  %vm4119_vm7 = vcmp.eq.f32.partialorder %v4075_v12, inf  ;;  %v4122_v51 = vand.u32 2147483648, %v4075_v12  ;;  %vm4121_vm8 = vcmp.eq.f32.partialorder %v4075_v12, 0.0 }
 0x62b   : > { %v4102_v33 = vmul.f32 %v6286_v47, %v4101_v16  ;;  %v4094_v43 = vmul.f32 %v4093_v35, %v4071_v7  ;;  %6289 = vrcp.f32 %v6467_v3 }
 0x62d   : > { %v4103_v22 = vmul.f32 0.5, %v4102_v33  ;;  %v4096_v8 = vsel %vm4095_vm0, %v4071_v7, %v4094_v43 }
 0x62e   : > { %v4099_v55 = vsel %vm4097_vm3, %v4098_v57, %v4096_v8 }
 0x62f   : > { %v4104_v17 = vsub.f32 1.5, %v4103_v22  ;;  %v4126_v14 = vsel %vm4124_vm6, %v4099_v55, 0.0 }
 0x630   : > { %v6288_v63 = vpop.eup %6287  ;;  %v4127_v52 = vadd.f32 %v4126_v14, %v4125_v21 }
 0x631   : > { %v4105_v32 = vmul.f32 %v6286_v47, %v4104_v17  ;;  %v4113_v50 = vmul.f32 %v6288_v63, %v4075_v12  ;;  %v6290_v0 = vpop.eup %6289 }
 0x632   : > { %v4142_v15 = vmul.f32 32.0, %v6290_v0  ;;  %vm4146_vm9 = vweird.f32 %v6290_v0 }
 0x633   : > { %v4106_v41 = vmul.f32 %v4105_v32, %v4073_v24  ;;  %v4114_v49 = vmul.f32 %v6288_v63, %v4113_v50 }
 0x634   : > { %v4143_v61 = vsub.f32 1.0, %v4142_v15 }
 0x635   : > { %v4108_v5 = vsel %vm4107_vm2, %v4073_v24, %v4106_v41  ;;  %v4115_v59 = vmul.f32 0.5, %v4114_v49 }
 0x636   : > { %v4111_v9 = vsel %vm4109_vm5, %v4110_v56, %v4108_v5  ;;  %v4144_v42 = vmul.f32 %v6290_v0, %v4143_v61 }
 0x637   : > { %v4116_v6 = vsub.f32 1.5, %v4115_v59  ;;  %v4128_v38 = vsel %vm4124_vm6, %v4111_v9, 0.0 }
 0x638   : > { %v4129_v44 = vadd.f32 %v4128_v38, %v4127_v52  ;;  %v4145_v62 = vadd.f32 %v6290_v0, %v4144_v42 }
 0x639   : > { %v4117_v13 = vmul.f32 %v6288_v63, %v4116_v6 }
 0x63a   : > { %v4147_v58 = vsel %vm4146_vm9, %v6290_v0, %v4145_v62 }
 0x63b   : > { %v4118_v31 = vmul.f32 %v4117_v13, %v4075_v12 }
 0x63d   : > { %v4120_v36 = vsel %vm4119_vm7, %v4075_v12, %v4118_v31 }
 0x63e   : > { %v4123_v37 = vsel %vm4121_vm8, %v4122_v51, %v4120_v36 }
 0x63f   : > { %v4130_v4 = vsel %vm4124_vm6, %v4123_v37, 0.0 }
 0x640   : > { %v4131_v19 = vadd.f32 %v4130_v4, %v4129_v44 }
 0x642   : > { %4132 = vadd.xlane.f32.xlu2 %v4131_v19 }
 0x6b5   : > { %v4133_v46 = vpop.xlane.xlu2 %4132 }
 0x6b6   : > { %v4134_v39 = vrot.slane %v4133_v46, 4 }
 0x6b8   : > { %v4135_v40 = vadd.f32 %v4134_v39, %v4133_v46 }
 0x6ba   : > { %v4136_v25 = vrot.slane %v4135_v40, 2 }
 0x6bc   : > { %v4137_v28 = vadd.f32 %v4136_v25, %v4135_v40 }
 0x6be   : > { %v4138_v30 = vrot.slane %v4137_v28, 1 }
 0x6c0   : > { %v4139_v27 = vadd.f32 %v4138_v30, %v4137_v28 }
 0x6c2   : > { %6189 = vpush %v4139_v27 }
 0x6c3   : > { %6191 = vpush %v4147_v58 }
 0x6f3   : > { %s6190_s7 = spop %6189 }
 0x6f4   : > { %s6192_s10 = spop %6191 }
 0x6f5   : > { %s4149_s15 = smul.f32 %s6192_s10, %s6190_s7 }
 0x6f7   : > { %v4150_v7 = vstv %s4149_s15 }
 0x6f8   : > { %4152 = vst.msk [vmem:[%s352_s14] sm:$0x1] %vm4151_vm10, %v4150_v7 }
 0x6f9 PF: > { %p19_p1 = scmp.ge.s32.totalorder %s6565_s8, 10   ;;  %s7155_s21 = smov %s6445_s22 }
 0x6fa   : > { %s7156_s22 = smov %s6449_s23  ;;  %s7157_s23 = smov %s6575_s12 }
 0x6fb   : > { %s7158_s24 = smov %s6565_s8  ;;  %21 = sbr.rel (!%p19_p1) target bundleno = 5 (0x5), region = 112 }
 0x700   :  { %4186 = vsyncpa [#allocation3], 1 }
 0x701   :  { %4188 = vsyncpa [#allocation3 + $0x1], 1 }
 0x702   :  { %4189 = vsyncpa [#allocation5], 1 }
 0x703   :  { %4190 = vsyncpa [#allocation8], 1 }

</bundles_post_ra>
